<compile_context>
chip_gen: v5e
topology: v5e:2x2
jax: 0.10.0
libtpu: 0.0.40
codegen_flags: <defaults>
</compile_context>

<pallas_src>
import jax
import jax.numpy as jnp
from jax.experimental import pallas as pl
from jax.experimental.pallas import tpu as pltpu

# Logical layer widths and their lane-padded (multiple-of-128) counterparts.
DIMS = [28 * 28, 500, 256, 100, 256, 500, 28 * 28]   # 784,500,256,100,256,500,784
PADDED = [896, 512, 256, 128, 256, 512, 896]


def _round_up(x, m):
    return (x + m - 1) // m * m


# ---------------------------------------------------------------------------
# Kernel: all six linear layers fused; padded bf16 weights fully VMEM-resident.
# ---------------------------------------------------------------------------
def autoencoder_kernel(x_ref,
                       w1_ref, b1_ref,
                       w2_ref, b2_ref,
                       w3_ref, b3_ref,
                       w4_ref, b4_ref,
                       w5_ref, b5_ref,
                       w6_ref, b6_ref,
                       o_ref):
    def layer(h_bf16, w_ref, b_ref):
        # bf16 x bf16 MXU matmul, fp32 accumulation, fp32 bias add,
        # ReLU fused with the downcast back to bf16 for the next layer.
        y = jnp.dot(h_bf16, w_ref[...],
                    preferred_element_type=jnp.float32) + b_ref[...]
        return jnp.maximum(y, 0.0).astype(jnp.bfloat16)

    h = x_ref[...]                        # (TB, 896) bf16
    h = layer(h, w1_ref, b1_ref)          # (TB, 512) bf16
    h = layer(h, w2_ref, b2_ref)          # (TB, 256)
    h = layer(h, w3_ref, b3_ref)          # (TB, 128)
    h = layer(h, w4_ref, b4_ref)          # (TB, 256)
    h = layer(h, w5_ref, b5_ref)          # (TB, 512)
    # Final layer: no ReLU; store lane-dense bf16 (upcast on host if needed).
    y = jnp.dot(h, w6_ref[...],
                preferred_element_type=jnp.float32) + b6_ref[...]
    o_ref[...] = y.astype(o_ref.dtype)    # (TB, 896)


# ---------------------------------------------------------------------------
# Host wrapper: pads batch + features, tiles the batch, slices the result back.
# ---------------------------------------------------------------------------
def _pick_tile_b(B, max_tile=256, sublane=16):
    """Adaptive batch tile: sublane-aligned, MXU-filling for big batches,
    and >=2 grid tiles for mid-size batches so both v7x TensorCores are used."""
    if B > 2 * max_tile:
        return max_tile
    if B <= sublane:
        return sublane
    # Split into (about) two tiles; keep each tile sublane-aligned for bf16.
    half = -(-B // 2)                     # cdiv(B, 2)
    return min(max_tile, _round_up(half, sublane))


def autoencoder_forward(x, padded_params, *, tile_b=None):
    """x: (B, 784) float32. padded_params: list of 6 (W (in_p,out_p) bf16, b (1,out_p) f32)."""
    B, F = x.shape
    assert F == DIMS[0]

    if tile_b is None:
        tile_b = _pick_tile_b(B)
    Bp = _round_up(max(B, 1), tile_b)
    Fin, Fout = PADDED[0], PADDED[-1]

    # Zero-pad batch rows and feature lanes; cast input to bf16 for the MXU.
    x_pad = jnp.zeros((Bp, Fin), jnp.bfloat16)
    x_pad = x_pad.at[:B, :F].set(x.astype(jnp.bfloat16))

    def const_spec(shape):
        # Constant operand: same block every grid step -> single-buffer it.
        return pl.BlockSpec(shape, lambda i: (0, 0),
                            pipeline_mode=pl.Buffered(1))

    flat_params = []
    in_specs = [pl.BlockSpec((tile_b, Fin), lambda i: (i, 0))]     # x: tiled over batch
    for (w, b) in padded_params:
        flat_params.append(w)
        flat_params.append(b)
        in_specs.append(const_spec(w.shape))                       # resident weight
        in_specs.append(const_spec(b.shape))                       # resident bias

    # Advisory cost estimate so XLA schedules around the kernel (helps v5e most).
    flops = 2 * Bp * sum(PADDED[i] * PADDED[i + 1] for i in range(6))
    weight_bytes = sum(int(w.size) * w.dtype.itemsize + int(b.size) * b.dtype.itemsize
                       for (w, b) in padded_params)
    bytes_accessed = int(x_pad.size) * 2 + Bp * Fout * 2 + weight_bytes

    out = pl.pallas_call(
        autoencoder_kernel,
        out_shape=jax.ShapeDtypeStruct((Bp, Fout), jnp.bfloat16),
        grid=(Bp // tile_b,),
        in_specs=in_specs,
        out_specs=pl.BlockSpec((tile_b, Fout), lambda i: (i, 0)),
        compiler_params=pltpu.CompilerParams(
            dimension_semantics=("parallel",),
            vmem_limit_bytes=32 * 1024 * 1024),
        cost_estimate=pl.CostEstimate(flops=flops, transcendentals=0,
                                      bytes_accessed=bytes_accessed),
    )(x_pad, *flat_params)

    # Drop batch and lane padding; upcast to f32 for downstream consumers.
    return out[:B, :DIMS[-1]].astype(jnp.float32)


# ---------------------------------------------------------------------------
# Deterministic synthetic parameter init (PyTorch Linear shapes: (out, in)),
# then zero-padded to lane multiples and cast to bf16 for the kernel.
# ---------------------------------------------------------------------------
def init_params(key):
    params = []
    for i in range(6):
        fan_in, fan_out = DIMS[i], DIMS[i + 1]
        key, kw, kb = jax.random.split(key, 3)
        bound = 1.0 / float(fan_in) ** 0.5
        w_torch = jax.random.uniform(kw, (fan_out, fan_in), jnp.float32,
                                     minval=-bound, maxval=bound)
        b_torch = jax.random.uniform(kb, (fan_out,), jnp.float32,
                                     minval=-bound, maxval=bound)
        params.append((w_torch, b_torch))
    return params


def pad_params(params):
    padded = []
    for i, (w_torch, b_torch) in enumerate(params):
        in_p, out_p = PADDED[i], PADDED[i + 1]
        fan_out, fan_in = w_torch.shape
        w = jnp.zeros((in_p, out_p), jnp.float32)
        w = w.at[:fan_in, :fan_out].set(jnp.transpose(w_torch))     # (in, out) layout
        b = jnp.zeros((1, out_p), jnp.float32)
        b = b.at[0, :fan_out].set(b_torch)
        padded.append((w.astype(jnp.bfloat16), b))                  # bf16 W, f32 b
    return padded


def reference_forward(x, padded_params):
    """Pure-jnp reference following the same bf16-input / f32-accumulate path."""
    h = jnp.zeros((x.shape[0], PADDED[0]), jnp.float32).at[:, :DIMS[0]].set(x)
    for i, (w, b) in enumerate(padded_params):
        h = jnp.dot(h.astype(jnp.bfloat16), w,
                    preferred_element_type=jnp.float32) + b
        if i < 5:
            h = jnp.maximum(h, 0.0)
    return h[:, :DIMS[-1]]


if __name__ == "__main__":
    key = jax.random.PRNGKey(0)
    kx, kp = jax.random.split(key)

    B = 8
    x = jax.random.normal(kx, (B, 28, 28), jnp.float32)
    raw_params = init_params(kp)
    padded_params = pad_params(raw_params)

    x_flat = x.reshape(-1, 28 * 28)                   # matches x.view(-1, 784)
    out = autoencoder_forward(x_flat, padded_params)
    out = jax.block_until_ready(out)

    ref = reference_forward(x_flat, padded_params)
    assert out.shape == (B, 28 * 28)
    max_err = float(jnp.max(jnp.abs(out - ref)))
    assert jnp.allclose(out, ref, atol=2e-2, rtol=2e-2), f"mismatch vs reference ({max_err})"

    print("KERNEL_OK")
</pallas_src>

<mosaic_0001>
module attributes {stable_mosaic.version = 11 : i64} {
  func.func @autoencoder_kernel(%arg0: i32, %arg1: memref<16x896xbf16, #tpu.memory_space<vmem>>, %arg2: memref<896x512xbf16, #tpu.memory_space<vmem>>, %arg3: memref<1x512xf32, #tpu.memory_space<vmem>>, %arg4: memref<512x256xbf16, #tpu.memory_space<vmem>>, %arg5: memref<1x256xf32, #tpu.memory_space<vmem>>, %arg6: memref<256x128xbf16, #tpu.memory_space<vmem>>, %arg7: memref<1x128xf32, #tpu.memory_space<vmem>>, %arg8: memref<128x256xbf16, #tpu.memory_space<vmem>>, %arg9: memref<1x256xf32, #tpu.memory_space<vmem>>, %arg10: memref<256x512xbf16, #tpu.memory_space<vmem>>, %arg11: memref<1x512xf32, #tpu.memory_space<vmem>>, %arg12: memref<512x896xbf16, #tpu.memory_space<vmem>>, %arg13: memref<1x896xf32, #tpu.memory_space<vmem>>, %arg14: memref<16x896xbf16, #tpu.memory_space<vmem>>) attributes {dimension_semantics = [#tpu.dimension_semantics<parallel>], iteration_bounds = array<i64: 1>, scalar_prefetch = 0 : i64, scratch_operands = 0 : i64, tpu.core_type = #tpu.core_type<tc>, window_params = [{transform_indices = @transform_0, window_bounds = array<i64: 16, 896>}, {pipeline_mode = #tpu.pipeline_mode<synchronous>, transform_indices = @transform_1, window_bounds = array<i64: 896, 512>}, {pipeline_mode = #tpu.pipeline_mode<synchronous>, transform_indices = @transform_2, window_bounds = array<i64: 1, 512>}, {pipeline_mode = #tpu.pipeline_mode<synchronous>, transform_indices = @transform_3, window_bounds = array<i64: 512, 256>}, {pipeline_mode = #tpu.pipeline_mode<synchronous>, transform_indices = @transform_4, window_bounds = array<i64: 1, 256>}, {pipeline_mode = #tpu.pipeline_mode<synchronous>, transform_indices = @transform_5, window_bounds = array<i64: 256, 128>}, {pipeline_mode = #tpu.pipeline_mode<synchronous>, transform_indices = @transform_6, window_bounds = array<i64: 1, 128>}, {pipeline_mode = #tpu.pipeline_mode<synchronous>, transform_indices = @transform_7, window_bounds = array<i64: 128, 256>}, {pipeline_mode = #tpu.pipeline_mode<synchronous>, transform_indices = @transform_8, window_bounds = array<i64: 1, 256>}, {pipeline_mode = #tpu.pipeline_mode<synchronous>, transform_indices = @transform_9, window_bounds = array<i64: 256, 512>}, {pipeline_mode = #tpu.pipeline_mode<synchronous>, transform_indices = @transform_10, window_bounds = array<i64: 1, 512>}, {pipeline_mode = #tpu.pipeline_mode<synchronous>, transform_indices = @transform_11, window_bounds = array<i64: 512, 896>}, {pipeline_mode = #tpu.pipeline_mode<synchronous>, transform_indices = @transform_12, window_bounds = array<i64: 1, 896>}, {transform_indices = @transform_13, window_bounds = array<i64: 16, 896>}]} {
    %c0 = arith.constant 0 : index
    %c0_0 = arith.constant 0 : index
    %0 = vector.load %arg1[%c0, %c0_0] : memref<16x896xbf16, #tpu.memory_space<vmem>>, vector<16x896xbf16>
    %c0_1 = arith.constant 0 : index
    %c0_2 = arith.constant 0 : index
    %1 = vector.load %arg2[%c0_1, %c0_2] : memref<896x512xbf16, #tpu.memory_space<vmem>>, vector<896x512xbf16>
    %cst = arith.constant dense<0.000000e+00> : vector<16x512xf32>
    %2 = tpu.matmul %0, %1, %cst {dimension_numbers = #tpu.dot_dimension_numbers<[1], [0], [0], [1], [0, 0, 1, 1], [], []>} : vector<16x896xbf16>, vector<896x512xbf16>, vector<16x512xf32> -> vector<16x512xf32>
    %c0_3 = arith.constant 0 : index
    %c0_4 = arith.constant 0 : index
    %3 = vector.load %arg3[%c0_3, %c0_4] : memref<1x512xf32, #tpu.memory_space<vmem>>, vector<1x512xf32>
    %4 = vector.broadcast %3 : vector<1x512xf32> to vector<16x512xf32>
    %5 = arith.addf %2, %4 : vector<16x512xf32>
    %cst_5 = arith.constant 0.000000e+00 : f32
    %6 = vector.broadcast %cst_5 : f32 to vector<16x512xf32>
    %7 = arith.maximumf %5, %6 : vector<16x512xf32>
    %8 = arith.truncf %7 : vector<16x512xf32> to vector<16x512xbf16>
    %c0_6 = arith.constant 0 : index
    %c0_7 = arith.constant 0 : index
    %9 = vector.load %arg4[%c0_6, %c0_7] : memref<512x256xbf16, #tpu.memory_space<vmem>>, vector<512x256xbf16>
    %cst_8 = arith.constant dense<0.000000e+00> : vector<16x256xf32>
    %10 = tpu.matmul %8, %9, %cst_8 {dimension_numbers = #tpu.dot_dimension_numbers<[1], [0], [0], [1], [0, 0, 1, 1], [], []>} : vector<16x512xbf16>, vector<512x256xbf16>, vector<16x256xf32> -> vector<16x256xf32>
    %c0_9 = arith.constant 0 : index
    %c0_10 = arith.constant 0 : index
    %11 = vector.load %arg5[%c0_9, %c0_10] : memref<1x256xf32, #tpu.memory_space<vmem>>, vector<1x256xf32>
    %12 = vector.broadcast %11 : vector<1x256xf32> to vector<16x256xf32>
    %13 = arith.addf %10, %12 : vector<16x256xf32>
    %cst_11 = arith.constant 0.000000e+00 : f32
    %14 = vector.broadcast %cst_11 : f32 to vector<16x256xf32>
    %15 = arith.maximumf %13, %14 : vector<16x256xf32>
    %16 = arith.truncf %15 : vector<16x256xf32> to vector<16x256xbf16>
    %c0_12 = arith.constant 0 : index
    %c0_13 = arith.constant 0 : index
    %17 = vector.load %arg6[%c0_12, %c0_13] : memref<256x128xbf16, #tpu.memory_space<vmem>>, vector<256x128xbf16>
    %cst_14 = arith.constant dense<0.000000e+00> : vector<16x128xf32>
    %18 = tpu.matmul %16, %17, %cst_14 {dimension_numbers = #tpu.dot_dimension_numbers<[1], [0], [0], [1], [0, 0, 1, 1], [], []>} : vector<16x256xbf16>, vector<256x128xbf16>, vector<16x128xf32> -> vector<16x128xf32>
    %c0_15 = arith.constant 0 : index
    %c0_16 = arith.constant 0 : index
    %19 = vector.load %arg7[%c0_15, %c0_16] : memref<1x128xf32, #tpu.memory_space<vmem>>, vector<1x128xf32>
    %20 = vector.broadcast %19 : vector<1x128xf32> to vector<16x128xf32>
    %21 = arith.addf %18, %20 : vector<16x128xf32>
    %cst_17 = arith.constant 0.000000e+00 : f32
    %22 = vector.broadcast %cst_17 : f32 to vector<16x128xf32>
    %23 = arith.maximumf %21, %22 : vector<16x128xf32>
    %24 = arith.truncf %23 : vector<16x128xf32> to vector<16x128xbf16>
    %c0_18 = arith.constant 0 : index
    %c0_19 = arith.constant 0 : index
    %25 = vector.load %arg8[%c0_18, %c0_19] : memref<128x256xbf16, #tpu.memory_space<vmem>>, vector<128x256xbf16>
    %cst_20 = arith.constant dense<0.000000e+00> : vector<16x256xf32>
    %26 = tpu.matmul %24, %25, %cst_20 {dimension_numbers = #tpu.dot_dimension_numbers<[1], [0], [0], [1], [0, 0, 1, 1], [], []>} : vector<16x128xbf16>, vector<128x256xbf16>, vector<16x256xf32> -> vector<16x256xf32>
    %c0_21 = arith.constant 0 : index
    %c0_22 = arith.constant 0 : index
    %27 = vector.load %arg9[%c0_21, %c0_22] : memref<1x256xf32, #tpu.memory_space<vmem>>, vector<1x256xf32>
    %28 = vector.broadcast %27 : vector<1x256xf32> to vector<16x256xf32>
    %29 = arith.addf %26, %28 : vector<16x256xf32>
    %cst_23 = arith.constant 0.000000e+00 : f32
    %30 = vector.broadcast %cst_23 : f32 to vector<16x256xf32>
    %31 = arith.maximumf %29, %30 : vector<16x256xf32>
    %32 = arith.truncf %31 : vector<16x256xf32> to vector<16x256xbf16>
    %c0_24 = arith.constant 0 : index
    %c0_25 = arith.constant 0 : index
    %33 = vector.load %arg10[%c0_24, %c0_25] : memref<256x512xbf16, #tpu.memory_space<vmem>>, vector<256x512xbf16>
    %cst_26 = arith.constant dense<0.000000e+00> : vector<16x512xf32>
    %34 = tpu.matmul %32, %33, %cst_26 {dimension_numbers = #tpu.dot_dimension_numbers<[1], [0], [0], [1], [0, 0, 1, 1], [], []>} : vector<16x256xbf16>, vector<256x512xbf16>, vector<16x512xf32> -> vector<16x512xf32>
    %c0_27 = arith.constant 0 : index
    %c0_28 = arith.constant 0 : index
    %35 = vector.load %arg11[%c0_27, %c0_28] : memref<1x512xf32, #tpu.memory_space<vmem>>, vector<1x512xf32>
    %36 = vector.broadcast %35 : vector<1x512xf32> to vector<16x512xf32>
    %37 = arith.addf %34, %36 : vector<16x512xf32>
    %cst_29 = arith.constant 0.000000e+00 : f32
    %38 = vector.broadcast %cst_29 : f32 to vector<16x512xf32>
    %39 = arith.maximumf %37, %38 : vector<16x512xf32>
    %40 = arith.truncf %39 : vector<16x512xf32> to vector<16x512xbf16>
    %c0_30 = arith.constant 0 : index
    %c0_31 = arith.constant 0 : index
    %41 = vector.load %arg12[%c0_30, %c0_31] : memref<512x896xbf16, #tpu.memory_space<vmem>>, vector<512x896xbf16>
    %cst_32 = arith.constant dense<0.000000e+00> : vector<16x896xf32>
    %42 = tpu.matmul %40, %41, %cst_32 {dimension_numbers = #tpu.dot_dimension_numbers<[1], [0], [0], [1], [0, 0, 1, 1], [], []>} : vector<16x512xbf16>, vector<512x896xbf16>, vector<16x896xf32> -> vector<16x896xf32>
    %c0_33 = arith.constant 0 : index
    %c0_34 = arith.constant 0 : index
    %43 = vector.load %arg13[%c0_33, %c0_34] : memref<1x896xf32, #tpu.memory_space<vmem>>, vector<1x896xf32>
    %44 = vector.broadcast %43 : vector<1x896xf32> to vector<16x896xf32>
    %45 = arith.addf %42, %44 : vector<16x896xf32>
    %46 = arith.truncf %45 : vector<16x896xf32> to vector<16x896xbf16>
    %c0_35 = arith.constant 0 : index
    %c0_36 = arith.constant 0 : index
    %47 = vector.load %arg14[%c0_35, %c0_36] : memref<16x896xbf16, #tpu.memory_space<vmem>>, vector<16x896xbf16>
    tpu.vector_store %arg14[%c0_35, %c0_36], %46 {strides = array<i32>} : memref<16x896xbf16, #tpu.memory_space<vmem>>, vector<16x896xbf16>,
    return
  }
  func.func @transform_0(%arg0: i32) -> (i32, i32) {
    %c0_i32 = arith.constant 0 : i32
    %c0_i32_0 = arith.constant 0 : i32
    return %arg0, %c0_i32 : i32, i32
  }
  func.func @transform_1(%arg0: i32) -> (i32, i32) {
    %c0_i32 = arith.constant 0 : i32
    %c0_i32_0 = arith.constant 0 : i32
    %c0_i32_1 = arith.constant 0 : i32
    return %c0_i32, %c0_i32_0 : i32, i32
  }
  func.func @transform_2(%arg0: i32) -> (i32, i32) {
    %c0_i32 = arith.constant 0 : i32
    %c0_i32_0 = arith.constant 0 : i32
    %c0_i32_1 = arith.constant 0 : i32
    return %c0_i32, %c0_i32_0 : i32, i32
  }
  func.func @transform_3(%arg0: i32) -> (i32, i32) {
    %c0_i32 = arith.constant 0 : i32
    %c0_i32_0 = arith.constant 0 : i32
    %c0_i32_1 = arith.constant 0 : i32
    return %c0_i32, %c0_i32_0 : i32, i32
  }
  func.func @transform_4(%arg0: i32) -> (i32, i32) {
    %c0_i32 = arith.constant 0 : i32
    %c0_i32_0 = arith.constant 0 : i32
    %c0_i32_1 = arith.constant 0 : i32
    return %c0_i32, %c0_i32_0 : i32, i32
  }
  func.func @transform_5(%arg0: i32) -> (i32, i32) {
    %c0_i32 = arith.constant 0 : i32
    %c0_i32_0 = arith.constant 0 : i32
    %c0_i32_1 = arith.constant 0 : i32
    return %c0_i32, %c0_i32_0 : i32, i32
  }
  func.func @transform_6(%arg0: i32) -> (i32, i32) {
    %c0_i32 = arith.constant 0 : i32
    %c0_i32_0 = arith.constant 0 : i32
    %c0_i32_1 = arith.constant 0 : i32
    return %c0_i32, %c0_i32_0 : i32, i32
  }
  func.func @transform_7(%arg0: i32) -> (i32, i32) {
    %c0_i32 = arith.constant 0 : i32
    %c0_i32_0 = arith.constant 0 : i32
    %c0_i32_1 = arith.constant 0 : i32
    return %c0_i32, %c0_i32_0 : i32, i32
  }
  func.func @transform_8(%arg0: i32) -> (i32, i32) {
    %c0_i32 = arith.constant 0 : i32
    %c0_i32_0 = arith.constant 0 : i32
    %c0_i32_1 = arith.constant 0 : i32
    return %c0_i32, %c0_i32_0 : i32, i32
  }
  func.func @transform_9(%arg0: i32) -> (i32, i32) {
    %c0_i32 = arith.constant 0 : i32
    %c0_i32_0 = arith.constant 0 : i32
    %c0_i32_1 = arith.constant 0 : i32
    return %c0_i32, %c0_i32_0 : i32, i32
  }
  func.func @transform_10(%arg0: i32) -> (i32, i32) {
    %c0_i32 = arith.constant 0 : i32
    %c0_i32_0 = arith.constant 0 : i32
    %c0_i32_1 = arith.constant 0 : i32
    return %c0_i32, %c0_i32_0 : i32, i32
  }
  func.func @transform_11(%arg0: i32) -> (i32, i32) {
    %c0_i32 = arith.constant 0 : i32
    %c0_i32_0 = arith.constant 0 : i32
    %c0_i32_1 = arith.constant 0 : i32
    return %c0_i32, %c0_i32_0 : i32, i32
  }
  func.func @transform_12(%arg0: i32) -> (i32, i32) {
    %c0_i32 = arith.constant 0 : i32
    %c0_i32_0 = arith.constant 0 : i32
    %c0_i32_1 = arith.constant 0 : i32
    return %c0_i32, %c0_i32_0 : i32, i32
  }
  func.func @transform_13(%arg0: i32) -> (i32, i32) {
    %c0_i32 = arith.constant 0 : i32
    %c0_i32_0 = arith.constant 0 : i32
    return %arg0, %c0_i32 : i32, i32
  }
}

</mosaic_0001>

<bundles_post_ra>
// kernel: tpu_custom_call.1
= control target key start
LH: loop header
LB: loop body
LE: loop exit
PB: predicated region body
PF: predicated region fallthrough
CT: control target
= control target key end

     0   :  { %18 = vsyncpa [#allocation3], 0  ;;  %s8869_s0 = inlined_call_operand.hbm [shape: bf16[16,896], index: 0, kind: input, shape index: {}]   ;;  %s8870_s1 = inlined_call_operand.hbm [shape: bf16[896,512], index: 1, kind: input, shape index: {}]   ;;  %s8871_s2 = inlined_call_operand.hbm [shape: f32[1,512], index: 2, kind: input, shape index: {}]   ;;  %s8872_s3 = inlined_call_operand.hbm [shape: bf16[512,256], index: 3, kind: input, shape index: {}]   ;;  %s8873_s4 = inlined_call_operand.hbm [shape: f32[1,256], index: 4, kind: input, shape index: {}]   ;;  %s8874_s5 = inlined_call_operand.hbm [shape: bf16[256,128], index: 5, kind: input, shape index: {}]   ;;  %s8875_s6 = inlined_call_operand.hbm [shape: f32[1,128], index: 6, kind: input, shape index: {}]   ;;  %s8876_s7 = inlined_call_operand.hbm [shape: bf16[128,256], index: 7, kind: input, shape index: {}]   ;;  %s8877_s8 = inlined_call_operand.hbm [shape: f32[1,256], index: 8, kind: input, shape index: {}]   ;;  %s8878_s9 = inlined_call_operand.hbm [shape: bf16[256,512], index: 9, kind: input, shape index: {}]   ;;  %s8879_s10 = inlined_call_operand.vmem [shape: f32[1,512], index: 10, kind: input, shape index: {}]   ;;  %s8880_s11 = inlined_call_operand.hbm [shape: bf16[512,896], index: 11, kind: input, shape index: {}]   ;;  %s8881_s12 = inlined_call_operand.vmem [shape: f32[1,896], index: 12, kind: input, shape index: {}]   ;;  %s8882_s13 = inlined_call_operand.hbm [shape: bf16[16,896], index: 13, kind: output, shape index: {}]  }
   0x1   :  { %19 = vsyncpa [#allocation6], 0 }
   0x2   :  { %20 = vsyncpa [#allocation9], 0 }
   0x3   :  { %21 = vsyncpa [#allocation12], 0 }
   0x4   :  { %22 = vsyncpa [#allocation15], 0 }
   0x5   :  { %23 = vsyncpa [#allocation18], 0  ;;  %s42_s27 = sshll.u32 %s8870_s1, 4  ;;  %s43_s27 = int_to_ptr.hbm [resolvable:$true] %s42_s27 }
   0x6   :  { %24 = vsyncpa [#allocation4], 0  ;;  %s8589_s28 = smov [#allocation5]   ;;  %s66_s15 = sshll.u32 %s8872_s3, 4  ;;  %s67_s15 = int_to_ptr.hbm [resolvable:$true] %s66_s15 }
   0x7   :  { %s44_s29 = sshll.u32 %s8589_s28, 4  ;;  %s8590_s16 = smov 256   ;;  %s45_s29 = int_to_ptr.vmem [resolvable:$true] %s44_s29 }
   0x8   :  { %s8591_s17 = smov 16   ;;  %s8592_s18 = smov [#allocation8]  }
   0x9   :  { %50 = dma.hbm_to_vmem [thread:$0]  %s43_s27, 28672, %s45_s29, [#allocation6], %s8590_s16, %s8590_s16, %s8591_s17  }
   0xa   :  { %s68_s19 = sshll.u32 %s8592_s18, 4  ;;  %s8593_s1 = smov 128   ;;  %s69_s19 = int_to_ptr.vmem [resolvable:$true] %s68_s19 }
   0xb   :  { %s8594_s20 = smov 8   ;;  %s90_s23 = sshll.u32 %s8874_s5, 4  ;;  %s91_s23 = int_to_ptr.hbm [resolvable:$true] %s90_s23 }
   0xc   :  { %74 = dma.hbm_to_vmem [thread:$0]  %s67_s15, 8192, %s69_s19, [#allocation9], %s8593_s1, %s8593_s1, %s8594_s20  }
   0xd   :  { %s8595_s24 = smov [#allocation11]   ;;  %s114_s28 = sshll.u32 %s8876_s7, 4  ;;  %s115_s28 = int_to_ptr.hbm [resolvable:$true] %s114_s28 }
   0xe   :  { %s92_s3 = sshll.u32 %s8595_s24, 4  ;;  %s8596_s27 = smov 64   ;;  %s93_s3 = int_to_ptr.vmem [resolvable:$true] %s92_s3 }
   0xf   :  { %s8597_s29 = smov 4   ;;  %s8598_s30 = smov [#allocation14]  }
  0x10   :  { %98 = dma.hbm_to_vmem [thread:$0]  %s91_s23, 2048, %s93_s3, [#allocation12], %s8596_s27, %s8596_s27, %s8597_s29  }
  0x11   :  { %s116_s14 = sshll.u32 %s8598_s30, 4  ;;  %s138_s19 = sshll.u32 %s8878_s9, 4  ;;  %s117_s14 = int_to_ptr.vmem [resolvable:$true] %s116_s14  ;;  %s139_s19 = int_to_ptr.hbm [resolvable:$true] %s138_s19 }
  0x12   :  { %122 = dma.hbm_to_vmem [thread:$0]  %s115_s28, 2048, %s117_s14, [#allocation15], %s8593_s1, %s8593_s1, %s8594_s20  }
  0x13   :  { %s29_s22 = sshll.u32 %s8869_s0, 4  ;;  %s8599_s24 = smov [#allocation17]   ;;  %s30_s22 = int_to_ptr.hbm [resolvable:$true] %s29_s22 }
  0x14   :  { %s140_s25 = sshll.u32 %s8599_s24, 4  ;;  %s8600_s7 = smov [#allocation2]   ;;  %s141_s25 = int_to_ptr.vmem [resolvable:$true] %s140_s25 }
  0x15   :  { %146 = dma.hbm_to_vmem [thread:$0]  %s139_s19, 8192, %s141_s25, [#allocation18], %s8590_s16, %s8590_s16, %s8591_s17  }
  0x16   :  { %s31_s23 = sshll.u32 %s8600_s7, 4  ;;  %s8601_s3 = smov 448   ;;  %s32_s23 = int_to_ptr.vmem [resolvable:$true] %s31_s23 }
  0x17   :  { %s8602_s9 = smov 28   ;;  %s56_s0 = sshll.u32 %s8871_s2, 4  ;;  %s57_s0 = int_to_ptr.hbm [resolvable:$true] %s56_s0 }
  0x18   :  { %37 = dma.hbm_to_vmem [thread:$0]  %s30_s22, 896, %s32_s23, [#allocation3], %s8601_s3, %s8601_s3, %s8602_s9  }
  0x19   :  { %s8603_s26 = smov [#allocation7]   ;;  %s80_s16 = sshll.u32 %s8873_s4, 4  ;;  %s81_s16 = int_to_ptr.hbm [resolvable:$true] %s80_s16 }
  0x1a   :  { %s58_s28 = sshll.u32 %s8603_s26, 4  ;;  %s8604_s17 = smov [#allocation10]   ;;  %s59_s28 = int_to_ptr.vmem [resolvable:$true] %s58_s28 }
  0x1b   :  { %61 = dma.hbm_to_vmem [thread:$0]  %s57_s0, 64, %s59_s28, [#allocation6]  }
  0x1c   :  { %s82_s30 = sshll.u32 %s8604_s17, 4  ;;  %s104_s15 = sshll.u32 %s8875_s6, 4  ;;  %s83_s30 = int_to_ptr.vmem [resolvable:$true] %s82_s30  ;;  %s105_s15 = int_to_ptr.hbm [resolvable:$true] %s104_s15 }
  0x1d   :  { %85 = dma.hbm_to_vmem [thread:$0]  %s81_s16, 32, %s83_s30, [#allocation9]  }
  0x1e   :  { %s128_s5 = sshll.u32 %s8877_s8, 4  ;;  %s8605_s21 = smov [#allocation13]   ;;  %s129_s5 = int_to_ptr.hbm [resolvable:$true] %s128_s5 }
  0x1f   :  { %s106_s22 = sshll.u32 %s8605_s21, 4  ;;  %s8606_s4 = smov [#allocation16]   ;;  %s107_s22 = int_to_ptr.vmem [resolvable:$true] %s106_s22 }
  0x20   :  { %109 = dma.hbm_to_vmem [thread:$0]  %s105_s15, 16, %s107_s22, [#allocation12]  }
  0x21   :  { %s130_s24 = sshll.u32 %s8606_s4, 4  ;;  %s153_s23 = sshll.u32 %s8880_s11, 4  ;;  %s131_s24 = int_to_ptr.vmem [resolvable:$true] %s130_s24  ;;  %s154_s23 = int_to_ptr.hbm [resolvable:$true] %s153_s23 }
  0x22   :  { %133 = dma.hbm_to_vmem [thread:$0]  %s129_s5, 32, %s131_s24, [#allocation15]  }
  0x23   :  { %s8607_s6 = smov [#allocation19]  }
  0x24   :  { %s155_s1 = sshll.u32 %s8607_s6, 4  ;;  %s156_s1 = int_to_ptr.vmem [resolvable:$true] %s155_s1 }
  0x25   :  { %161 = dma.hbm_to_vmem [thread:$0]  %s154_s23, 28672, %s156_s1, [#allocation18], %s8601_s3, %s8601_s3, %s8602_s9  }
  0x26   :  { %8575 = dma.done.wait [#allocation3], 896  }
  0x27   :  { %8576 = vsyncadd [#allocation3], 4294966400 }
  0x28   :  { %8577 = dma.done.wait [#allocation6], 28736  }
  0x29   :  { %8578 = vsyncadd [#allocation6], 4294938560 }
  0x2a   :  { %8579 = dma.done.wait [#allocation9], 8224  }
  0x2b   :  { %8580 = vsyncadd [#allocation9], 4294959072 }
  0x2c   :  { %8581 = dma.done.wait [#allocation12], 2064  }
  0x2d   :  { %8582 = vsyncadd [#allocation12], 4294965232 }
  0x2e   :  { %8583 = dma.done.wait [#allocation15], 2080  }
  0x2f   :  { %8584 = vsyncadd [#allocation15], 4294965216 }
  0x30   :  { %8585 = dma.done.wait [#allocation18], 36864  }
  0x31   :  { %8586 = vsyncadd [#allocation18], 4294930432  ;;  %v5333_v0 = vld [vmem:[#allocation5 + $0xe0] sm:$0xf]  ;;  %v7688_v1 = vld [vmem:[#allocation5 + $0xec] sm:$0xf0] }
  0x32   :  { %v5461_v2 = vld [vmem:[#allocation5 + $0x1e0] sm:$0xf]  ;;  %v5334_v3 = vor.u32 %v7688_v1, %v5333_v0  ;;  %v7720_v4 = vld [vmem:[#allocation5 + $0x1ec] sm:$0xf0]  ;;  %s5173_s27 = sshll.u32 %s8882_s13, 4  ;;  %s5174_s27 = int_to_ptr.hbm [resolvable:$true] %s5173_s27 }
  0x33   :  { %v5589_v5 = vld [vmem:[#allocation5 + $0x2e0] sm:$0xf]  ;;  %v7752_v6 = vld [vmem:[#allocation5 + $0x2ec] sm:$0xf0]  ;;  %v5462_v7 = vor.u32 %v7720_v4, %v5461_v2 }
  0x34   :  { %v5590_v8 = vor.u32 %v7752_v6, %v5589_v5  ;;  %v5717_v9 = vld [vmem:[#allocation5 + $0x3e0] sm:$0xf]  ;;  %v7784_v10 = vld [vmem:[#allocation5 + $0x3ec] sm:$0xf0]  ;;  %1606 = vmatpush.bf16.msra.mxu0 %v5334_v3 }
  0x35   :  { %v5317_v11 = vld [vmem:[#allocation5 + $0xc0] sm:$0xf]  ;;  %v5718_v12 = vor.u32 %v7784_v10, %v5717_v9  ;;  %v7684_v13 = vld [vmem:[#allocation5 + $0xcc] sm:$0xf0]  ;;  %1620 = vmatpush.bf16.msra.mxu1 %v5462_v7 }
  0x36   :  { %v5445_v14 = vld [vmem:[#allocation5 + $0x1c0] sm:$0xf]  ;;  %v7716_v15 = vld [vmem:[#allocation5 + $0x1cc] sm:$0xf0]  ;;  %1634 = vmatpush.bf16.msra.mxu2 %v5590_v8  ;;  %v5318_v16 = vor.u32 %v7684_v13, %v5317_v11 }
  0x37   :  { %v5446_v17 = vor.u32 %v7716_v15, %v5445_v14  ;;  %v5573_v18 = vld [vmem:[#allocation5 + $0x2c0] sm:$0xf]  ;;  %v7748_v19 = vld [vmem:[#allocation5 + $0x2cc] sm:$0xf0]  ;;  %1648 = vmatpush.bf16.msra.mxu3 %v5718_v12 }
  0x38   :  { %v5701_v20 = vld [vmem:[#allocation5 + $0x3c0] sm:$0xf]  ;;  %v5574_v21 = vor.u32 %v7748_v19, %v5573_v18  ;;  %v7780_v22 = vld [vmem:[#allocation5 + $0x3cc] sm:$0xf0]  ;;  %1607 = vmatpush.bf16.msra.mxu0 %v5318_v16 }
  0x39   :  { %v5301_v23 = vld [vmem:[#allocation5 + $0xa0] sm:$0xf]  ;;  %v7680_v24 = vld [vmem:[#allocation5 + $0xac] sm:$0xf0]  ;;  %v5702_v25 = vor.u32 %v7780_v22, %v5701_v20  ;;  %1621 = vmatpush.bf16.msra.mxu1 %v5446_v17 }
  0x3a   :  { %v5429_v26 = vld [vmem:[#allocation5 + $0x1a0] sm:$0xf]  ;;  %v7712_v27 = vld [vmem:[#allocation5 + $0x1ac] sm:$0xf0]  ;;  %v5302_v29 = vor.u32 %v7680_v24, %v5301_v23  ;;  %1635 = vmatpush.bf16.msra.mxu2 %v5574_v21 }
  0x3b   :  { %v5557_v28 = vld [vmem:[#allocation5 + $0x2a0] sm:$0xf]  ;;  %v7744_v30 = vld [vmem:[#allocation5 + $0x2ac] sm:$0xf0]  ;;  %v5430_v33 = vor.u32 %v7712_v27, %v5429_v26  ;;  %1649 = vmatpush.bf16.msra.mxu3 %v5702_v25 }
  0x3c   :  { %v5685_v31 = vld [vmem:[#allocation5 + $0x3a0] sm:$0xf]  ;;  %v7776_v32 = vld [vmem:[#allocation5 + $0x3ac] sm:$0xf0]  ;;  %v5558_v34 = vor.u32 %v7744_v30, %v5557_v28  ;;  %1608 = vmatpush.bf16.msra.mxu0 %v5302_v29 }
  0x3d   :  { %v5285_v35 = vld [vmem:[#allocation5 + $0x80] sm:$0xf]  ;;  %v7676_v36 = vld [vmem:[#allocation5 + $0x8c] sm:$0xf0]  ;;  %v5686_v38 = vor.u32 %v7776_v32, %v5685_v31  ;;  %1622 = vmatpush.bf16.msra.mxu1 %v5430_v33 }
  0x3e   :  { %v5413_v37 = vld [vmem:[#allocation5 + $0x180] sm:$0xf]  ;;  %v7708_v39 = vld [vmem:[#allocation5 + $0x18c] sm:$0xf0]  ;;  %v5286_v44 = vor.u32 %v7676_v36, %v5285_v35  ;;  %1636 = vmatpush.bf16.msra.mxu2 %v5558_v34 }
  0x3f   :  { %v5541_v40 = vld [vmem:[#allocation5 + $0x280] sm:$0xf]  ;;  %v7740_v41 = vld [vmem:[#allocation5 + $0x28c] sm:$0xf0]  ;;  %v5414_v45 = vor.u32 %v7708_v39, %v5413_v37  ;;  %1650 = vmatpush.bf16.msra.mxu3 %v5686_v38  ;;  %v7686_v37 = vld [vmem:[#allocation5 + $0xe4] sm:$0xf] }
  0x40   :  { %v5669_v42 = vld [vmem:[#allocation5 + $0x380] sm:$0xf]  ;;  %v7772_v43 = vld [vmem:[#allocation5 + $0x38c] sm:$0xf0]  ;;  %v5542_v46 = vor.u32 %v7740_v41, %v5541_v40  ;;  %1609 = vmatpush.bf16.msra.mxu0 %v5286_v44  ;;  %v5335_v38 = vld [vmem:[#allocation5 + $0xf0] sm:$0xf0] }
  0x41   :  { %v5269_v47 = vld [vmem:[#allocation5 + $0x60] sm:$0xf]  ;;  %v7672_v48 = vld [vmem:[#allocation5 + $0x6c] sm:$0xf0]  ;;  %v5670_v50 = vor.u32 %v7772_v43, %v5669_v42  ;;  %1623 = vmatpush.bf16.msra.mxu1 %v5414_v45 }
  0x42   :  { %v5397_v49 = vld [vmem:[#allocation5 + $0x160] sm:$0xf]  ;;  %v7704_v51 = vld [vmem:[#allocation5 + $0x16c] sm:$0xf0]  ;;  %v5270_v56 = vor.u32 %v7672_v48, %v5269_v47  ;;  %1637 = vmatpush.bf16.msra.mxu2 %v5542_v46  ;;  %v5338_v48 = vor.u32 %v7686_v37, %v5335_v38 }
  0x43   :  { %v5525_v52 = vld [vmem:[#allocation5 + $0x260] sm:$0xf]  ;;  %v7736_v53 = vld [vmem:[#allocation5 + $0x26c] sm:$0xf0]  ;;  %v5398_v57 = vor.u32 %v7704_v51, %v5397_v49  ;;  %1651 = vmatpush.bf16.msra.mxu3 %v5670_v50  ;;  %v7682_v50 = vld [vmem:[#allocation5 + $0xc4] sm:$0xf] }
  0x44   :  { %v5653_v54 = vld [vmem:[#allocation5 + $0x360] sm:$0xf]  ;;  %v7768_v55 = vld [vmem:[#allocation5 + $0x36c] sm:$0xf0]  ;;  %v5526_v58 = vor.u32 %v7736_v53, %v5525_v52  ;;  %1610 = vmatpush.bf16.msra.mxu0 %v5270_v56  ;;  %v5319_v51 = vld [vmem:[#allocation5 + $0xd0] sm:$0xf0] }
  0x45   :  { %v5253_v59 = vld [vmem:[#allocation5 + $0x40] sm:$0xf]  ;;  %v7668_v60 = vld [vmem:[#allocation5 + $0x4c] sm:$0xf0]  ;;  %v5654_v62 = vor.u32 %v7768_v55, %v5653_v54  ;;  %1624 = vmatpush.bf16.msra.mxu1 %v5398_v57  ;;  %v5193_v52 = vld [vmem:[#allocation2] sm:$0xf] }
  0x46   :  { %v5381_v61 = vld [vmem:[#allocation5 + $0x140] sm:$0xf]  ;;  %v7700_v63 = vld [vmem:[#allocation5 + $0x14c] sm:$0xf0]  ;;  %v5254_v4 = vor.u32 %v7668_v60, %v5253_v59  ;;  %1638 = vmatpush.bf16.msra.mxu2 %v5526_v58  ;;  %v7654_v53 = vld [vmem:[#allocation2 + $0x18] sm:$0xf0] }
  0x47   :  { %v5509_v0 = vld [vmem:[#allocation5 + $0x240] sm:$0xf]  ;;  %v7732_v1 = vld [vmem:[#allocation5 + $0x24c] sm:$0xf0]  ;;  %v5382_v5 = vor.u32 %v7700_v63, %v5381_v61  ;;  %1652 = vmatpush.bf16.msra.mxu3 %v5654_v62  ;;  %v8724_v57 = vor.u32 %v7654_v53, %v5193_v52  ;;  %v7655_v58 = vld [vmem:[#allocation2 + $0x20] sm:$0xf0] }
  0x48   :  { %v5637_v2 = vld [vmem:[#allocation5 + $0x340] sm:$0xf]  ;;  %v7764_v3 = vld [vmem:[#allocation5 + $0x34c] sm:$0xf0]  ;;  %v5510_v6 = vor.u32 %v7732_v1, %v5509_v0  ;;  %1611 = vmatpush.bf16.msra.mxu0 %v5254_v4  ;;  %v5322_v1 = vor.u32 %v7682_v50, %v5319_v51  ;;  %v7678_v4 = vld [vmem:[#allocation5 + $0xa4] sm:$0xf] }
  0x49   :  { %v5237_v7 = vld [vmem:[#allocation5 + $0x20] sm:$0xf]  ;;  %v7664_v8 = vld [vmem:[#allocation5 + $0x2c] sm:$0xf0]  ;;  %v5638_v10 = vor.u32 %v7764_v3, %v5637_v2  ;;  %1625 = vmatpush.bf16.msra.mxu1 %v5382_v5  ;;  %v5303_v5 = vld [vmem:[#allocation5 + $0xb0] sm:$0xf0] }
  0x4a   :  { %v5365_v9 = vld [vmem:[#allocation5 + $0x120] sm:$0xf]  ;;  %v7696_v11 = vld [vmem:[#allocation5 + $0x12c] sm:$0xf0]  ;;  %v5238_v16 = vor.u32 %v7664_v8, %v5237_v7  ;;  %1639 = vmatpush.bf16.msra.mxu2 %v5510_v6  ;;  %v7651_v6 = vld [vmem:[#allocation2 + $0x4] sm:$0xf] }
  0x4b   :  { %v5493_v12 = vld [vmem:[#allocation5 + $0x220] sm:$0xf]  ;;  %v7728_v13 = vld [vmem:[#allocation5 + $0x22c] sm:$0xf0]  ;;  %v5366_v19 = vor.u32 %v7696_v11, %v5365_v9  ;;  %1653 = vmatpush.bf16.msra.mxu3 %v5638_v10  ;;  %v5195_v7 = vld [vmem:[#allocation2 + $0x1c] sm:$0xf0] }
  0x4c   :  { %v5621_v14 = vld [vmem:[#allocation5 + $0x320] sm:$0xf]  ;;  %v7760_v15 = vld [vmem:[#allocation5 + $0x32c] sm:$0xf0]  ;;  %v5494_v20 = vor.u32 %v7728_v13, %v5493_v12  ;;  %1612 = vmatpush.bf16.msra.mxu0 %v5238_v16  ;;  %v8730_v11 = vor.u32 %v7651_v6, %v5195_v7  ;;  %v7658_v7 = vld [vmem:[#allocation5 + $0x4] sm:$0xf] }
  0x4d   :  { %v5221_v17 = vld [vmem:[#allocation5] sm:$0xf]  ;;  %v7660_v18 = vld [vmem:[#allocation5 + $0xc] sm:$0xf0]  ;;  %v5622_v24 = vor.u32 %v7760_v15, %v5621_v14  ;;  %1626 = vmatpush.bf16.msra.mxu1 %v5366_v19  ;;  %v7652_v19 = vld [vmem:[#allocation2 + $0xc] sm:$0xf] }
  0x4e   :  { %v5349_v21 = vld [vmem:[#allocation5 + $0x100] sm:$0xf]  ;;  %v7692_v22 = vld [vmem:[#allocation5 + $0x10c] sm:$0xf0]  ;;  %v5222_v31 = vor.u32 %v7660_v18, %v5221_v17  ;;  %1640 = vmatpush.bf16.msra.mxu2 %v5494_v20  ;;  %v5306_v17 = vor.u32 %v7678_v4, %v5303_v5 }
  0x4f   :  { %v5477_v23 = vld [vmem:[#allocation5 + $0x200] sm:$0xf]  ;;  %v7724_v25 = vld [vmem:[#allocation5 + $0x20c] sm:$0xf0]  ;;  %v5350_v35 = vor.u32 %v7692_v22, %v5349_v21  ;;  %1654 = vmatpush.bf16.msra.mxu3 %v5622_v24  ;;  %v7674_v21 = vld [vmem:[#allocation5 + $0x84] sm:$0xf] }
  0x50   :  { %v5605_v26 = vld [vmem:[#allocation5 + $0x300] sm:$0xf]  ;;  %v7756_v27 = vld [vmem:[#allocation5 + $0x30c] sm:$0xf0]  ;;  %v5478_v36 = vor.u32 %v7724_v25, %v5477_v23  ;;  %1613 = vmatpush.bf16.msra.mxu0 %v5222_v31  ;;  %v5287_v22 = vld [vmem:[#allocation5 + $0x90] sm:$0xf0] }
  0x51   :  { %v5845_v28 = vld [vmem:[#allocation5 + $0x4e0] sm:$0xf]  ;;  %v7816_v29 = vld [vmem:[#allocation5 + $0x4ec] sm:$0xf0]  ;;  %v5606_v39 = vor.u32 %v7756_v27, %v5605_v26  ;;  %1627 = vmatpush.bf16.msra.mxu1 %v5350_v35  ;;  %v5271_v35 = vld [vmem:[#allocation5 + $0x70] sm:$0xf0] }
  0x52   :  { %v5973_v30 = vld [vmem:[#allocation5 + $0x5e0] sm:$0xf]  ;;  %v7848_v32 = vld [vmem:[#allocation5 + $0x5ec] sm:$0xf0]  ;;  %v5846_v40 = vor.u32 %v7816_v29, %v5845_v28  ;;  %1641 = vmatpush.bf16.msra.mxu2 %v5478_v36 }
  0x53   :  { %v6101_v33 = vld [vmem:[#allocation5 + $0x6e0] sm:$0xf]  ;;  %v7880_v34 = vld [vmem:[#allocation5 + $0x6ec] sm:$0xf0]  ;;  %v5974_v43 = vor.u32 %v7848_v32, %v5973_v30  ;;  %1655 = vmatpush.bf16.msra.mxu3 %v5606_v39  ;;  %1614 = vmatmul.bf16.vlgmr.msra.gmra.mxu0 %v8724_v57  ;;  %v5290_v30 = vor.u32 %v7674_v21, %v5287_v22  ;;  %v5209_v22 = vld [vmem:[#allocation2 + $0x10] sm:$0xf] }
  0x54   :  { %v5829_v41 = vld [vmem:[#allocation5 + $0x4c0] sm:$0xf]  ;;  %v7812_v42 = vld [vmem:[#allocation5 + $0x4cc] sm:$0xf0]  ;;  %v6102_v44 = vor.u32 %v7880_v34, %v6101_v33  ;;  %1662 = vmatpush.bf16.msrb.mxu0 %v5846_v40  ;;  %1628 = vmatmul.bf16.vlgmr.msra.gmra.mxu1 %v8730_v11  ;;  %v7670_v34 = vld [vmem:[#allocation5 + $0x64] sm:$0xf] }
  0x55   :  { %v5957_v45 = vld [vmem:[#allocation5 + $0x5c0] sm:$0xf]  ;;  %v7844_v46 = vld [vmem:[#allocation5 + $0x5cc] sm:$0xf0]  ;;  %v5830_v55 = vor.u32 %v7812_v42, %v5829_v41  ;;  %1676 = vmatpush.bf16.msrb.mxu1 %v5974_v43  ;;  %v5274_v42 = vor.u32 %v7670_v34, %v5271_v35  ;;  %v5447_v34 = vld [vmem:[#allocation5 + $0x1d0] sm:$0xf0] }
  0x56   :  { %v6085_v47 = vld [vmem:[#allocation5 + $0x6c0] sm:$0xf]  ;;  %v7876_v49 = vld [vmem:[#allocation5 + $0x6cc] sm:$0xf0]  ;;  %1690 = vmatpush.bf16.msrb.mxu2 %v6102_v44  ;;  %v5958_v59 = vor.u32 %v7844_v46, %v5957_v45  ;;  %v7666_v46 = vld [vmem:[#allocation5 + $0x44] sm:$0xf] }
  0x57   :  { %v5201_v54 = vld [vmem:[#allocation2 + $0x8] sm:$0xf]  ;;  %v5813_v56 = vld [vmem:[#allocation5 + $0x4a0] sm:$0xf]  ;;  %v6086_v60 = vor.u32 %v7876_v49, %v6085_v47  ;;  %1704 = vmatpush.bf16.msrb.mxu3 %v5338_v48  ;;  %v5255_v47 = vld [vmem:[#allocation5 + $0x50] sm:$0xf0] }
  0x58   :  { %v7808_v61 = vld [vmem:[#allocation5 + $0x4ac] sm:$0xf0]  ;;  %v5941_v62 = vld [vmem:[#allocation5 + $0x5a0] sm:$0xf]  ;;  %v8726_v0 = vor.u32 %v7655_v58, %v5201_v54  ;;  %1663 = vmatpush.bf16.msrb.mxu0 %v5830_v55  ;;  %v5258_v54 = vor.u32 %v7666_v46, %v5255_v47  ;;  %v7746_v35 = vld [vmem:[#allocation5 + $0x2c4] sm:$0xf] }
  0x59   :  { %v7840_v63 = vld [vmem:[#allocation5 + $0x5ac] sm:$0xf0]  ;;  %v6069_v2 = vld [vmem:[#allocation5 + $0x6a0] sm:$0xf]  ;;  %v5814_v8 = vor.u32 %v7808_v61, %v5813_v56  ;;  %1677 = vmatpush.bf16.msrb.mxu1 %v5958_v59  ;;  %v7662_v59 = vld [vmem:[#allocation5 + $0x24] sm:$0xf] }
  0x5a   :  { %v7872_v3 = vld [vmem:[#allocation5 + $0x6ac] sm:$0xf0]  ;;  %1642 = vmatmul.bf16.vlgmr.msra.gmra.mxu2 %v8726_v0  ;;  %v5797_v9 = vld [vmem:[#allocation5 + $0x480] sm:$0xf]  ;;  %v5942_v12 = vor.u32 %v7840_v63, %v5941_v62 }
  0x5b   :  { %v7804_v10 = vld [vmem:[#allocation5 + $0x48c] sm:$0xf0]  ;;  %1691 = vmatpush.bf16.msrb.mxu2 %v6086_v60  ;;  %v6070_v13 = vor.u32 %v7872_v3, %v6069_v2  ;;  %v5925_v14 = vld [vmem:[#allocation5 + $0x580] sm:$0xf]  ;;  %1705 = vmatpush.bf16.msrb.mxu3 %v5322_v1  ;;  %v5239_v60 = vld [vmem:[#allocation5 + $0x30] sm:$0xf0] }
  0x5c   :  { %v7836_v15 = vld [vmem:[#allocation5 + $0x58c] sm:$0xf0]  ;;  %v6053_v16 = vld [vmem:[#allocation5 + $0x680] sm:$0xf]  ;;  %1664 = vmatpush.bf16.msrb.mxu0 %v5814_v8  ;;  %v5798_v24 = vor.u32 %v7804_v10, %v5797_v9  ;;  %v5242_v8 = vor.u32 %v7662_v59, %v5239_v60  ;;  %v5223_v9 = vld [vmem:[#allocation5 + $0x10] sm:$0xf0] }
  0x5d   :  { %v7868_v18 = vld [vmem:[#allocation5 + $0x68c] sm:$0xf0]  ;;  %1678 = vmatpush.bf16.msrb.mxu1 %v5942_v12  ;;  %v5926_v25 = vor.u32 %v7836_v15, %v5925_v14  ;;  %v5781_v27 = vld [vmem:[#allocation5 + $0x460] sm:$0xf]  ;;  %v7718_v10 = vld [vmem:[#allocation5 + $0x1e4] sm:$0xf] }
  0x5e   :  { %v5203_v20 = vld [vmem:[#allocation2 + $0x24] sm:$0xf0]  ;;  %v6054_v26 = vor.u32 %v7868_v18, %v6053_v16  ;;  %v5909_v29 = vld [vmem:[#allocation5 + $0x560] sm:$0xf]  ;;  %v5463_v12 = vld [vmem:[#allocation5 + $0x1f0] sm:$0xf0] }
  0x5f   :  { %v8733_v23 = vor.u32 %v7652_v19, %v5203_v20  ;;  %1692 = vmatpush.bf16.msrb.mxu2 %v6070_v13  ;;  %v7800_v28 = vld [vmem:[#allocation5 + $0x46c] sm:$0xf0]  ;;  %1706 = vmatpush.bf16.msrb.mxu3 %v5306_v17  ;;  %v6037_v32 = vld [vmem:[#allocation5 + $0x660] sm:$0xf]  ;;  %v7750_v13 = vld [vmem:[#allocation5 + $0x2e4] sm:$0xf] }
  0x60   :  { %v7832_v31 = vld [vmem:[#allocation5 + $0x56c] sm:$0xf0]  ;;  %1665 = vmatpush.bf16.msrb.mxu0 %v5798_v24  ;;  %v5782_v36 = vor.u32 %v7800_v28, %v5781_v27  ;;  %v5765_v39 = vld [vmem:[#allocation5 + $0x440] sm:$0xf]  ;;  %v5591_v14 = vld [vmem:[#allocation5 + $0x2f0] sm:$0xf0]  ;;  %v5466_v27 = vor.u32 %v7718_v10, %v5463_v12 }
  0x61   :  { %v7864_v33 = vld [vmem:[#allocation5 + $0x66c] sm:$0xf0]  ;;  %1656 = vmatmul.bf16.vlgmr.msra.gmra.mxu3 %v8733_v23  ;;  %1679 = vmatpush.bf16.msrb.mxu1 %v5926_v25  ;;  %v5910_v37 = vor.u32 %v7832_v31, %v5909_v29  ;;  %v5893_v41 = vld [vmem:[#allocation5 + $0x540] sm:$0xf]  ;;  %v7782_v15 = vld [vmem:[#allocation5 + $0x3e4] sm:$0xf]  ;;  %v5594_v31 = vor.u32 %v7750_v13, %v5591_v14 }
  0x62   :  { %v6038_v38 = vor.u32 %v7864_v33, %v6037_v32  ;;  %v7796_v40 = vld [vmem:[#allocation5 + $0x44c] sm:$0xf0]  ;;  %v6021_v44 = vld [vmem:[#allocation5 + $0x640] sm:$0xf]  ;;  %v5719_v17 = vld [vmem:[#allocation5 + $0x3f0] sm:$0xf0] }
  0x63   :  { %1693 = vmatpush.bf16.msrb.mxu2 %v6054_v26  ;;  %1707 = vmatpush.bf16.msrb.mxu3 %v5290_v30  ;;  %v7828_v43 = vld [vmem:[#allocation5 + $0x54c] sm:$0xf0]  ;;  %v5766_v48 = vor.u32 %v7796_v40, %v5765_v39  ;;  %v5749_v51 = vld [vmem:[#allocation5 + $0x420] sm:$0xf]  ;;  %v7814_v18 = vld [vmem:[#allocation5 + $0x4e4] sm:$0xf]  ;;  %v5226_v26 = vor.u32 %v7658_v7, %v5223_v9  ;;  %v5722_v32 = vor.u32 %v7782_v15, %v5719_v17 }
  0x64   :  { %v7860_v45 = vld [vmem:[#allocation5 + $0x64c] sm:$0xf0]  ;;  %1666 = vmatpush.bf16.msrb.mxu0 %v5782_v36  ;;  %v5894_v49 = vor.u32 %v7828_v43, %v5893_v41  ;;  %v5877_v53 = vld [vmem:[#allocation5 + $0x520] sm:$0xf]  ;;  %v5847_v19 = vld [vmem:[#allocation5 + $0x4f0] sm:$0xf0] }
  0x65   :  { %1680 = vmatpush.bf16.msrb.mxu1 %v5910_v37  ;;  %v6022_v50 = vor.u32 %v7860_v45, %v6021_v44  ;;  %v7792_v52 = vld [vmem:[#allocation5 + $0x42c] sm:$0xf0]  ;;  %v6005_v56 = vld [vmem:[#allocation5 + $0x620] sm:$0xf]  ;;  %v7656_v24 = vld [vmem:[#allocation2 + $0x28] sm:$0xf0]  ;;  %v5850_v36 = vor.u32 %v7814_v18, %v5847_v19 }
  0x66   :  { %v7824_v55 = vld [vmem:[#allocation5 + $0x52c] sm:$0xf0]  ;;  %v5733_v61 = vld [vmem:[#allocation5 + $0x400] sm:$0xf]  ;;  %v5750_v62 = vor.u32 %v7792_v52, %v5749_v51  ;;  %v7657_v28 = vld [vmem:[#allocation2 + $0x30] sm:$0xf0]  ;;  %v8736_v37 = vor.u32 %v7656_v24, %v5209_v22 }
  0x67   :  { %1694 = vmatpush.bf16.msrb.mxu2 %v6038_v38  ;;  %1708 = vmatpush.bf16.msrb.mxu3 %v5274_v42  ;;  %v7856_v58 = vld [vmem:[#allocation5 + $0x62c] sm:$0xf0]  ;;  %v5861_v1 = vld [vmem:[#allocation5 + $0x500] sm:$0xf]  ;;  %v5878_v3 = vor.u32 %v7824_v55, %v5877_v53  ;;  %v7653_v29 = vld [vmem:[#allocation2 + $0x14] sm:$0xf] }
  0x68   :  { %1667 = vmatpush.bf16.msrb.mxu0 %v5766_v48  ;;  %v7788_v63 = vld [vmem:[#allocation5 + $0x40c] sm:$0xf0]  ;;  %v6006_v4 = vor.u32 %v7856_v58, %v6005_v56  ;;  %v5989_v5 = vld [vmem:[#allocation5 + $0x600] sm:$0xf]  ;;  %v5211_v30 = vld [vmem:[#allocation2 + $0x2c] sm:$0xf0] }
  0x69   :  { %v7820_v2 = vld [vmem:[#allocation5 + $0x50c] sm:$0xf0]  ;;  %1681 = vmatpush.bf16.msrb.mxu1 %v5894_v49  ;;  %v5734_v16 = vor.u32 %v7788_v63, %v5733_v61  ;;  %v5217_v25 = vld [vmem:[#allocation2 + $0x18] sm:$0xf]  ;;  %v7714_v33 = vld [vmem:[#allocation5 + $0x1c4] sm:$0xf]  ;;  %v8740_v42 = vor.u32 %v7653_v29, %v5211_v30 }
  0x6a   :  { %v7852_v6 = vld [vmem:[#allocation5 + $0x60c] sm:$0xf0]  ;;  %v5862_v20 = vor.u32 %v7820_v2, %v5861_v1  ;;  %v5575_v38 = vld [vmem:[#allocation5 + $0x2d0] sm:$0xf0]  ;;  %v7778_v39 = vld [vmem:[#allocation5 + $0x3c4] sm:$0xf]  ;;  %v8738_v41 = vor.u32 %v7657_v28, %v5217_v25  ;;  %v5450_v45 = vor.u32 %v7714_v33, %v5447_v34 }
  0x6b   :  { %1695 = vmatpush.bf16.msrb.mxu2 %v6022_v50  ;;  %1709 = vmatpush.bf16.msrb.mxu3 %v5258_v54  ;;  %v5990_v21 = vor.u32 %v7852_v6, %v5989_v5  ;;  %v5703_v40 = vld [vmem:[#allocation5 + $0x3d0] sm:$0xf0]  ;;  %v7810_v43 = vld [vmem:[#allocation5 + $0x4c4] sm:$0xf]  ;;  %v5578_v46 = vor.u32 %v7746_v35, %v5575_v38 }
  0x6c   :  { %1668 = vmatpush.bf16.msrb.mxu0 %v5750_v62  ;;  %v5831_v44 = vld [vmem:[#allocation5 + $0x4d0] sm:$0xf0]  ;;  %v5706_v47 = vor.u32 %v7778_v39, %v5703_v40  ;;  %v7710_v48 = vld [vmem:[#allocation5 + $0x1a4] sm:$0xf] }
  0x6d   :  { %1682 = vmatpush.bf16.msrb.mxu1 %v5878_v3  ;;  %v5431_v49 = vld [vmem:[#allocation5 + $0x1b0] sm:$0xf0]  ;;  %v7742_v50 = vld [vmem:[#allocation5 + $0x2a4] sm:$0xf]  ;;  %v5834_v51 = vor.u32 %v7810_v43, %v5831_v44 }
  0x6e   :  { %v5559_v52 = vld [vmem:[#allocation5 + $0x2b0] sm:$0xf0]  ;;  %v7774_v53 = vld [vmem:[#allocation5 + $0x3a4] sm:$0xf]  ;;  %v5434_v58 = vor.u32 %v7710_v48, %v5431_v49 }
  0x6f   :  { %1696 = vmatpush.bf16.msrb.mxu2 %v6006_v4  ;;  %1710 = vmatpush.bf16.msrb.mxu3 %v5242_v8  ;;  %v5687_v54 = vld [vmem:[#allocation5 + $0x3b0] sm:$0xf0]  ;;  %v7806_v55 = vld [vmem:[#allocation5 + $0x4a4] sm:$0xf]  ;;  %v5562_v59 = vor.u32 %v7742_v50, %v5559_v52 }
  0x70   :  { %1669 = vmatpush.bf16.msrb.mxu0 %v5734_v16  ;;  %v5815_v56 = vld [vmem:[#allocation5 + $0x4b0] sm:$0xf0]  ;;  %v5690_v60 = vor.u32 %v7774_v53, %v5687_v54  ;;  %v7706_v61 = vld [vmem:[#allocation5 + $0x184] sm:$0xf] }
  0x71   :  { %1683 = vmatpush.bf16.msrb.mxu1 %v5862_v20  ;;  %v5415_v62 = vld [vmem:[#allocation5 + $0x190] sm:$0xf0]  ;;  %v7738_v63 = vld [vmem:[#allocation5 + $0x284] sm:$0xf]  ;;  %v5818_v1 = vor.u32 %v7806_v55, %v5815_v56 }
  0x72   :  { %v5543_v2 = vld [vmem:[#allocation5 + $0x290] sm:$0xf0]  ;;  %v7770_v3 = vld [vmem:[#allocation5 + $0x384] sm:$0xf]  ;;  %v5418_v7 = vor.u32 %v7706_v61, %v5415_v62 }
  0x73   :  { %1697 = vmatpush.bf16.msrb.mxu2 %v5990_v21  ;;  %1711 = vmatpush.bf16.msrb.mxu3 %v5226_v26  ;;  %v5671_v4 = vld [vmem:[#allocation5 + $0x390] sm:$0xf0]  ;;  %v7802_v5 = vld [vmem:[#allocation5 + $0x484] sm:$0xf]  ;;  %v5546_v8 = vor.u32 %v7738_v63, %v5543_v2 }
  0x74   :  { %1718 = vmatpush.bf16.msra.mxu0 %v5466_v27  ;;  %1684 = vmatmul.bf16.vlgmr.msrb.gmra.mxu1 %v8740_v42  ;;  %v5799_v6 = vld [vmem:[#allocation5 + $0x490] sm:$0xf0]  ;;  %v5674_v9 = vor.u32 %v7770_v3, %v5671_v4  ;;  %v7702_v10 = vld [vmem:[#allocation5 + $0x164] sm:$0xf]  ;;  %v5341_v3 = vld [vmem:[#allocation5 + $0xe8] sm:$0xf] }
  0x75   :  { %1732 = vmatpush.bf16.msra.mxu1 %v5594_v31  ;;  %1670 = vmatmul.bf16.vlgmr.msrb.gmra.mxu0 %v8736_v37  ;;  %v5399_v12 = vld [vmem:[#allocation5 + $0x170] sm:$0xf0]  ;;  %v7734_v13 = vld [vmem:[#allocation5 + $0x264] sm:$0xf]  ;;  %v5802_v14 = vor.u32 %v7802_v5, %v5799_v6  ;;  %v7689_v4 = vld [vmem:[#allocation5 + $0xf4] sm:$0xf0] }
  0x76   :  { %1698 = vmatmul.bf16.vlgmr.msrb.gmra.mxu2 %v8738_v41  ;;  %1712 = vmatmul.bf16.vlgmr.msrb.gmra.mxu3 %v8724_v57  ;;  %v5527_v15 = vld [vmem:[#allocation5 + $0x270] sm:$0xf0]  ;;  %v7766_v16 = vld [vmem:[#allocation5 + $0x364] sm:$0xf]  ;;  %v5402_v20 = vor.u32 %v7702_v10, %v5399_v12 }
  0x77   :  { %1746 = vmatpush.bf16.msra.mxu2 %v5722_v32  ;;  %1760 = vmatpush.bf16.msra.mxu3 %v5850_v36  ;;  %v5655_v17 = vld [vmem:[#allocation5 + $0x370] sm:$0xf0]  ;;  %v7798_v18 = vld [vmem:[#allocation5 + $0x464] sm:$0xf]  ;;  %v5530_v21 = vor.u32 %v7734_v13, %v5527_v15  ;;  %v5342_v13 = vor.u32 %v7689_v4, %v5341_v3 }
  0x78   :  { %1719 = vmatpush.bf16.msra.mxu0 %v5450_v45  ;;  %v5783_v19 = vld [vmem:[#allocation5 + $0x470] sm:$0xf0]  ;;  %v5658_v22 = vor.u32 %v7766_v16, %v5655_v17  ;;  %v7698_v24 = vld [vmem:[#allocation5 + $0x144] sm:$0xf] }
  0x79   :  { %1733 = vmatpush.bf16.msra.mxu1 %v5578_v46  ;;  %v5383_v25 = vld [vmem:[#allocation5 + $0x150] sm:$0xf0]  ;;  %v7730_v26 = vld [vmem:[#allocation5 + $0x244] sm:$0xf]  ;;  %v5786_v27 = vor.u32 %v7798_v18, %v5783_v19  ;;  %v5325_v19 = vld [vmem:[#allocation5 + $0xc8] sm:$0xf] }
  0x7a   :  { %v5511_v28 = vld [vmem:[#allocation5 + $0x250] sm:$0xf0]  ;;  %v7762_v29 = vld [vmem:[#allocation5 + $0x344] sm:$0xf]  ;;  %v5386_v33 = vor.u32 %v7698_v24, %v5383_v25 }
  0x7b   :  { %1747 = vmatpush.bf16.msra.mxu2 %v5706_v47  ;;  %1761 = vmatpush.bf16.msra.mxu3 %v5834_v51  ;;  %v5639_v30 = vld [vmem:[#allocation5 + $0x350] sm:$0xf0]  ;;  %v7794_v31 = vld [vmem:[#allocation5 + $0x444] sm:$0xf]  ;;  %v5514_v34 = vor.u32 %v7730_v26, %v5511_v28 }
  0x7c   :  { %1720 = vmatpush.bf16.msra.mxu0 %v5434_v58  ;;  %v5767_v32 = vld [vmem:[#allocation5 + $0x450] sm:$0xf0]  ;;  %v5642_v35 = vor.u32 %v7762_v29, %v5639_v30  ;;  %v7694_v36 = vld [vmem:[#allocation5 + $0x124] sm:$0xf] }
  0x7d   :  { %1734 = vmatpush.bf16.msra.mxu1 %v5562_v59  ;;  %v5367_v38 = vld [vmem:[#allocation5 + $0x130] sm:$0xf0]  ;;  %v7726_v39 = vld [vmem:[#allocation5 + $0x224] sm:$0xf]  ;;  %v5770_v40 = vor.u32 %v7794_v31, %v5767_v32  ;;  %v5309_v32 = vld [vmem:[#allocation5 + $0xa8] sm:$0xf] }
  0x7e   :  { %v5495_v43 = vld [vmem:[#allocation5 + $0x230] sm:$0xf0]  ;;  %v7758_v44 = vld [vmem:[#allocation5 + $0x324] sm:$0xf]  ;;  %v5370_v48 = vor.u32 %v7694_v36, %v5367_v38 }
  0x7f   :  { %1748 = vmatpush.bf16.msra.mxu2 %v5690_v60  ;;  %1762 = vmatpush.bf16.msra.mxu3 %v5818_v1  ;;  %v5623_v45 = vld [vmem:[#allocation5 + $0x330] sm:$0xf0]  ;;  %v7790_v46 = vld [vmem:[#allocation5 + $0x424] sm:$0xf]  ;;  %v5498_v51 = vor.u32 %v7726_v39, %v5495_v43 }
  0x80   :  { %1721 = vmatpush.bf16.msra.mxu0 %v5418_v7  ;;  %v5751_v47 = vld [vmem:[#allocation5 + $0x430] sm:$0xf0]  ;;  %v7690_v49 = vld [vmem:[#allocation5 + $0x104] sm:$0xf]  ;;  %v5626_v52 = vor.u32 %v7758_v44, %v5623_v45  ;;  %v5469_v7 = vld [vmem:[#allocation5 + $0x1e8] sm:$0xf] }
  0x81   :  { %1735 = vmatpush.bf16.msra.mxu1 %v5546_v8  ;;  %v5351_v50 = vld [vmem:[#allocation5 + $0x110] sm:$0xf0]  ;;  %v7722_v53 = vld [vmem:[#allocation5 + $0x204] sm:$0xf]  ;;  %v5754_v56 = vor.u32 %v7790_v46, %v5751_v47  ;;  %v7721_v8 = vld [vmem:[#allocation5 + $0x1f4] sm:$0xf0] }
  0x82   :  { %v5479_v54 = vld [vmem:[#allocation5 + $0x210] sm:$0xf0]  ;;  %v7754_v55 = vld [vmem:[#allocation5 + $0x304] sm:$0xf]  ;;  %v5354_v1 = vor.u32 %v7690_v49, %v5351_v50  ;;  %v5470_v17 = vor.u32 %v7721_v8, %v5469_v7  ;;  %v5293_v47 = vld [vmem:[#allocation5 + $0x88] sm:$0xf] }
  0x83   :  { %1749 = vmatpush.bf16.msra.mxu2 %v5674_v9  ;;  %1763 = vmatpush.bf16.msra.mxu3 %v5802_v14  ;;  %v5607_v58 = vld [vmem:[#allocation5 + $0x310] sm:$0xf0]  ;;  %v7786_v59 = vld [vmem:[#allocation5 + $0x404] sm:$0xf]  ;;  %v5482_v5 = vor.u32 %v7722_v53, %v5479_v54  ;;  %v5421_v49 = vld [vmem:[#allocation5 + $0x188] sm:$0xf] }
  0x84   :  { %1722 = vmatpush.bf16.msra.mxu0 %v5402_v20  ;;  %v5735_v60 = vld [vmem:[#allocation5 + $0x410] sm:$0xf0]  ;;  %v7846_v61 = vld [vmem:[#allocation5 + $0x5e4] sm:$0xf]  ;;  %v5610_v6 = vor.u32 %v7754_v55, %v5607_v58  ;;  %v7685_v20 = vld [vmem:[#allocation5 + $0xd4] sm:$0xf0] }
  0x85   :  { %1736 = vmatpush.bf16.msra.mxu1 %v5530_v21  ;;  %v5975_v62 = vld [vmem:[#allocation5 + $0x5f0] sm:$0xf0]  ;;  %v7878_v63 = vld [vmem:[#allocation5 + $0x6e4] sm:$0xf]  ;;  %v5738_v9 = vor.u32 %v7786_v59, %v5735_v60  ;;  %v5453_v21 = vld [vmem:[#allocation5 + $0x1c8] sm:$0xf]  ;;  %v5326_v26 = vor.u32 %v7685_v20, %v5325_v19 }
  0x86   :  { %v6103_v2 = vld [vmem:[#allocation5 + $0x6f0] sm:$0xf0]  ;;  %v5978_v10 = vor.u32 %v7846_v61, %v5975_v62  ;;  %v7842_v14 = vld [vmem:[#allocation5 + $0x5c4] sm:$0xf]  ;;  %v7709_v50 = vld [vmem:[#allocation5 + $0x194] sm:$0xf0] }
  0x87   :  { %1750 = vmatpush.bf16.msra.mxu2 %v5658_v22  ;;  %1764 = vmatpush.bf16.msra.mxu3 %v5786_v27  ;;  %v6106_v12 = vor.u32 %v7878_v63, %v6103_v2  ;;  %v5959_v15 = vld [vmem:[#allocation5 + $0x5d0] sm:$0xf0]  ;;  %v7874_v16 = vld [vmem:[#allocation5 + $0x6c4] sm:$0xf]  ;;  %v7717_v22 = vld [vmem:[#allocation5 + $0x1d4] sm:$0xf0]  ;;  %v5422_v58 = vor.u32 %v7709_v50, %v5421_v49 }
  0x88   :  { %1723 = vmatpush.bf16.msra.mxu0 %v5386_v33  ;;  %v6087_v18 = vld [vmem:[#allocation5 + $0x6d0] sm:$0xf0]  ;;  %v5962_v24 = vor.u32 %v7842_v14, %v5959_v15  ;;  %v7838_v27 = vld [vmem:[#allocation5 + $0x5a4] sm:$0xf]  ;;  %v5454_v30 = vor.u32 %v7717_v22, %v5453_v21  ;;  %v7681_v33 = vld [vmem:[#allocation5 + $0xb4] sm:$0xf0] }
  0x89   :  { %1737 = vmatpush.bf16.msra.mxu1 %v5514_v34  ;;  %v6090_v25 = vor.u32 %v7874_v16, %v6087_v18  ;;  %v5943_v28 = vld [vmem:[#allocation5 + $0x5b0] sm:$0xf0]  ;;  %v7870_v29 = vld [vmem:[#allocation5 + $0x6a4] sm:$0xf]  ;;  %v5437_v34 = vld [vmem:[#allocation5 + $0x1a8] sm:$0xf]  ;;  %v5310_v39 = vor.u32 %v7681_v33, %v5309_v32 }
  0x8a   :  { %v6071_v31 = vld [vmem:[#allocation5 + $0x6b0] sm:$0xf0]  ;;  %v5946_v36 = vor.u32 %v7838_v27, %v5943_v28  ;;  %v7866_v44 = vld [vmem:[#allocation5 + $0x684] sm:$0xf]  ;;  %v5277_v60 = vld [vmem:[#allocation5 + $0x68] sm:$0xf] }
  0x8b   :  { %1751 = vmatpush.bf16.msra.mxu2 %v5642_v35  ;;  %1765 = vmatpush.bf16.msra.mxu3 %v5770_v40  ;;  %v7713_v35 = vld [vmem:[#allocation5 + $0x1b4] sm:$0xf0]  ;;  %v6074_v38 = vor.u32 %v7870_v29, %v6071_v31  ;;  %v7834_v40 = vld [vmem:[#allocation5 + $0x584] sm:$0xf]  ;;  %v5927_v43 = vld [vmem:[#allocation5 + $0x590] sm:$0xf0] }
  0x8c   :  { %1724 = vmatpush.bf16.msra.mxu0 %v5370_v48  ;;  %v5438_v45 = vor.u32 %v7713_v35, %v5437_v34  ;;  %v6055_v46 = vld [vmem:[#allocation5 + $0x690] sm:$0xf0]  ;;  %v7677_v48 = vld [vmem:[#allocation5 + $0x94] sm:$0xf0]  ;;  %v7830_v54 = vld [vmem:[#allocation5 + $0x564] sm:$0xf] }
  0x8d   :  { %1738 = vmatpush.bf16.msra.mxu1 %v5498_v51  ;;  %v5930_v51 = vor.u32 %v7834_v40, %v5927_v43  ;;  %v5294_v53 = vor.u32 %v7677_v48, %v5293_v47  ;;  %v5911_v55 = vld [vmem:[#allocation5 + $0x570] sm:$0xf0]  ;;  %v7673_v61 = vld [vmem:[#allocation5 + $0x74] sm:$0xf0]  ;;  %v5405_v62 = vld [vmem:[#allocation5 + $0x168] sm:$0xf] }
  0x8e   :  { %v6039_v59 = vld [vmem:[#allocation5 + $0x670] sm:$0xf0]  ;;  %v7705_v63 = vld [vmem:[#allocation5 + $0x174] sm:$0xf0]  ;;  %v5278_v3 = vor.u32 %v7673_v61, %v5277_v60  ;;  %v7826_v4 = vld [vmem:[#allocation5 + $0x544] sm:$0xf] }
  0x8f   :  { %1752 = vmatpush.bf16.msra.mxu2 %v5626_v52  ;;  %1766 = vmatpush.bf16.msra.mxu3 %v5754_v56  ;;  %v6058_v52 = vor.u32 %v7866_v44, %v6055_v46  ;;  %v7862_v56 = vld [vmem:[#allocation5 + $0x664] sm:$0xf]  ;;  %v5406_v7 = vor.u32 %v7705_v63, %v5405_v62  ;;  %v6023_v8 = vld [vmem:[#allocation5 + $0x650] sm:$0xf0]  ;;  %v5245_v22 = vld [vmem:[#allocation5 + $0x28] sm:$0xf] }
  0x90   :  { %1725 = vmatpush.bf16.msra.mxu0 %v5354_v1  ;;  %v5914_v1 = vor.u32 %v7830_v54, %v5911_v55  ;;  %v6042_v2 = vor.u32 %v7862_v56, %v6039_v59  ;;  %v5879_v18 = vld [vmem:[#allocation5 + $0x530] sm:$0xf0]  ;;  %v7854_v19 = vld [vmem:[#allocation5 + $0x624] sm:$0xf]  ;;  %v5229_v34 = vld [vmem:[#allocation5 + $0x8] sm:$0xf] }
  0x91   :  { %1739 = vmatpush.bf16.msra.mxu1 %v5482_v5  ;;  %v5895_v5 = vld [vmem:[#allocation5 + $0x550] sm:$0xf0]  ;;  %v7818_v28 = vld [vmem:[#allocation5 + $0x504] sm:$0xf]  ;;  %v5597_v40 = vld [vmem:[#allocation5 + $0x2e8] sm:$0xf] }
  0x92   :  { %v5898_v14 = vor.u32 %v7826_v4, %v5895_v5  ;;  %v6007_v21 = vld [vmem:[#allocation5 + $0x630] sm:$0xf0]  ;;  %v7850_v32 = vld [vmem:[#allocation5 + $0x604] sm:$0xf]  ;;  %v7753_v43 = vld [vmem:[#allocation5 + $0x2f4] sm:$0xf0] }
  0x93   :  { %1753 = vmatpush.bf16.msra.mxu2 %v5610_v6  ;;  %1767 = vmatpush.bf16.msra.mxu3 %v5738_v9  ;;  %v7858_v6 = vld [vmem:[#allocation5 + $0x644] sm:$0xf]  ;;  %v5261_v9 = vld [vmem:[#allocation5 + $0x48] sm:$0xf]  ;;  %v5863_v29 = vld [vmem:[#allocation5 + $0x510] sm:$0xf0]  ;;  %v5598_v54 = vor.u32 %v7753_v43, %v5597_v40 }
  0x94   :  { %1774 = vmatpush.bf16.msrb.mxu0 %v5978_v10  ;;  %1740 = vmatmul.bf16.vlgmr.msra.gmra.mxu1 %v8726_v0  ;;  %v7669_v10 = vld [vmem:[#allocation5 + $0x54] sm:$0xf0]  ;;  %v6026_v15 = vor.u32 %v7858_v6, %v6023_v8  ;;  %v5991_v33 = vld [vmem:[#allocation5 + $0x610] sm:$0xf0]  ;;  %v5725_v44 = vld [vmem:[#allocation5 + $0x3e8] sm:$0xf] }
  0x95   :  { %1788 = vmatpush.bf16.msrb.mxu1 %v6106_v12  ;;  %1726 = vmatmul.bf16.vlgmr.msra.gmra.mxu0 %v8730_v11  ;;  %v5389_v12 = vld [vmem:[#allocation5 + $0x148] sm:$0xf]  ;;  %v5262_v16 = vor.u32 %v7669_v10, %v5261_v9  ;;  %v7785_v46 = vld [vmem:[#allocation5 + $0x3f4] sm:$0xf0]  ;;  %v5994_v49 = vor.u32 %v7850_v32, %v5991_v33 }
  0x96   :  { %1754 = vmatmul.bf16.vlgmr.msra.gmra.mxu2 %v8733_v23  ;;  %1768 = vmatmul.bf16.vlgmr.msra.gmra.mxu3 %v8736_v37  ;;  %v5853_v47 = vld [vmem:[#allocation5 + $0x4e8] sm:$0xf]  ;;  %v7817_v48 = vld [vmem:[#allocation5 + $0x4f4] sm:$0xf0]  ;;  %v5726_v55 = vor.u32 %v7785_v46, %v5725_v44 }
  0x97   :  { %1802 = vmatpush.bf16.msrb.mxu2 %v5342_v13  ;;  %1816 = vmatpush.bf16.msrb.mxu3 %v5470_v17  ;;  %v7701_v13 = vld [vmem:[#allocation5 + $0x154] sm:$0xf0]  ;;  %v7822_v17 = vld [vmem:[#allocation5 + $0x524] sm:$0xf]  ;;  %v5854_v56 = vor.u32 %v7817_v48, %v5853_v47  ;;  %v5709_v60 = vld [vmem:[#allocation5 + $0x3c8] sm:$0xf] }
  0x98   :  { %1775 = vmatpush.bf16.msrb.mxu0 %v5962_v24  ;;  %v5390_v20 = vor.u32 %v7701_v13, %v5389_v12  ;;  %v7665_v24 = vld [vmem:[#allocation5 + $0x34] sm:$0xf0]  ;;  %v5882_v27 = vor.u32 %v7822_v17, %v5879_v18  ;;  %v5837_v63 = vld [vmem:[#allocation5 + $0x4c8] sm:$0xf] }
  0x99   :  { %1789 = vmatpush.bf16.msrb.mxu1 %v6090_v25  ;;  %v5373_v25 = vld [vmem:[#allocation5 + $0x128] sm:$0xf]  ;;  %v5246_v31 = vor.u32 %v7665_v24, %v5245_v22  ;;  %v7749_v59 = vld [vmem:[#allocation5 + $0x2d4] sm:$0xf0] }
  0x9a   :  { %v7781_v62 = vld [vmem:[#allocation5 + $0x3d4] sm:$0xf0]  ;;  %v5693_v9 = vld [vmem:[#allocation5 + $0x3a8] sm:$0xf] }
  0x9b   :  { %1803 = vmatpush.bf16.msrb.mxu2 %v5326_v26  ;;  %1817 = vmatpush.bf16.msrb.mxu3 %v5454_v30  ;;  %v7697_v26 = vld [vmem:[#allocation5 + $0x134] sm:$0xf0]  ;;  %v6010_v30 = vor.u32 %v7854_v19, %v6007_v21  ;;  %v5710_v5 = vor.u32 %v7781_v62, %v5709_v60  ;;  %v5821_v13 = vld [vmem:[#allocation5 + $0x4a8] sm:$0xf] }
  0x9c   :  { %1776 = vmatpush.bf16.msrb.mxu0 %v5946_v36  ;;  %v5374_v35 = vor.u32 %v7697_v26, %v5373_v25  ;;  %v7661_v36 = vld [vmem:[#allocation5 + $0x14] sm:$0xf0]  ;;  %v5677_v22 = vld [vmem:[#allocation5 + $0x388] sm:$0xf] }
  0x9d   :  { %1790 = vmatpush.bf16.msrb.mxu1 %v6074_v38  ;;  %v5357_v38 = vld [vmem:[#allocation5 + $0x108] sm:$0xf]  ;;  %v5230_v50 = vor.u32 %v7661_v36, %v5229_v34  ;;  %v7745_v8 = vld [vmem:[#allocation5 + $0x2b4] sm:$0xf0] }
  0x9e   :  { %v7777_v12 = vld [vmem:[#allocation5 + $0x3b4] sm:$0xf0]  ;;  %v5805_v26 = vld [vmem:[#allocation5 + $0x488] sm:$0xf] }
  0x9f   :  { %1804 = vmatpush.bf16.msrb.mxu2 %v5310_v39  ;;  %1818 = vmatpush.bf16.msrb.mxu3 %v5438_v45  ;;  %v7693_v39 = vld [vmem:[#allocation5 + $0x114] sm:$0xf0]  ;;  %v5866_v45 = vor.u32 %v7818_v28, %v5863_v29  ;;  %v5694_v18 = vor.u32 %v7777_v12, %v5693_v9  ;;  %v5933_v28 = vld [vmem:[#allocation5 + $0x588] sm:$0xf] }
  0xa0   :  { %1777 = vmatpush.bf16.msrb.mxu0 %v5930_v51  ;;  %v5981_v51 = vld [vmem:[#allocation5 + $0x5e8] sm:$0xf]  ;;  %v7741_v21 = vld [vmem:[#allocation5 + $0x294] sm:$0xf0] }
  0xa1   :  { %1791 = vmatpush.bf16.msrb.mxu1 %v6058_v52  ;;  %v7849_v52 = vld [vmem:[#allocation5 + $0x5f4] sm:$0xf0]  ;;  %v5533_v33 = vld [vmem:[#allocation5 + $0x268] sm:$0xf] }
  0xa2   :  { %v5982_v61 = vor.u32 %v7849_v52, %v5981_v51  ;;  %v7773_v25 = vld [vmem:[#allocation5 + $0x394] sm:$0xf0]  ;;  %v5917_v43 = vld [vmem:[#allocation5 + $0x568] sm:$0xf] }
  0xa3   :  { %1805 = vmatpush.bf16.msrb.mxu2 %v5294_v53  ;;  %1819 = vmatpush.bf16.msrb.mxu3 %v5422_v58  ;;  %v5358_v53 = vor.u32 %v7693_v39, %v5357_v38  ;;  %v5581_v58 = vld [vmem:[#allocation5 + $0x2c8] sm:$0xf]  ;;  %v7837_v29 = vld [vmem:[#allocation5 + $0x594] sm:$0xf0] }
  0xa4   :  { %1778 = vmatpush.bf16.msrb.mxu0 %v5914_v1  ;;  %v7813_v1 = vld [vmem:[#allocation5 + $0x4d4] sm:$0xf0]  ;;  %v5582_v4 = vor.u32 %v7749_v59, %v5581_v58  ;;  %v5934_v36 = vor.u32 %v7837_v29, %v5933_v28  ;;  %v5789_v39 = vld [vmem:[#allocation5 + $0x468] sm:$0xf] }
  0xa5   :  { %1792 = vmatpush.bf16.msrb.mxu1 %v6042_v2  ;;  %v5965_v2 = vld [vmem:[#allocation5 + $0x5c8] sm:$0xf]  ;;  %v5838_v6 = vor.u32 %v7813_v1, %v5837_v63  ;;  %v7737_v34 = vld [vmem:[#allocation5 + $0x274] sm:$0xf0] }
  0xa6   :  { %v7769_v38 = vld [vmem:[#allocation5 + $0x374] sm:$0xf0]  ;;  %v5517_v48 = vld [vmem:[#allocation5 + $0x248] sm:$0xf] }
  0xa7   :  { %1806 = vmatpush.bf16.msrb.mxu2 %v5278_v3  ;;  %1820 = vmatpush.bf16.msrb.mxu3 %v5406_v7  ;;  %v7845_v3 = vld [vmem:[#allocation5 + $0x5d4] sm:$0xf0]  ;;  %v5565_v7 = vld [vmem:[#allocation5 + $0x2a8] sm:$0xf] }
  0xa8   :  { %1779 = vmatpush.bf16.msrb.mxu0 %v5898_v14  ;;  %v5966_v10 = vor.u32 %v7845_v3, %v5965_v2  ;;  %v7809_v14 = vld [vmem:[#allocation5 + $0x4b4] sm:$0xf0]  ;;  %v5566_v17 = vor.u32 %v7745_v8, %v5565_v7  ;;  %v5629_v63 = vld [vmem:[#allocation5 + $0x328] sm:$0xf] }
  0xa9   :  { %1793 = vmatpush.bf16.msrb.mxu1 %v6026_v15  ;;  %v5949_v15 = vld [vmem:[#allocation5 + $0x5a8] sm:$0xf]  ;;  %v5822_v19 = vor.u32 %v7809_v14, %v5821_v13  ;;  %v7801_v40 = vld [vmem:[#allocation5 + $0x474] sm:$0xf0] }
  0xaa   :  { %v7833_v44 = vld [vmem:[#allocation5 + $0x574] sm:$0xf0]  ;;  %v5790_v47 = vor.u32 %v7801_v40, %v5789_v39  ;;  %v5757_v3 = vld [vmem:[#allocation5 + $0x428] sm:$0xf]  ;;  %v7683_v39 = vld [vmem:[#allocation5 + $0xcc] sm:$0xf] }
  0xab   :  { %1807 = vmatpush.bf16.msrb.mxu2 %v5262_v16  ;;  %1821 = vmatpush.bf16.msrb.mxu3 %v5390_v20  ;;  %v7841_v16 = vld [vmem:[#allocation5 + $0x5b4] sm:$0xf0]  ;;  %v5549_v20 = vld [vmem:[#allocation5 + $0x288] sm:$0xf]  ;;  %v5918_v51 = vor.u32 %v7833_v44, %v5917_v43  ;;  %v5327_v43 = vld [vmem:[#allocation5 + $0xd8] sm:$0xf0] }
  0xac   :  { %1780 = vmatpush.bf16.msrb.mxu0 %v5882_v27  ;;  %v5950_v24 = vor.u32 %v7841_v16, %v5949_v15  ;;  %v7805_v27 = vld [vmem:[#allocation5 + $0x494] sm:$0xf0]  ;;  %v5485_v8 = vld [vmem:[#allocation5 + $0x208] sm:$0xf]  ;;  %v7715_v44 = vld [vmem:[#allocation5 + $0x1cc] sm:$0xf] }
  0xad   :  { %1794 = vmatpush.bf16.msrb.mxu1 %v6010_v30  ;;  %v5550_v30 = vor.u32 %v7741_v21, %v5549_v20  ;;  %v5806_v32 = vor.u32 %v7805_v27, %v5805_v26  ;;  %v7765_v52 = vld [vmem:[#allocation5 + $0x354] sm:$0xf0]  ;;  %v5613_v13 = vld [vmem:[#allocation5 + $0x308] sm:$0xf]  ;;  %v7719_v26 = vld [vmem:[#allocation5 + $0x1ec] sm:$0xf] }
  0xae   :  { %v7729_v62 = vld [vmem:[#allocation5 + $0x234] sm:$0xf0]  ;;  %v5741_v15 = vld [vmem:[#allocation5 + $0x408] sm:$0xf]  ;;  %v5471_v27 = vld [vmem:[#allocation5 + $0x1f8] sm:$0xf0] }
  0xaf   :  { %1808 = vmatpush.bf16.msrb.mxu2 %v5246_v31  ;;  %1822 = vmatpush.bf16.msrb.mxu3 %v5374_v35  ;;  %v5678_v31 = vor.u32 %v7773_v25, %v5677_v22  ;;  %v5661_v35 = vld [vmem:[#allocation5 + $0x368] sm:$0xf]  ;;  %v7761_v2 = vld [vmem:[#allocation5 + $0x334] sm:$0xf0]  ;;  %v7687_v22 = vld [vmem:[#allocation5 + $0xec] sm:$0xf] }
  0xb0   :  { %1781 = vmatpush.bf16.msrb.mxu0 %v5866_v45  ;;  %v5534_v45 = vor.u32 %v7737_v34, %v5533_v33  ;;  %v5662_v46 = vor.u32 %v7769_v38, %v5661_v35  ;;  %v7725_v9 = vld [vmem:[#allocation5 + $0x214] sm:$0xf0]  ;;  %v6109_v20 = vld [vmem:[#allocation5 + $0x6e8] sm:$0xf]  ;;  %v5343_v25 = vld [vmem:[#allocation5 + $0xf8] sm:$0xf0]  ;;  %v5474_v35 = vor.u32 %v7719_v26, %v5471_v27 }
  0xb1   :  { %1795 = vmatpush.bf16.msrb.mxu1 %v5994_v49  ;;  %v7733_v49 = vld [vmem:[#allocation5 + $0x254] sm:$0xf0]  ;;  %v5346_v34 = vor.u32 %v7687_v22, %v5343_v25  ;;  %v5535_v22 = vld [vmem:[#allocation5 + $0x278] sm:$0xf0]  ;;  %v6029_v27 = vld [vmem:[#allocation5 + $0x648] sm:$0xf] }
  0xb2   :  { %v5518_v58 = vor.u32 %v7733_v49, %v5517_v48  ;;  %v7757_v14 = vld [vmem:[#allocation5 + $0x314] sm:$0xf0]  ;;  %v5330_v49 = vor.u32 %v7683_v39, %v5327_v43 }
  0xb3   :  { %1809 = vmatpush.bf16.msrb.mxu2 %v5230_v50  ;;  %1823 = vmatpush.bf16.msrb.mxu3 %v5358_v53  ;;  %v5645_v50 = vld [vmem:[#allocation5 + $0x348] sm:$0xf]  ;;  %v7881_v21 = vld [vmem:[#allocation5 + $0x6f4] sm:$0xf0]  ;;  %v5614_v28 = vor.u32 %v7757_v14, %v5613_v13 }
  0xb4   :  { %1830 = vmatpush.bf16.msra.mxu0 %v5598_v54  ;;  %1796 = vmatmul.bf16.vlgmr.msrb.gmra.mxu1 %v8738_v41  ;;  %v5773_v53 = vld [vmem:[#allocation5 + $0x448] sm:$0xf]  ;;  %v7797_v54 = vld [vmem:[#allocation5 + $0x454] sm:$0xf0]  ;;  %v5646_v59 = vor.u32 %v7765_v52, %v5645_v50  ;;  %v6110_v33 = vor.u32 %v7881_v21, %v6109_v20  ;;  %v5407_v20 = vld [vmem:[#allocation5 + $0x178] sm:$0xf0] }
  0xb5   :  { %1844 = vmatpush.bf16.msra.mxu1 %v5726_v55  ;;  %1782 = vmatmul.bf16.vlgmr.msrb.gmra.mxu0 %v8740_v42  ;;  %v5901_v55 = vld [vmem:[#allocation5 + $0x548] sm:$0xf]  ;;  %v5774_v60 = vor.u32 %v7797_v54, %v5773_v53  ;;  %v7877_v38 = vld [vmem:[#allocation5 + $0x6d4] sm:$0xf0]  ;;  %v7679_v53 = vld [vmem:[#allocation5 + $0xac] sm:$0xf] }
  0xb6   :  { %1810 = vmatmul.bf16.vlgmr.msrb.gmra.mxu2 %v8724_v57  ;;  %1824 = vmatmul.bf16.vlgmr.msrb.gmra.mxu3 %v8730_v11  ;;  %v7873_v52 = vld [vmem:[#allocation5 + $0x6b4] sm:$0xf0]  ;;  %v6045_v14 = vld [vmem:[#allocation5 + $0x668] sm:$0xf]  ;;  %v7735_v21 = vld [vmem:[#allocation5 + $0x26c] sm:$0xf] }
  0xb7   :  { %1858 = vmatpush.bf16.msra.mxu2 %v5854_v56  ;;  %1872 = vmatpush.bf16.msra.mxu3 %v5982_v61  ;;  %v7829_v56 = vld [vmem:[#allocation5 + $0x554] sm:$0xf0]  ;;  %v5501_v61 = vld [vmem:[#allocation5 + $0x228] sm:$0xf] }
  0xb8   :  { %1831 = vmatpush.bf16.msra.mxu0 %v5582_v4  ;;  %v5902_v1 = vor.u32 %v7829_v56, %v5901_v55  ;;  %v7793_v4 = vld [vmem:[#allocation5 + $0x434] sm:$0xf0]  ;;  %v5502_v7 = vor.u32 %v7729_v62, %v5501_v61  ;;  %v5311_v55 = vld [vmem:[#allocation5 + $0xb8] sm:$0xf0]  ;;  %v7711_v56 = vld [vmem:[#allocation5 + $0x1ac] sm:$0xf] }
  0xb9   :  { %1845 = vmatpush.bf16.msra.mxu1 %v5710_v5  ;;  %v5885_v5 = vld [vmem:[#allocation5 + $0x528] sm:$0xf]  ;;  %v5758_v12 = vor.u32 %v7793_v4, %v5757_v3  ;;  %v5314_v62 = vor.u32 %v7679_v53, %v5311_v55  ;;  %v7675_v3 = vld [vmem:[#allocation5 + $0x8c] sm:$0xf]  ;;  %v7857_v43 = vld [vmem:[#allocation5 + $0x634] sm:$0xf0] }
  0xba   :  { %v7853_v53 = vld [vmem:[#allocation5 + $0x614] sm:$0xf0] }
  0xbb   :  { %1859 = vmatpush.bf16.msra.mxu2 %v5838_v6  ;;  %1873 = vmatpush.bf16.msra.mxu3 %v5966_v10  ;;  %v7825_v6 = vld [vmem:[#allocation5 + $0x534] sm:$0xf0]  ;;  %v5630_v10 = vor.u32 %v7761_v2, %v5629_v63 }
  0xbc   :  { %1832 = vmatpush.bf16.msra.mxu0 %v5566_v17  ;;  %v5886_v16 = vor.u32 %v7825_v6, %v5885_v5  ;;  %v7789_v17 = vld [vmem:[#allocation5 + $0x414] sm:$0xf0]  ;;  %v5295_v5 = vld [vmem:[#allocation5 + $0x98] sm:$0xf0]  ;;  %v7707_v6 = vld [vmem:[#allocation5 + $0x18c] sm:$0xf] }
  0xbd   :  { %1846 = vmatpush.bf16.msra.mxu1 %v5694_v18  ;;  %v5869_v18 = vld [vmem:[#allocation5 + $0x508] sm:$0xf]  ;;  %v5742_v29 = vor.u32 %v7789_v17, %v5741_v15  ;;  %v7869_v2 = vld [vmem:[#allocation5 + $0x694] sm:$0xf0] }
  0xbe   :  { %v7865_v15 = vld [vmem:[#allocation5 + $0x674] sm:$0xf0] }
  0xbf   :  { %1860 = vmatpush.bf16.msra.mxu2 %v5822_v19  ;;  %1874 = vmatpush.bf16.msra.mxu3 %v5950_v24  ;;  %v7821_v19 = vld [vmem:[#allocation5 + $0x514] sm:$0xf0]  ;;  %v5486_v24 = vor.u32 %v7725_v9, %v5485_v8  ;;  %v7739_v8 = vld [vmem:[#allocation5 + $0x28c] sm:$0xf]  ;;  %v5551_v9 = vld [vmem:[#allocation5 + $0x298] sm:$0xf0] }
  0xc0   :  { %1833 = vmatpush.bf16.msra.mxu0 %v5550_v30  ;;  %v7751_v30 = vld [vmem:[#allocation5 + $0x2ec] sm:$0xf]  ;;  %v5554_v17 = vor.u32 %v7739_v8, %v5551_v9 }
  0xc1   :  { %1847 = vmatpush.bf16.msra.mxu1 %v5678_v31  ;;  %v5599_v31 = vld [vmem:[#allocation5 + $0x2f8] sm:$0xf0] }
  0xc2   :  { %v5602_v40 = vor.u32 %v7751_v30, %v5599_v31  ;;  %v5538_v30 = vor.u32 %v7735_v21, %v5535_v22  ;;  %v5263_v31 = vld [vmem:[#allocation5 + $0x58] sm:$0xf0]  ;;  %v7843_v22 = vld [vmem:[#allocation5 + $0x5cc] sm:$0xf] }
  0xc3   :  { %1861 = vmatpush.bf16.msra.mxu2 %v5806_v32  ;;  %1875 = vmatpush.bf16.msra.mxu3 %v5934_v36  ;;  %v5870_v32 = vor.u32 %v7821_v19, %v5869_v18  ;;  %v6093_v36 = vld [vmem:[#allocation5 + $0x6c8] sm:$0xf]  ;;  %v5279_v18 = vld [vmem:[#allocation5 + $0x78] sm:$0xf0]  ;;  %v7703_v19 = vld [vmem:[#allocation5 + $0x16c] sm:$0xf] }
  0xc4   :  { %1834 = vmatpush.bf16.msra.mxu0 %v5534_v45  ;;  %v5455_v45 = vld [vmem:[#allocation5 + $0x1d8] sm:$0xf0]  ;;  %v6094_v48 = vor.u32 %v7877_v38, %v6093_v36  ;;  %v5410_v26 = vor.u32 %v7703_v19, %v5407_v20  ;;  %v7811_v19 = vld [vmem:[#allocation5 + $0x4cc] sm:$0xf] }
  0xc5   :  { %1848 = vmatpush.bf16.msra.mxu1 %v5662_v46  ;;  %v7747_v46 = vld [vmem:[#allocation5 + $0x2cc] sm:$0xf]  ;;  %v5458_v50 = vor.u32 %v7715_v44, %v5455_v45  ;;  %v5839_v21 = vld [vmem:[#allocation5 + $0x4d8] sm:$0xf0] }
  0xc6   :  { %v7663_v44 = vld [vmem:[#allocation5 + $0x2c] sm:$0xf] }
  0xc7   :  { %1862 = vmatpush.bf16.msra.mxu2 %v5790_v47  ;;  %1876 = vmatpush.bf16.msra.mxu3 %v5918_v51  ;;  %v5583_v47 = vld [vmem:[#allocation5 + $0x2d8] sm:$0xf0]  ;;  %v6077_v51 = vld [vmem:[#allocation5 + $0x6a8] sm:$0xf] }
  0xc8   :  { %1835 = vmatpush.bf16.msra.mxu0 %v5518_v58  ;;  %v5586_v54 = vor.u32 %v7747_v46, %v5583_v47  ;;  %v5439_v58 = vld [vmem:[#allocation5 + $0x1b8] sm:$0xf0]  ;;  %v6078_v61 = vor.u32 %v7873_v52, %v6077_v51  ;;  %v7695_v47 = vld [vmem:[#allocation5 + $0x12c] sm:$0xf]  ;;  %v5997_v52 = vld [vmem:[#allocation5 + $0x608] sm:$0xf] }
  0xc9   :  { %1849 = vmatpush.bf16.msra.mxu1 %v5646_v59  ;;  %v7743_v59 = vld [vmem:[#allocation5 + $0x2ac] sm:$0xf]  ;;  %v5442_v63 = vor.u32 %v7711_v56, %v5439_v58  ;;  %v5247_v46 = vld [vmem:[#allocation5 + $0x38] sm:$0xf0] }
  0xca   :  { %v7659_v56 = vld [vmem:[#allocation5 + $0xc] sm:$0xf]  ;;  %v5231_v58 = vld [vmem:[#allocation5 + $0x18] sm:$0xf0] }
  0xcb   :  { %1863 = vmatpush.bf16.msra.mxu2 %v5774_v60  ;;  %1877 = vmatpush.bf16.msra.mxu3 %v5902_v1  ;;  %v5567_v60 = vld [vmem:[#allocation5 + $0x2b8] sm:$0xf0]  ;;  %v6061_v1 = vld [vmem:[#allocation5 + $0x688] sm:$0xf]  ;;  %v5234_v8 = vor.u32 %v7659_v56, %v5231_v58  ;;  %v7799_v56 = vld [vmem:[#allocation5 + $0x46c] sm:$0xf] }
  0xcc   :  { %1836 = vmatpush.bf16.msra.mxu0 %v5502_v7  ;;  %v5570_v4 = vor.u32 %v7743_v59, %v5567_v60  ;;  %v5423_v7 = vld [vmem:[#allocation5 + $0x198] sm:$0xf0]  ;;  %v7691_v59 = vld [vmem:[#allocation5 + $0x10c] sm:$0xf] }
  0xcd   :  { %1850 = vmatpush.bf16.msra.mxu1 %v5630_v10  ;;  %v6062_v10 = vor.u32 %v7869_v2, %v6061_v1  ;;  %v5426_v13 = vor.u32 %v7707_v6, %v5423_v7  ;;  %v7783_v1 = vld [vmem:[#allocation5 + $0x3ec] sm:$0xf]  ;;  %v5727_v2 = vld [vmem:[#allocation5 + $0x3f8] sm:$0xf0] }
  0xce   :  { %v7847_v6 = vld [vmem:[#allocation5 + $0x5ec] sm:$0xf]  ;;  %v5983_v7 = vld [vmem:[#allocation5 + $0x5f8] sm:$0xf0] }
  0xcf   :  { %1864 = vmatpush.bf16.msra.mxu2 %v5758_v12  ;;  %1878 = vmatpush.bf16.msra.mxu3 %v5886_v16  ;;  %v5298_v12 = vor.u32 %v7675_v3, %v5295_v5  ;;  %v7671_v16 = vld [vmem:[#allocation5 + $0x6c] sm:$0xf]  ;;  %v5855_v5 = vld [vmem:[#allocation5 + $0x4f8] sm:$0xf0] }
  0xd0   :  { %1837 = vmatpush.bf16.msra.mxu0 %v5486_v24  ;;  %v6046_v24 = vor.u32 %v7865_v15, %v6045_v14  ;;  %v5282_v25 = vor.u32 %v7671_v16, %v5279_v18  ;;  %v7815_v3 = vld [vmem:[#allocation5 + $0x4ec] sm:$0xf]  ;;  %v5730_v14 = vor.u32 %v7783_v1, %v5727_v2  ;;  %v5986_v16 = vor.u32 %v7847_v6, %v5983_v7  ;;  %v5711_v18 = vld [vmem:[#allocation5 + $0x3d8] sm:$0xf0] }
  0xd1   :  { %1851 = vmatpush.bf16.msra.mxu1 %v5614_v28  ;;  %v7861_v28 = vld [vmem:[#allocation5 + $0x654] sm:$0xf0]  ;;  %v5858_v15 = vor.u32 %v7815_v3, %v5855_v5  ;;  %v6047_v1 = vld [vmem:[#allocation5 + $0x678] sm:$0xf0]  ;;  %v8764_v2 = vpop.f32.mrf.mxu1  ;;  %v7763_v6 = vld [vmem:[#allocation5 + $0x34c] sm:$0xf] }
  0xd2   :  { %v6030_v36 = vor.u32 %v7861_v28, %v6029_v27  ;;  %v5842_v28 = vor.u32 %v7811_v19, %v5839_v21  ;;  %v5647_v7 = vld [vmem:[#allocation5 + $0x358] sm:$0xf0]  ;;  %v7759_v19 = vld [vmem:[#allocation5 + $0x32c] sm:$0xf] }
  0xd3   :  { %1865 = vmatpush.bf16.msra.mxu2 %v5742_v29  ;;  %1879 = vmatpush.bf16.msra.mxu3 %v5870_v32  ;;  %v7667_v29 = vld [vmem:[#allocation5 + $0x4c] sm:$0xf] }
  0xd4   :  { %1886 = vmatpush.bf16.msrb.mxu0 %v6110_v33  ;;  %1852 = vmatmul.bf16.vlgmr.msra.gmra.mxu1 %v8733_v23  ;;  %v7699_v32 = vld [vmem:[#allocation5 + $0x14c] sm:$0xf]  ;;  %v5391_v33 = vld [vmem:[#allocation5 + $0x158] sm:$0xf0]  ;;  %v5266_v38 = vor.u32 %v7667_v29, %v5263_v31 }
  0xd5   :  { %1900 = vmatpush.bf16.msrb.mxu1 %v5346_v34  ;;  %1838 = vmatmul.bf16.vlgmr.msra.gmra.mxu0 %v8726_v0  ;;  %v7731_v34 = vld [vmem:[#allocation5 + $0x24c] sm:$0xf]  ;;  %v5394_v39 = vor.u32 %v7699_v32, %v5391_v33  ;;  %v5695_v31 = vld [vmem:[#allocation5 + $0x3b8] sm:$0xf0] }
  0xd6   :  { %1866 = vmatmul.bf16.vlgmr.msra.gmra.mxu2 %v8736_v37  ;;  %1880 = vmatmul.bf16.vlgmr.msra.gmra.mxu3 %v8740_v42  ;;  %v7807_v32 = vld [vmem:[#allocation5 + $0x4ac] sm:$0xf] }
  0xd7   :  { %1914 = vmatpush.bf16.msrb.mxu2 %v5474_v35  ;;  %1928 = vmatpush.bf16.msrb.mxu3 %v5602_v40  ;;  %v5519_v35 = vld [vmem:[#allocation5 + $0x258] sm:$0xf0]  ;;  %v6013_v40 = vld [vmem:[#allocation5 + $0x628] sm:$0xf]  ;;  %v7791_v21 = vld [vmem:[#allocation5 + $0x42c] sm:$0xf] }
  0xd8   :  { %1887 = vmatpush.bf16.msrb.mxu0 %v6094_v48  ;;  %v5522_v45 = vor.u32 %v7731_v34, %v5519_v35  ;;  %v5375_v48 = vld [vmem:[#allocation5 + $0x138] sm:$0xf0]  ;;  %v6014_v51 = vor.u32 %v7857_v43, %v6013_v40  ;;  %v7839_v35 = vld [vmem:[#allocation5 + $0x5ac] sm:$0xf] }
  0xd9   :  { %1901 = vmatpush.bf16.msrb.mxu1 %v5330_v49  ;;  %v7727_v49 = vld [vmem:[#allocation5 + $0x22c] sm:$0xf]  ;;  %v5378_v55 = vor.u32 %v7695_v47, %v5375_v48  ;;  %v5823_v34 = vld [vmem:[#allocation5 + $0x4b8] sm:$0xf0] }
  0xda   :  { %v5826_v43 = vor.u32 %v7807_v32, %v5823_v34  ;;  %v7803_v47 = vld [vmem:[#allocation5 + $0x48c] sm:$0xf] }
  0xdb   :  { %1915 = vmatpush.bf16.msrb.mxu2 %v5458_v50  ;;  %1929 = vmatpush.bf16.msrb.mxu3 %v5586_v54  ;;  %v5503_v50 = vld [vmem:[#allocation5 + $0x238] sm:$0xf0]  ;;  %v5250_v54 = vor.u32 %v7663_v44, %v5247_v46  ;;  %v7755_v32 = vld [vmem:[#allocation5 + $0x30c] sm:$0xf] }
  0xdc   :  { %1888 = vmatpush.bf16.msrb.mxu0 %v6078_v61  ;;  %v5506_v60 = vor.u32 %v7727_v49, %v5503_v50  ;;  %v5359_v61 = vld [vmem:[#allocation5 + $0x118] sm:$0xf0]  ;;  %v7835_v50 = vld [vmem:[#allocation5 + $0x58c] sm:$0xf] }
  0xdd   :  { %1902 = vmatpush.bf16.msrb.mxu1 %v5314_v62  ;;  %v7723_v62 = vld [vmem:[#allocation5 + $0x20c] sm:$0xf]  ;;  %v5362_v9 = vor.u32 %v7691_v59, %v5359_v61  ;;  %v5679_v46 = vld [vmem:[#allocation5 + $0x398] sm:$0xf0] }
  0xde   :  { %v5807_v49 = vld [vmem:[#allocation5 + $0x498] sm:$0xf0] }
  0xdf   :  { %1916 = vmatpush.bf16.msrb.mxu2 %v5442_v63  ;;  %1930 = vmatpush.bf16.msrb.mxu3 %v5570_v4  ;;  %v5487_v63 = vld [vmem:[#allocation5 + $0x218] sm:$0xf0]  ;;  %v5998_v4 = vor.u32 %v7853_v53, %v5997_v52  ;;  %v5810_v53 = vor.u32 %v7803_v47, %v5807_v49  ;;  %v6173_v49 = vld [vmem:[#allocation8 + $0x70] sm:$0xf] }
  0xe0   :  { %1889 = vmatpush.bf16.msrb.mxu0 %v6062_v10  ;;  %v7879_v10 = vld [vmem:[#allocation5 + $0x6ec] sm:$0xf]  ;;  %v6063_v52 = vld [vmem:[#allocation5 + $0x698] sm:$0xf0] }
  0xe1   :  { %1903 = vmatpush.bf16.msrb.mxu1 %v5298_v12  ;;  %v6111_v12 = vld [vmem:[#allocation5 + $0x6f8] sm:$0xf0] }
  0xe2   :  { %v6114_v20 = vor.u32 %v7879_v10, %v6111_v12  ;;  %v5791_v59 = vld [vmem:[#allocation5 + $0x478] sm:$0xf0]  ;;  %v7827_v12 = vld [vmem:[#allocation5 + $0x54c] sm:$0xf] }
  0xe3   :  { %1917 = vmatpush.bf16.msrb.mxu2 %v5426_v13  ;;  %1931 = vmatpush.bf16.msrb.mxu3 %v5554_v17  ;;  %v5490_v13 = vor.u32 %v7723_v62, %v5487_v63  ;;  %v7779_v17 = vld [vmem:[#allocation5 + $0x3cc] sm:$0xf]  ;;  %v5919_v61 = vld [vmem:[#allocation5 + $0x578] sm:$0xf0]  ;;  %v8762_v62 = vpop.f32.mrf.mxu0 }
  0xe4   :  { %1890 = vmatpush.bf16.msrb.mxu0 %v6046_v24  ;;  %v5967_v24 = vld [vmem:[#allocation5 + $0x5d8] sm:$0xf0]  ;;  %v5714_v27 = vor.u32 %v7779_v17, %v5711_v18  ;;  %v7863_v63 = vld [vmem:[#allocation5 + $0x66c] sm:$0xf]  ;;  %v8770_v47 = vpop.f32.mrf.mxu3 }
  0xe5   :  { %1904 = vmatpush.bf16.msrb.mxu1 %v5282_v25  ;;  %v7875_v25 = vld [vmem:[#allocation5 + $0x6cc] sm:$0xf]  ;;  %v5970_v29 = vor.u32 %v7843_v22, %v5967_v24  ;;  %v5775_v10 = vld [vmem:[#allocation5 + $0x458] sm:$0xf0]  ;;  %v8766_v22 = vpop.f32.mrf.mxu2 }
  0xe7   :  { %1918 = vmatpush.bf16.msrb.mxu2 %v5410_v26  ;;  %1932 = vmatpush.bf16.msrb.mxu3 %v5538_v30  ;;  %v6095_v26 = vld [vmem:[#allocation5 + $0x6d8] sm:$0xf0]  ;;  %v7775_v30 = vld [vmem:[#allocation5 + $0x3ac] sm:$0xf] }
  0xe8   :  { %1891 = vmatpush.bf16.msrb.mxu0 %v6030_v36  ;;  %v6098_v33 = vor.u32 %v7875_v25, %v6095_v26  ;;  %v5951_v36 = vld [vmem:[#allocation5 + $0x5b8] sm:$0xf0]  ;;  %v5698_v40 = vor.u32 %v7775_v30, %v5695_v31  ;;  %v7823_v26 = vld [vmem:[#allocation5 + $0x52c] sm:$0xf]  ;;  %v8768_v30 = vld [vmem:[#allocation7] sm:$0xf] }
  0xe9   :  { %1905 = vmatpush.bf16.msrb.mxu1 %v5266_v38  ;;  %v7871_v38 = vld [vmem:[#allocation5 + $0x6ac] sm:$0xf]  ;;  %v5954_v44 = vor.u32 %v7839_v35, %v5951_v36  ;;  %v5759_v25 = vld [vmem:[#allocation5 + $0x438] sm:$0xf0] }
  0xea   :  { %v5762_v34 = vor.u32 %v7791_v21, %v5759_v25  ;;  %v5615_v36 = vld [vmem:[#allocation5 + $0x318] sm:$0xf0] }
  0xeb   :  { %1919 = vmatpush.bf16.msrb.mxu2 %v5394_v39  ;;  %1933 = vmatpush.bf16.msrb.mxu3 %v5522_v45  ;;  %v6079_v39 = vld [vmem:[#allocation5 + $0x6b8] sm:$0xf0]  ;;  %v7771_v45 = vld [vmem:[#allocation5 + $0x38c] sm:$0xf] }
  0xec   :  { %1892 = vmatpush.bf16.msrb.mxu0 %v6014_v51  ;;  %v6082_v48 = vor.u32 %v7871_v38, %v6079_v39  ;;  %v7867_v51 = vld [vmem:[#allocation5 + $0x68c] sm:$0xf]  ;;  %v5743_v39 = vld [vmem:[#allocation5 + $0x418] sm:$0xf0] }
  0xed   :  { %1906 = vmatpush.bf16.msrb.mxu1 %v5250_v54  ;;  %v7767_v54 = vld [vmem:[#allocation5 + $0x36c] sm:$0xf]  ;;  %v6066_v58 = vor.u32 %v7867_v51, %v6063_v52  ;;  %v6237_v51 = vld [vmem:[#allocation8 + $0xf0] sm:$0xf]  ;;  %v7913_v52 = vld [vmem:[#allocation8 + $0xf4] sm:$0xf0] }
  0xee   :  { %v7787_v38 = vld [vmem:[#allocation5 + $0x40c] sm:$0xf] }
  0xef   :  { %1920 = vmatpush.bf16.msrb.mxu2 %v5378_v55  ;;  %1934 = vmatpush.bf16.msrb.mxu3 %v5506_v60  ;;  %v5663_v55 = vld [vmem:[#allocation5 + $0x378] sm:$0xf0]  ;;  %v7831_v60 = vld [vmem:[#allocation5 + $0x56c] sm:$0xf] }
  0xf0   :  { %1893 = vmatpush.bf16.msrb.mxu0 %v5998_v4  ;;  %v5666_v3 = vor.u32 %v7767_v54, %v5663_v55  ;;  %v5794_v4 = vor.u32 %v7799_v56, %v5791_v59  ;;  %v5922_v5 = vor.u32 %v7831_v60, %v5919_v61  ;;  %v6165_v56 = vld [vmem:[#allocation8 + $0x60] sm:$0xf]  ;;  %v6238_v59 = vor.u32 %v7913_v52, %v6237_v51  ;;  %v1645_v60 = vpop.f32.mrf.mxu2 }
  0xf1   :  { %1907 = vmatpush.bf16.msrb.mxu1 %v5234_v8  ;;  %v7795_v8 = vld [vmem:[#allocation5 + $0x44c] sm:$0xf]  ;;  %v6229_v61 = vld [vmem:[#allocation8 + $0xe0] sm:$0xf]  ;;  %v443_v52 = vperm.slane %v8768_v30, 1 }
  0xf2   :  { %v5778_v17 = vor.u32 %v7795_v8, %v5775_v10  ;;  %v6221_v10 = vld [vmem:[#allocation8 + $0xd0] sm:$0xf] }
  0xf3   :  { %1921 = vmatpush.bf16.msrb.mxu2 %v5362_v9  ;;  %1935 = vmatpush.bf16.msrb.mxu3 %v5490_v13  ;;  %v6050_v9 = vor.u32 %v7863_v63, %v6047_v1  ;;  %v5903_v13 = vld [vmem:[#allocation5 + $0x558] sm:$0xf0]  ;;  %v7911_v63 = vld [vmem:[#allocation8 + $0xe4] sm:$0xf0] }
  0xf4   :  { %1942 = vmatpush.bf16.msra.mxu0 %v5730_v14  ;;  %1908 = vmatmul.bf16.vlgmr.msrb.gmra.mxu1 %v8724_v57  ;;  %v7859_v14 = vld [vmem:[#allocation5 + $0x64c] sm:$0xf]  ;;  %v5906_v18 = vor.u32 %v7827_v12, %v5903_v13  ;;  %v6230_v8 = vor.u32 %v7911_v63, %v6229_v61  ;;  %v6181_v61 = vld [vmem:[#allocation8 + $0x80] sm:$0xf] }
  0xf5   :  { %1956 = vmatpush.bf16.msra.mxu1 %v5858_v15  ;;  %1894 = vmatmul.bf16.vlgmr.msrb.gmra.mxu0 %v8738_v41  ;;  %v6031_v15 = vld [vmem:[#allocation5 + $0x658] sm:$0xf0]  ;;  %v7899_v63 = vld [vmem:[#allocation8 + $0x84] sm:$0xf0] }
  0xf6   :  { %1922 = vmatmul.bf16.vlgmr.msrb.gmra.mxu2 %v8730_v11  ;;  %1936 = vmatmul.bf16.vlgmr.msrb.gmra.mxu3 %v8726_v0  ;;  %v5935_v11 = vld [vmem:[#allocation5 + $0x598] sm:$0xf0]  ;;  %v5682_v0 = vor.u32 %v7771_v45, %v5679_v46  ;;  %v6034_v24 = vor.u32 %v7859_v14, %v6031_v15  ;;  %v7851_v46 = vld [vmem:[#allocation5 + $0x60c] sm:$0xf]  ;;  %v1659_v14 = vpop.f32.mrf.mxu3 }
  0xf7   :  { %1970 = vmatpush.bf16.msra.mxu2 %v5986_v16  ;;  %1984 = vmatpush.bf16.msra.mxu3 %v6114_v20  ;;  %v5938_v57 = vor.u32 %v7835_v50, %v5935_v11  ;;  %v5650_v16 = vor.u32 %v7763_v6, %v5647_v7  ;;  %v5631_v20 = vld [vmem:[#allocation5 + $0x338] sm:$0xf0]  ;;  %v5618_v11 = vor.u32 %v7755_v32, %v5615_v36  ;;  %v6157_v6 = vld [vmem:[#allocation8 + $0x50] sm:$0xf]  ;;  %v6197_v36 = vld [vmem:[#allocation8 + $0xa0] sm:$0xf] }
  0xf8   :  { %1943 = vmatpush.bf16.msra.mxu0 %v5714_v27  ;;  %v5887_v27 = vld [vmem:[#allocation5 + $0x538] sm:$0xf0]  ;;  %v5634_v31 = vor.u32 %v7759_v19, %v5631_v20  ;;  %v7907_v19 = vld [vmem:[#allocation8 + $0xc4] sm:$0xf0] }
  0xf9   :  { %1957 = vmatpush.bf16.msra.mxu1 %v5842_v28  ;;  %v7855_v28 = vld [vmem:[#allocation5 + $0x62c] sm:$0xf]  ;;  %v5890_v35 = vor.u32 %v7823_v26, %v5887_v27  ;;  %v5871_v45 = vld [vmem:[#allocation5 + $0x518] sm:$0xf0]  ;;  %v6205_v26 = vld [vmem:[#allocation8 + $0xb0] sm:$0xf] }
  0xfa   :  { %v7897_v50 = vld [vmem:[#allocation8 + $0x74] sm:$0xf0] }
  0xfb   :  { %1971 = vmatpush.bf16.msra.mxu2 %v5970_v29  ;;  %1985 = vmatpush.bf16.msra.mxu3 %v6098_v33  ;;  %v6015_v29 = vld [vmem:[#allocation5 + $0x638] sm:$0xf0]  ;;  %v1617_v33 = vpop.f32.mrf.mxu0  ;;  %v6174_v55 = vor.u32 %v7897_v50, %v6173_v49 }
  0xfc   :  { %1944 = vmatpush.bf16.msra.mxu0 %v5698_v40  ;;  %v1631_v40 = vpop.f32.mrf.mxu1  ;;  %v7893_v7 = vld [vmem:[#allocation8 + $0x54] sm:$0xf0] }
  0xfd   :  { %1958 = vmatpush.bf16.msra.mxu1 %v5826_v43  ;;  %v6018_v43 = vor.u32 %v7855_v28, %v6015_v29  ;;  %v6158_v15 = vor.u32 %v7893_v7, %v6157_v6  ;;  %v7901_v49 = vld [vmem:[#allocation8 + $0x94] sm:$0xf0] }
  0xff   :  { %1972 = vmatpush.bf16.msra.mxu2 %v5954_v44  ;;  %1986 = vmatpush.bf16.msra.mxu3 %v6082_v48  ;;  %v7819_v44 = vld [vmem:[#allocation5 + $0x50c] sm:$0xf]  ;;  %v5999_v48 = vld [vmem:[#allocation5 + $0x618] sm:$0xf0] }
 0x100   :  { %1945 = vmatpush.bf16.msra.mxu0 %v5682_v0  ;;  %v442_v0 = vperm.slane %v8768_v30, 0  ;;  %v6002_v54 = vor.u32 %v7851_v46, %v5999_v48  ;;  %v6189_v48 = vld [vmem:[#allocation8 + $0x90] sm:$0xf] }
 0x101   :  { %1959 = vmatpush.bf16.msra.mxu1 %v5810_v53  ;;  %v5746_v53 = vor.u32 %v7787_v38, %v5743_v39  ;;  %v7903_v38 = vld [vmem:[#allocation8 + $0xa4] sm:$0xf0] }
 0x102   :  { %v1616_v1 = vadd.f32 %v8762_v62, %v442_v0  ;;  %v7909_v62 = vld [vmem:[#allocation8 + $0xd4] sm:$0xf0]  ;;  %v6198_v46 = vor.u32 %v7903_v38, %v6197_v36 }
 0x103   :  { %1973 = vmatpush.bf16.msra.mxu2 %v5938_v57  ;;  %1987 = vmatpush.bf16.msra.mxu3 %v6066_v58  ;;  %v5874_v57 = vor.u32 %v7819_v44, %v5871_v45  ;;  %v7895_v58 = vld [vmem:[#allocation8 + $0x64] sm:$0xf0]  ;;  %v6125_v44 = vld [vmem:[#allocation8 + $0x10] sm:$0xf]  ;;  %v7885_v45 = vld [vmem:[#allocation8 + $0x14] sm:$0xf0] }
 0x104   :  { %1946 = vmatpush.bf16.msra.mxu0 %v5666_v3  ;;  %v1618_v3 = vadd.f32 %v1617_v33, %v442_v0  ;;  %v1630_v12 = vadd.f32 %v8764_v2, %v1616_v1  ;;  %v7889_v2 = vld [vmem:[#allocation8 + $0x34] sm:$0xf0] }
 0x105   :  { %1960 = vmatpush.bf16.msra.mxu1 %v5794_v4  ;;  %v6166_v4 = vor.u32 %v7895_v58, %v6165_v56  ;;  %v7883_v56 = vld [vmem:[#allocation8 + $0x4] sm:$0xf0]  ;;  %v7896_v58 = vld [vmem:[#allocation8 + $0x74] sm:$0xf] }
 0x106   :  { %v1632_v13 = vadd.f32 %v1631_v40, %v1618_v3  ;;  %v7912_v3 = vld [vmem:[#allocation8 + $0xf4] sm:$0xf] }
 0x107   :  { %1974 = vmatpush.bf16.msra.mxu2 %v5922_v5  ;;  %1988 = vmatpush.bf16.msra.mxu3 %v6050_v9  ;;  %v1671_v5 = vpop.f32.mrf.mxu0  ;;  %v1685_v9 = vpop.f32.mrf.mxu1 }
 0x108   :  { %1947 = vmatpush.bf16.msra.mxu0 %v5650_v16  ;;  %v7891_v16 = vld [vmem:[#allocation8 + $0x44] sm:$0xf0]  ;;  %v1646_v20 = vadd.f32 %v1645_v60, %v1632_v13  ;;  %v6175_v60 = vld [vmem:[#allocation8 + $0x78] sm:$0xf0] }
 0x109   :  { %1961 = vmatpush.bf16.msra.mxu1 %v5778_v17  ;;  %v6222_v17 = vor.u32 %v7909_v62, %v6221_v10  ;;  %v7894_v10 = vld [vmem:[#allocation8 + $0x64] sm:$0xf]  ;;  %v6167_v62 = vld [vmem:[#allocation8 + $0x68] sm:$0xf0] }
 0x10a   :  { %v1660_v28 = vadd.f32 %v1659_v14, %v1646_v20 }
 0x10b   :  { %1975 = vmatpush.bf16.msra.mxu2 %v5906_v18  ;;  %1989 = vmatpush.bf16.msra.mxu3 %v6034_v24  ;;  %v6213_v18 = vld [vmem:[#allocation8 + $0xc0] sm:$0xf]  ;;  %v6141_v24 = vld [vmem:[#allocation8 + $0x30] sm:$0xf] }
 0x10c   :  { %1948 = vmatpush.bf16.msra.mxu0 %v5634_v31  ;;  %v6214_v25 = vor.u32 %v7907_v19, %v6213_v18  ;;  %v1713_v31 = vpop.f32.mrf.mxu3  ;;  %v6142_v33 = vor.u32 %v7889_v2, %v6141_v24  ;;  %v6170_v19 = vor.u32 %v7894_v10, %v6167_v62  ;;  %v6127_v62 = vld [vmem:[#allocation8 + $0x18] sm:$0xf0] }
 0x10d   :  { %1962 = vmatpush.bf16.msra.mxu1 %v5762_v34  ;;  %v6133_v34 = vld [vmem:[#allocation8 + $0x20] sm:$0xf] }
 0x10f   :  { %1976 = vmatpush.bf16.msra.mxu2 %v5890_v35  ;;  %1990 = vmatpush.bf16.msra.mxu3 %v6018_v43  ;;  %v1673_v29 = vpop.f32.mrf.mxu0  ;;  %v1687_v32 = vpop.f32.mrf.mxu1 }
 0x110   :  { %1949 = vmatpush.bf16.msra.mxu0 %v5618_v11  ;;  %v1674_v40 = vadd.f32 %v1673_v29, %v1660_v28  ;;  %v7890_v29 = vld [vmem:[#allocation8 + $0x44] sm:$0xf] }
 0x111   :  { %1963 = vmatpush.bf16.msra.mxu1 %v5746_v53  ;;  %v6126_v53 = vor.u32 %v7885_v45, %v6125_v44  ;;  %v7888_v44 = vld [vmem:[#allocation8 + $0x34] sm:$0xf] }
 0x112   :  { %v1688_v11 = vadd.f32 %v1687_v32, %v1674_v40 }
 0x113   :  { %1977 = vmatpush.bf16.msra.mxu2 %v5874_v57  ;;  %1991 = vmatpush.bf16.msra.mxu3 %v6002_v54 }
 0x114   :  { %2400 = vmatpush.bf16.msrb.mxu0 %v6174_v55  ;;  %1964 = vmatmul.bf16.vlgmr.msra.gmra.mxu1 %v8736_v37  ;;  %v1644_v37 = vadd.f32 %v8766_v22, %v1630_v12  ;;  %v7887_v22 = vld [vmem:[#allocation8 + $0x24] sm:$0xf0]  ;;  %v1715_v54 = vpop.f32.mrf.mxu3  ;;  %v6117_v55 = vld [vmem:[#allocation8] sm:$0xf] }
 0x115   :  { %1950 = vmatmul.bf16.vlgmr.msra.gmra.mxu0 %v8733_v23  ;;  %2414 = vmatpush.bf16.msrb.mxu1 %v6238_v59  ;;  %v6149_v23 = vld [vmem:[#allocation8 + $0x40] sm:$0xf]  ;;  %v6134_v43 = vor.u32 %v7887_v22, %v6133_v34  ;;  %v6190_v59 = vor.u32 %v7901_v49, %v6189_v48  ;;  %v6118_v6 = vor.u32 %v7883_v56, %v6117_v55  ;;  %v6215_v34 = vld [vmem:[#allocation8 + $0xc8] sm:$0xf0]  ;;  %v6301_v22 = vld [vmem:[#allocation8 + $0x170] sm:$0xf] }
 0x116   :  { %1978 = vmatmul.bf16.vlgmr.msra.gmra.mxu2 %v8740_v42  ;;  %1992 = vmatmul.bf16.vlgmr.msra.gmra.mxu3 %v8738_v41  ;;  %v1699_v42 = vpop.f32.mrf.mxu2  ;;  %v6150_v21 = vor.u32 %v7891_v16, %v6149_v23  ;;  %v7905_v41 = vld [vmem:[#allocation8 + $0xb4] sm:$0xf0]  ;;  %v1658_v27 = vadd.f32 %v8770_v47, %v1644_v37  ;;  %v6231_v23 = vld [vmem:[#allocation8 + $0xe8] sm:$0xf0]  ;;  %v1716_v37 = vadd.f32 %v1715_v54, %v443_v52  ;;  %v6293_v49 = vld [vmem:[#allocation8 + $0x160] sm:$0xf] }
 0x117   :  { %v6206_v35 = vor.u32 %v7905_v41, %v6205_v26  ;;  %v1727_v51 = vpop.f32.mrf.mxu0  ;;  %v1741_v0 = vpop.f32.mrf.mxu1  ;;  %v6223_v26 = vld [vmem:[#allocation8 + $0xd8] sm:$0xf0]  ;;  %v7886_v56 = vld [vmem:[#allocation8 + $0x24] sm:$0xf] }
 0x118   :  { %2401 = vmatpush.bf16.msrb.mxu0 %v6166_v4  ;;  %v1672_v39 = vadd.f32 %v1671_v5, %v1658_v27  ;;  %v6239_v4 = vld [vmem:[#allocation8 + $0xf8] sm:$0xf0]  ;;  %v1714_v5 = vadd.f32 %v1713_v31, %v443_v52  ;;  %v6151_v31 = vld [vmem:[#allocation8 + $0x48] sm:$0xf0] }
 0x119   :  { %2415 = vmatpush.bf16.msrb.mxu1 %v6230_v8  ;;  %v6178_v8 = vor.u32 %v7896_v58, %v6175_v60  ;;  %v6242_v12 = vor.u32 %v7912_v3, %v6239_v4  ;;  %v6135_v58 = vld [vmem:[#allocation8 + $0x28] sm:$0xf0]  ;;  %v7902_v60 = vld [vmem:[#allocation8 + $0xa4] sm:$0xf] }
 0x11a   :  { %v1686_v50 = vadd.f32 %v1685_v9, %v1672_v39  ;;  %v6182_v9 = vor.u32 %v7899_v63, %v6181_v61  ;;  %v1728_v16 = vadd.f32 %v1727_v51, %v1714_v5  ;;  %v6207_v51 = vld [vmem:[#allocation8 + $0xb8] sm:$0xf0]  ;;  %v6199_v61 = vld [vmem:[#allocation8 + $0xa8] sm:$0xf0]  ;;  %v6285_v63 = vld [vmem:[#allocation8 + $0x150] sm:$0xf] }
 0x11c   :  { %2402 = vmatpush.bf16.msrb.mxu0 %v6158_v15  ;;  %v1700_v1 = vadd.f32 %v1699_v42, %v1686_v50  ;;  %v7910_v15 = vld [vmem:[#allocation8 + $0xe4] sm:$0xf]  ;;  %v7892_v42 = vld [vmem:[#allocation8 + $0x54] sm:$0xf]  ;;  %v1769_v2 = vpop.f32.mrf.mxu3  ;;  %v1742_v41 = vadd.f32 %v1741_v0, %v1728_v16  ;;  %v7927_v50 = vld [vmem:[#allocation8 + $0x164] sm:$0xf0] }
 0x11d   :  { %2416 = vmatpush.bf16.msrb.mxu1 %v6222_v17  ;;  %v6234_v24 = vor.u32 %v7910_v15, %v6231_v23  ;;  %v6294_v52 = vor.u32 %v7927_v50, %v6293_v49  ;;  %v7900_v16 = vld [vmem:[#allocation8 + $0x94] sm:$0xf] }
 0x11e   :  { %v1701_v47 = vpop.f32.mrf.mxu2  ;;  %v1998_v13 = vmax.f32 %v1700_v1, 0.0  ;;  %v7925_v1 = vld [vmem:[#allocation8 + $0x154] sm:$0xf0] }
 0x11f   :  { %v1702_v57 = vadd.f32 %v1701_v47, %v1688_v11  ;;  %v1729_v18 = vpop.f32.mrf.mxu0  ;;  %v1743_v20 = vpop.f32.mrf.mxu1  ;;  %v6143_v47 = vld [vmem:[#allocation8 + $0x38] sm:$0xf0]  ;;  %v7904_v11 = vld [vmem:[#allocation8 + $0xb4] sm:$0xf]  ;;  %v6286_v4 = vor.u32 %v7925_v1, %v6285_v63  ;;  %v6349_v1 = vld [vmem:[#allocation8 + $0x1d0] sm:$0xf] }
 0x120   :  { %2403 = vmatpush.bf16.msrb.mxu0 %v6150_v21  ;;  %v6159_v21 = vld [vmem:[#allocation8 + $0x58] sm:$0xf0]  ;;  %v1730_v28 = vadd.f32 %v1729_v18, %v1716_v37  ;;  %v6146_v54 = vor.u32 %v7888_v44, %v6143_v47  ;;  %v7926_v47 = vld [vmem:[#allocation8 + $0x164] sm:$0xf] }
 0x121   :  { %2417 = vmatpush.bf16.msrb.mxu1 %v6214_v25  ;;  %v2002_v7 = vmax.f32 %v1702_v57, 0.0  ;;  %v7908_v25 = vld [vmem:[#allocation8 + $0xd4] sm:$0xf]  ;;  %v6162_v27 = vor.u32 %v7892_v42, %v6159_v21  ;;  %v6191_v18 = vld [vmem:[#allocation8 + $0x98] sm:$0xf0] }
 0x122   :  { %v6226_v32 = vor.u32 %v7908_v25, %v6223_v26  ;;  %v1744_v45 = vadd.f32 %v1743_v20, %v1730_v28  ;;  %v7882_v42 = vld [vmem:[#allocation8 + $0x4] sm:$0xf]  ;;  %v6119_v21 = vld [vmem:[#allocation8 + $0x8] sm:$0xf0]  ;;  %v7921_v25 = vld [vmem:[#allocation8 + $0x134] sm:$0xf0] }
 0x123   :  { %v8782_v17 = vpack.c.bf16 %v2002_v7, %v1998_v13  ;;  %v7884_v7 = vld [vmem:[#allocation8 + $0x14] sm:$0xf]  ;;  %v6277_v13 = vld [vmem:[#allocation8 + $0x140] sm:$0xf]  ;;  %v6303_v44 = vld [vmem:[#allocation8 + $0x178] sm:$0xf0] }
 0x124   :  { %2404 = vmatpush.bf16.msrb.mxu0 %v6142_v33  ;;  %v7906_v33 = vld [vmem:[#allocation8 + $0xc4] sm:$0xf]  ;;  %v1771_v57 = vpop.f32.mrf.mxu3 }
 0x125   :  { %2418 = vmatpush.bf16.msrb.mxu1 %v6206_v35  ;;  %v7929_v35 = vld [vmem:[#allocation8 + $0x174] sm:$0xf0]  ;;  %v6218_v48 = vor.u32 %v7906_v33, %v6215_v34 }
 0x126   :  { %v1755_v14 = vpop.f32.mrf.mxu2  ;;  %v6302_v38 = vor.u32 %v7929_v35, %v6301_v22  ;;  %v6253_v22 = vld [vmem:[#allocation8 + $0x110] sm:$0xf]  ;;  %v7917_v35 = vld [vmem:[#allocation8 + $0x114] sm:$0xf0] }
 0x127   :  { %v1756_v36 = vadd.f32 %v1755_v14, %v1742_v41  ;;  %v7923_v14 = vld [vmem:[#allocation8 + $0x144] sm:$0xf0]  ;;  %v7898_v41 = vld [vmem:[#allocation8 + $0x84] sm:$0xf] }
 0x128   :  { %2405 = vmatpush.bf16.msrb.mxu0 %v6134_v43  ;;  %v6154_v43 = vor.u32 %v7890_v29, %v6151_v31  ;;  %2428 = vmatpush.bf16.msrb.mxu2 %v6302_v38  ;;  %v6278_v15 = vor.u32 %v7923_v14, %v6277_v13  ;;  %v6122_v29 = vor.u32 %v7882_v42, %v6119_v21  ;;  %v6261_v31 = vld [vmem:[#allocation8 + $0x120] sm:$0xf]  ;;  %v6263_v13 = vld [vmem:[#allocation8 + $0x128] sm:$0xf0] }
 0x129   :  { %2419 = vmatpush.bf16.msrb.mxu1 %v6198_v46  ;;  %v1770_v0 = vadd.f32 %v1769_v2, %v1756_v36  ;;  %v6269_v2 = vld [vmem:[#allocation8 + $0x130] sm:$0xf]  ;;  %v6254_v36 = vor.u32 %v7917_v35, %v6253_v22  ;;  %v6245_v38 = vld [vmem:[#allocation8 + $0x100] sm:$0xf] }
 0x12a   :  { %v6270_v28 = vor.u32 %v7921_v25, %v6269_v2  ;;  %v6325_v25 = vld [vmem:[#allocation8 + $0x1a0] sm:$0xf] }
 0x12c   :  { %2406 = vmatpush.bf16.msrb.mxu0 %v6126_v53  ;;  %2429 = vmatpush.bf16.msrb.mxu2 %v6294_v52  ;;  %v7924_v52 = vld [vmem:[#allocation8 + $0x154] sm:$0xf] }
 0x12d   :  { %2420 = vmatpush.bf16.msrb.mxu1 %v6190_v59  ;;  %v6210_v59 = vor.u32 %v7904_v11, %v6207_v51  ;;  %v6365_v11 = vld [vmem:[#allocation8 + $0x1f0] sm:$0xf]  ;;  %v7945_v51 = vld [vmem:[#allocation8 + $0x1f4] sm:$0xf0] }
 0x12e   :  { %v1757_v39 = vpop.f32.mrf.mxu2 }
 0x12f   :  { %v1758_v53 = vadd.f32 %v1757_v39, %v1744_v45  ;;  %v7915_v39 = vld [vmem:[#allocation8 + $0x104] sm:$0xf0] }
 0x130   :  { %2407 = vmatpush.bf16.msrb.mxu0 %v6118_v6  ;;  %v6138_v6 = vor.u32 %v7886_v56, %v6135_v58  ;;  %2430 = vmatpush.bf16.msrb.mxu2 %v6286_v4  ;;  %v7920_v4 = vld [vmem:[#allocation8 + $0x134] sm:$0xf] }
 0x131   :  { %2421 = vmatpush.bf16.msrb.mxu1 %v6182_v9  ;;  %v1797_v46 = vpop.f32.mrf.mxu1  ;;  %v1772_v3 = vadd.f32 %v1771_v57, %v1758_v53  ;;  %v6287_v53 = vld [vmem:[#allocation8 + $0x158] sm:$0xf0]  ;;  %v6357_v57 = vld [vmem:[#allocation8 + $0x1e0] sm:$0xf] }
 0x132   :  { %v1783_v40 = vpop.f32.mrf.mxu0 }
 0x133   :  { %2408 = vmatmul.bf16.vlgmr.msrb.gmra.mxu0 %v8782_v17  ;;  %v1784_v55 = vadd.f32 %v1783_v40, %v1770_v0  ;;  %v6246_v40 = vor.u32 %v7915_v39, %v6245_v38  ;;  %v6366_v0 = vor.u32 %v7945_v51, %v6365_v11  ;;  %v6317_v38 = vld [vmem:[#allocation8 + $0x190] sm:$0xf]  ;;  %v7933_v39 = vld [vmem:[#allocation8 + $0x194] sm:$0xf0]  ;;  %v7944_v51 = vld [vmem:[#allocation8 + $0x1f4] sm:$0xf] }
 0x134   :  { %2456 = vmatpush.bf16.msra.mxu0 %v6178_v8  ;;  %2431 = vmatpush.bf16.msrb.mxu2 %v6278_v15 }
 0x135   :  { %2470 = vmatpush.bf16.msra.mxu1 %v6242_v12  ;;  %v1798_v8 = vadd.f32 %v1797_v46, %v1784_v55  ;;  %v6202_v12 = vor.u32 %v7902_v60, %v6199_v61  ;;  %2442 = vmatpush.bf16.msrb.mxu3 %v6366_v0  ;;  %v7922_v55 = vld [vmem:[#allocation8 + $0x144] sm:$0xf]  ;;  %v444_v60 = vperm.slane %v8768_v30, 2 }
 0x137   :  { %v1999_v37 = vmax.f32 %v1798_v8, 0.0  ;;  %v6341_v8 = vld [vmem:[#allocation8 + $0x1c0] sm:$0xf] }
 0x138   :  { %2457 = vmatpush.bf16.msra.mxu0 %v6170_v19  ;;  %v6130_v19 = vor.u32 %v7884_v7, %v6127_v62  ;;  %2432 = vmatpush.bf16.msrb.mxu2 %v6270_v28  ;;  %v6271_v7 = vld [vmem:[#allocation8 + $0x138] sm:$0xf0]  ;;  %v6247_v28 = vld [vmem:[#allocation8 + $0x108] sm:$0xf0] }
 0x139   :  { %2471 = vmatpush.bf16.msra.mxu1 %v6234_v24  ;;  %v1799_v10 = vpop.f32.mrf.mxu1  ;;  %v6194_v24 = vor.u32 %v7900_v16, %v6191_v18  ;;  %v1811_v46 = vpop.f32.mrf.mxu2  ;;  %v6274_v62 = vor.u32 %v7920_v4, %v6271_v7  ;;  %v7937_v16 = vld [vmem:[#allocation8 + $0x1b4] sm:$0xf0]  ;;  %v6343_v7 = vld [vmem:[#allocation8 + $0x1c8] sm:$0xf0] }
 0x13a   :  { %v1785_v5 = vpop.f32.mrf.mxu0  ;;  %v1825_v50 = vpop.f32.mrf.mxu3 }
 0x13b   :  { %v1786_v9 = vadd.f32 %v1785_v5, %v1772_v3  ;;  %v7941_v3 = vld [vmem:[#allocation8 + $0x1d4] sm:$0xf0] }
 0x13c   :  { %2458 = vmatpush.bf16.msra.mxu0 %v6162_v27  ;;  %v6183_v27 = vld [vmem:[#allocation8 + $0x88] sm:$0xf0] }
 0x13d   :  { %2472 = vmatpush.bf16.msra.mxu1 %v6226_v32  ;;  %v1800_v23 = vadd.f32 %v1799_v10, %v1786_v9  ;;  %v7919_v32 = vld [vmem:[#allocation8 + $0x124] sm:$0xf0]  ;;  %v6186_v34 = vor.u32 %v7898_v41, %v6183_v27  ;;  %v1812_v10 = vadd.f32 %v1811_v46, %v444_v60  ;;  %v7914_v27 = vld [vmem:[#allocation8 + $0x104] sm:$0xf] }
 0x13e   :  { %v6262_v33 = vor.u32 %v7919_v32, %v6261_v31  ;;  %v7939_v9 = vld [vmem:[#allocation8 + $0x1c4] sm:$0xf0] }
 0x13f   :  { %v2003_v20 = vmax.f32 %v1800_v23, 0.0  ;;  %v6342_v14 = vor.u32 %v7939_v9, %v6341_v8  ;;  %v6333_v23 = vld [vmem:[#allocation8 + $0x1b0] sm:$0xf] }
 0x140   :  { %2459 = vmatpush.bf16.msra.mxu0 %v6154_v43  ;;  %2433 = vmatpush.bf16.msrb.mxu2 %v6262_v33  ;;  %v7928_v43 = vld [vmem:[#allocation8 + $0x174] sm:$0xf] }
 0x141   :  { %2473 = vmatpush.bf16.msra.mxu1 %v6218_v48  ;;  %v2007_v26 = vpack.c.bf16 %v2003_v20, %v1999_v37  ;;  %v6306_v45 = vor.u32 %v7928_v43, %v6303_v44  ;;  %v6295_v48 = vld [vmem:[#allocation8 + $0x168] sm:$0xf0]  ;;  %v1813_v56 = vpop.f32.mrf.mxu2  ;;  %v6255_v37 = vld [vmem:[#allocation8 + $0x118] sm:$0xf0]  ;;  %v1826_v20 = vadd.f32 %v1825_v50, %v1812_v10  ;;  %v6318_v44 = vor.u32 %v7933_v39, %v6317_v38 }
 0x142   :  { %v6298_v49 = vor.u32 %v7926_v47, %v6295_v48  ;;  %v1827_v5 = vpop.f32.mrf.mxu3  ;;  %v1814_v42 = vadd.f32 %v1813_v56, %v444_v60  ;;  %v6309_v48 = vld [vmem:[#allocation8 + $0x180] sm:$0xf]  ;;  %v6359_v56 = vld [vmem:[#allocation8 + $0x1e8] sm:$0xf0] }
 0x143   :  { %2422 = vmatmul.bf16.vlgmr.msrb.gmra.mxu1 %v2007_v26 }
 0x144   :  { %2460 = vmatpush.bf16.msra.mxu0 %v6146_v54  ;;  %2434 = vmatpush.bf16.msrb.mxu2 %v6254_v36  ;;  %v7943_v54 = vld [vmem:[#allocation8 + $0x1e4] sm:$0xf0] }
 0x145   :  { %2474 = vmatpush.bf16.msra.mxu1 %v6210_v59  ;;  %v6358_v58 = vor.u32 %v7943_v54, %v6357_v57  ;;  %v6279_v59 = vld [vmem:[#allocation8 + $0x148] sm:$0xf0] }
 0x146   :  { %v6282_v61 = vor.u32 %v7922_v55, %v6279_v59  ;;  %v7942_v55 = vld [vmem:[#allocation8 + $0x1e4] sm:$0xf] }
 0x147   :  { %2443 = vmatpush.bf16.msrb.mxu3 %v6358_v58  ;;  %v6362_v59 = vor.u32 %v7942_v55, %v6359_v56  ;;  %v7960_v55 = vld [vmem:[#allocation11 + $0x70] sm:$0xff]  ;;  %v7947_v56 = vld [vmem:[#allocation11 + $0x8] sm:$0xff] }
 0x148   :  { %2461 = vmatpush.bf16.msra.mxu0 %v6138_v6  ;;  %2435 = vmatpush.bf16.msrb.mxu2 %v6246_v40  ;;  %v6350_v6 = vor.u32 %v7941_v3, %v6349_v1  ;;  %v6351_v1 = vld [vmem:[#allocation8 + $0x1d8] sm:$0xf0] }
 0x149   :  { %2475 = vmatpush.bf16.msra.mxu1 %v6202_v12  ;;  %v7918_v12 = vld [vmem:[#allocation8 + $0x124] sm:$0xf] }
 0x14a   :  { %v6266_v15 = vor.u32 %v7918_v12, %v6263_v13  ;;  %v6335_v12 = vld [vmem:[#allocation8 + $0x1b8] sm:$0xf0]  ;;  %v445_v13 = vperm.slane %v8768_v30, 3 }
 0x14b   :  { %2444 = vmatpush.bf16.msrb.mxu3 %v6350_v6  ;;  %v7938_v6 = vld [vmem:[#allocation8 + $0x1c4] sm:$0xf] }
 0x14c   :  { %2462 = vmatpush.bf16.msra.mxu0 %v6130_v19  ;;  %2484 = vmatpush.bf16.msra.mxu2 %v6306_v45  ;;  %v7916_v19 = vld [vmem:[#allocation8 + $0x114] sm:$0xf]  ;;  %v6346_v8 = vor.u32 %v7938_v6, %v6343_v7  ;;  %v2074_v6 = vld [vmem:[#allocation10] sm:$0x3]  ;;  %v7954_v7 = vld [vmem:[#allocation11 + $0x40] sm:$0xff] }
 0x14d   :  { %2476 = vmatpush.bf16.msra.mxu1 %v6194_v24  ;;  %v6334_v24 = vor.u32 %v7937_v16, %v6333_v23  ;;  %v6258_v2 = vor.u32 %v7916_v19, %v6255_v37  ;;  %v6327_v23 = vld [vmem:[#allocation8 + $0x1a8] sm:$0xf0] }
 0x14f   :  { %2445 = vmatpush.bf16.msrb.mxu3 %v6342_v14 }
 0x150   :  { %2463 = vmatpush.bf16.msra.mxu0 %v6122_v29  ;;  %2485 = vmatpush.bf16.msra.mxu2 %v6298_v49  ;;  %v1828_v29 = vadd.f32 %v1827_v5, %v1814_v42  ;;  %v7931_v49 = vld [vmem:[#allocation8 + $0x184] sm:$0xf0]  ;;  %v6319_v42 = vld [vmem:[#allocation8 + $0x198] sm:$0xf0] }
 0x151   :  { %2477 = vmatpush.bf16.msra.mxu1 %v6186_v34  ;;  %v1853_v18 = vpop.f32.mrf.mxu1  ;;  %v6250_v34 = vor.u32 %v7914_v27, %v6247_v28  ;;  %v6310_v11 = vor.u32 %v7931_v49, %v6309_v48  ;;  %v6311_v27 = vld [vmem:[#allocation8 + $0x188] sm:$0xf0] }
 0x152   :  { %v1839_v63 = vpop.f32.mrf.mxu0 }
 0x153   :  { %2464 = vmatmul.bf16.vlgmr.msra.gmra.mxu0 %v8782_v17  ;;  %v6290_v17 = vor.u32 %v7924_v52, %v6287_v53  ;;  %v1840_v31 = vadd.f32 %v1839_v63, %v1826_v20  ;;  %2446 = vmatpush.bf16.msrb.mxu3 %v6334_v24  ;;  %v6367_v52 = vld [vmem:[#allocation8 + $0x1f8] sm:$0xf0]  ;;  %v7940_v63 = vld [vmem:[#allocation8 + $0x1d4] sm:$0xf] }
 0x154   :  { %2478 = vmatmul.bf16.vlgmr.msra.gmra.mxu1 %v2007_v26  ;;  %v7935_v26 = vld [vmem:[#allocation8 + $0x1a4] sm:$0xf0]  ;;  %v6370_v53 = vor.u32 %v7944_v51, %v6367_v52  ;;  %v6354_v4 = vor.u32 %v7940_v63, %v6351_v1  ;;  %v7932_v20 = vld [vmem:[#allocation8 + $0x194] sm:$0xf]  ;;  %v7953_v51 = vld [vmem:[#allocation11 + $0x38] sm:$0xff] }
 0x155   :  { %2486 = vmatpush.bf16.msra.mxu2 %v6290_v17  ;;  %v6326_v33 = vor.u32 %v7935_v26, %v6325_v25  ;;  %v1854_v22 = vadd.f32 %v1853_v18, %v1840_v31  ;;  %2650 = vmatpush.bf16.msrb.mxu0 %v7953_v51  ;;  %v7952_v52 = vld [vmem:[#allocation11 + $0x30] sm:$0xff]  ;;  %v7975_v51 = vld [vmem:[#allocation14 + $0x64] sm:$0xf0] }
 0x156   :  { %v7956_v63 = vld [vmem:[#allocation11 + $0x50] sm:$0xff] }
 0x157   :  { %2447 = vmatpush.bf16.msrb.mxu3 %v6326_v33 }
 0x159   :  { %2487 = vmatpush.bf16.msra.mxu2 %v6282_v61  ;;  %v1867_v21 = vpop.f32.mrf.mxu2  ;;  %v1881_v32 = vpop.f32.mrf.mxu3  ;;  %2651 = vmatpush.bf16.msrb.mxu0 %v7952_v52  ;;  %v7974_v52 = vld [vmem:[#allocation14 + $0x64] sm:$0xf] }
 0x15a   :  { %v1841_v41 = vpop.f32.mrf.mxu0  ;;  %v1855_v36 = vpop.f32.mrf.mxu1  ;;  %v1868_v45 = vadd.f32 %v1867_v21, %v1854_v22  ;;  %v7930_v21 = vld [vmem:[#allocation8 + $0x184] sm:$0xf] }
 0x15b   :  { %v1842_v35 = vadd.f32 %v1841_v41, %v1828_v29  ;;  %2448 = vmatpush.bf16.msrb.mxu3 %v6318_v44  ;;  %v6322_v41 = vor.u32 %v7932_v20, %v6319_v42  ;;  %v6314_v30 = vor.u32 %v7930_v21, %v6311_v27 }
 0x15c   :  { %v1882_v0 = vadd.f32 %v1881_v32, %v1868_v45 }
 0x15d   :  { %2488 = vmatpush.bf16.msra.mxu2 %v6274_v62  ;;  %v1856_v46 = vadd.f32 %v1855_v36, %v1842_v35  ;;  %v7936_v62 = vld [vmem:[#allocation8 + $0x1b4] sm:$0xf] }
 0x15e   :  { %v6338_v14 = vor.u32 %v7936_v62, %v6335_v12 }
 0x15f   :  { %2449 = vmatpush.bf16.msrb.mxu3 %v6310_v11 }
 0x161   :  { %2489 = vmatpush.bf16.msra.mxu2 %v6266_v15  ;;  %v1869_v40 = vpop.f32.mrf.mxu2  ;;  %v1883_v50 = vpop.f32.mrf.mxu3  ;;  %v7934_v15 = vld [vmem:[#allocation8 + $0x1a4] sm:$0xf] }
 0x162   :  { %v1870_v47 = vadd.f32 %v1869_v40, %v1856_v46  ;;  %v6330_v16 = vor.u32 %v7934_v15, %v6327_v23 }
 0x163   :  { %2498 = vmatpush.bf16.msra.mxu3 %v6370_v53  ;;  %v7950_v53 = vld [vmem:[#allocation11 + $0x20] sm:$0xff] }
 0x164   :  { %v1884_v17 = vadd.f32 %v1883_v50, %v1870_v47 }
 0x165   :  { %2490 = vmatpush.bf16.msra.mxu2 %v6258_v2 }
 0x167   :  { %2499 = vmatpush.bf16.msra.mxu3 %v6362_v59  ;;  %v7946_v59 = vld [vmem:[#allocation11] sm:$0xff] }
 0x169   :  { %2491 = vmatpush.bf16.msra.mxu2 %v6250_v34 }
 0x16b   :  { %2500 = vmatpush.bf16.msra.mxu3 %v6354_v4 }
 0x16f   :  { %2501 = vmatpush.bf16.msra.mxu3 %v6346_v8  ;;  %v2076_v8 = vperm.slane %v2074_v6, 0 }
 0x171   :  { %v1909_v5 = vpop.f32.mrf.mxu1 }
 0x172   :  { %v1895_v43 = vpop.f32.mrf.mxu0  ;;  %v1910_v19 = vadd.f32 %v1909_v5, %v445_v13  ;;  %v7955_v5 = vld [vmem:[#allocation11 + $0x48] sm:$0xff] }
 0x173   :  { %v1896_v57 = vadd.f32 %v1895_v43, %v1882_v0  ;;  %2502 = vmatpush.bf16.msra.mxu3 %v6338_v14  ;;  %v7951_v0 = vld [vmem:[#allocation11 + $0x28] sm:$0xff] }
 0x174   :  { %2652 = vmatpush.bf16.msrb.mxu0 %v7951_v0 }
 0x175   :  { %v2000_v60 = vmax.f32 %v1896_v57, 0.0  ;;  %v7961_v57 = vld [vmem:[#allocation11 + $0x78] sm:$0xff] }
 0x176   :  { %2664 = vmatpush.bf16.msrb.mxu1 %v7961_v57  ;;  %v6477_v57 = vld [vmem:[#allocation14 + $0x50] sm:$0xf] }
 0x177   :  { %2503 = vmatpush.bf16.msra.mxu3 %v6330_v16 }
 0x178   :  { %2653 = vmatpush.bf16.msrb.mxu0 %v7950_v53  ;;  %v6487_v53 = vld [vmem:[#allocation14 + $0x68] sm:$0xf0] }
 0x179   :  { %v1923_v9 = vpop.f32.mrf.mxu2  ;;  %v1937_v10 = vpop.f32.mrf.mxu3 }
 0x17a   :  { %v1897_v54 = vpop.f32.mrf.mxu0  ;;  %v1911_v18 = vpop.f32.mrf.mxu1  ;;  %v1924_v24 = vadd.f32 %v1923_v9, %v1910_v19  ;;  %2665 = vmatpush.bf16.msrb.mxu1 %v7960_v55  ;;  %v7972_v55 = vld [vmem:[#allocation14 + $0x54] sm:$0xf] }
 0x17b   :  { %v1898_v58 = vadd.f32 %v1897_v54, %v1884_v17  ;;  %v1912_v2 = vadd.f32 %v1911_v18, %v445_v13  ;;  %2504 = vmatpush.bf16.msra.mxu3 %v6322_v41  ;;  %v7949_v17 = vld [vmem:[#allocation11 + $0x18] sm:$0xff]  ;;  %v7948_v54 = vld [vmem:[#allocation11 + $0x10] sm:$0xff] }
 0x17c   :  { %v1938_v29 = vadd.f32 %v1937_v10, %v1924_v24  ;;  %2654 = vmatpush.bf16.msrb.mxu0 %v7949_v17  ;;  %v6490_v17 = vor.u32 %v7974_v52, %v6487_v53  ;;  %v8000_v52 = vld [vmem:[#allocation17 + $0xac] sm:$0xf0]  ;;  %v6709_v53 = vld [vmem:[#allocation17 + $0x1a0] sm:$0xf] }
 0x17d   :  { %v2004_v61 = vmax.f32 %v1898_v58, 0.0  ;;  %v7959_v58 = vld [vmem:[#allocation11 + $0x68] sm:$0xff] }
 0x17e   :  { %2666 = vmatpush.bf16.msrb.mxu1 %v7959_v58  ;;  %v6479_v58 = vld [vmem:[#allocation14 + $0x58] sm:$0xf0] }
 0x17f   :  { %v2008_v3 = vpack.c.bf16 %v2004_v61, %v2000_v60  ;;  %2505 = vmatpush.bf16.msra.mxu3 %v6314_v30  ;;  %v7958_v60 = vld [vmem:[#allocation11 + $0x60] sm:$0xff]  ;;  %v7957_v61 = vld [vmem:[#allocation11 + $0x58] sm:$0xff] }
 0x180   :  { %2655 = vmatpush.bf16.msrb.mxu0 %v7948_v54  ;;  %v7973_v54 = vld [vmem:[#allocation14 + $0x54] sm:$0xf0] }
 0x181   :  { %2436 = vmatmul.bf16.vlgmr.msrb.gmra.mxu2 %v2008_v3  ;;  %v1925_v37 = vpop.f32.mrf.mxu2  ;;  %v1939_v25 = vpop.f32.mrf.mxu3 }
 0x182   :  { %v1926_v31 = vadd.f32 %v1925_v37, %v1912_v2  ;;  %2667 = vmatpush.bf16.msrb.mxu1 %v7958_v60  ;;  %v6469_v60 = vld [vmem:[#allocation14 + $0x40] sm:$0xf] }
 0x184   :  { %v1940_v34 = vadd.f32 %v1939_v25, %v1926_v31  ;;  %2656 = vmatpush.bf16.msrb.mxu0 %v7947_v56  ;;  %v6478_v56 = vor.u32 %v7973_v54, %v6477_v57  ;;  %v7998_v57 = vld [vmem:[#allocation17 + $0xa4] sm:$0xf] }
 0x186   :  { %2668 = vmatpush.bf16.msrb.mxu1 %v7957_v61  ;;  %v7971_v61 = vld [vmem:[#allocation14 + $0x44] sm:$0xf0] }
 0x188   :  { %2657 = vmatpush.bf16.msrb.mxu0 %v7946_v59  ;;  %v6482_v59 = vor.u32 %v7972_v55, %v6479_v58  ;;  %v6583_v55 = vld [vmem:[#allocation17 + $0xb0] sm:$0xf0] }
 0x189   :  { %v6711_v58 = vld [vmem:[#allocation17 + $0x1b0] sm:$0xf0] }
 0x18a   :  { %2669 = vmatpush.bf16.msrb.mxu1 %v7956_v63  ;;  %v7970_v63 = vld [vmem:[#allocation14 + $0x44] sm:$0xf] }
 0x18e   :  { %2670 = vmatpush.bf16.msrb.mxu1 %v7955_v5  ;;  %v6461_v5 = vld [vmem:[#allocation14 + $0x30] sm:$0xf] }
 0x191   :  { %2492 = vmatmul.bf16.vlgmr.msra.gmra.mxu2 %v2008_v3  ;;  %v1965_v28 = vpop.f32.mrf.mxu1 }
 0x192   :  { %v1951_v26 = vpop.f32.mrf.mxu0  ;;  %2671 = vmatpush.bf16.msrb.mxu1 %v7954_v7  ;;  %v7968_v7 = vld [vmem:[#allocation14 + $0x34] sm:$0xf] }
 0x193   :  { %v1952_v32 = vadd.f32 %v1951_v26, %v1938_v29  ;;  %v2077_v26 = vperm.slane %v2074_v6, 1  ;;  %v7969_v6 = vld [vmem:[#allocation14 + $0x34] sm:$0xf0] }
 0x195   :  { %v1966_v36 = vadd.f32 %v1965_v28, %v1952_v32 }
 0x199   :  { %v1979_v33 = vpop.f32.mrf.mxu2  ;;  %v1993_v22 = vpop.f32.mrf.mxu3 }
 0x19a   :  { %v1953_v35 = vpop.f32.mrf.mxu0  ;;  %v1980_v39 = vadd.f32 %v1979_v33, %v1966_v36  ;;  %v1967_v40 = vpop.f32.mrf.mxu1 }
 0x19b   :  { %v1954_v38 = vadd.f32 %v1953_v35, %v1940_v34 }
 0x19c   :  { %v1994_v45 = vadd.f32 %v1993_v22, %v1980_v39 }
 0x19d   :  { %v1968_v43 = vadd.f32 %v1967_v40, %v1954_v38 }
 0x19e   :  { %v2001_v49 = vmax.f32 %v1994_v45, 0.0  ;;  %v6493_v45 = vld [vmem:[#allocation14 + $0x70] sm:$0xf] }
 0x1a1   :  { %v1981_v44 = vpop.f32.mrf.mxu2  ;;  %v1995_v47 = vpop.f32.mrf.mxu3 }
 0x1a2   :  { %v1982_v46 = vadd.f32 %v1981_v44, %v1968_v43 }
 0x1a4   :  { %v1996_v48 = vadd.f32 %v1995_v47, %v1982_v46  ;;  %v7977_v46 = vld [vmem:[#allocation14 + $0x74] sm:$0xf0]  ;;  %v7976_v47 = vld [vmem:[#allocation14 + $0x74] sm:$0xf] }
 0x1a6   :  { %v2005_v50 = vmax.f32 %v1996_v48, 0.0  ;;  %v6494_v48 = vor.u32 %v7977_v46, %v6493_v45 }
 0x1a8   :  { %v2009_v11 = vpack.c.bf16 %v2005_v50, %v2001_v49  ;;  %v6495_v49 = vld [vmem:[#allocation14 + $0x78] sm:$0xf0]  ;;  %2783 = vmatpush.bf16.msrb.mxu2 %v6494_v48  ;;  %v6599_v48 = vld [vmem:[#allocation17 + $0xd0] sm:$0xf0] }
 0x1a9   :  { %v6498_v50 = vor.u32 %v7976_v47, %v6495_v49  ;;  %v8002_v47 = vld [vmem:[#allocation17 + $0xc4] sm:$0xf] }
 0x1aa   :  { %2450 = vmatmul.bf16.vlgmr.msrb.gmra.mxu3 %v2009_v11  ;;  %v8034_v49 = vld [vmem:[#allocation17 + $0x1c4] sm:$0xf] }
 0x1ab   :  { %2797 = vmatpush.bf16.msrb.mxu3 %v6498_v50  ;;  %v6602_v50 = vor.u32 %v8002_v47, %v6599_v48  ;;  %v8014_v48 = vld [vmem:[#allocation17 + $0x124] sm:$0xf] }
 0x1af   :  { %2798 = vmatpush.bf16.msrb.mxu3 %v6490_v17  ;;  %v8032_v17 = vld [vmem:[#allocation17 + $0x1ac] sm:$0xf0] }
 0x1b0   :  { %v2409_v1 = vpop.f32.mrf.mxu0 }
 0x1b1   :  { %v2410_v13 = vadd.f32 %v2409_v1, %v2076_v8  ;;  %v6470_v1 = vor.u32 %v7971_v61, %v6469_v60  ;;  %v6586_v60 = vor.u32 %v7998_v57, %v6583_v55  ;;  %v6565_v61 = vld [vmem:[#allocation17 + $0x80] sm:$0xf] }
 0x1b2   :  { %v6629_v55 = vld [vmem:[#allocation17 + $0x100] sm:$0xf] }
 0x1b3   :  { %2799 = vmatpush.bf16.msrb.mxu3 %v6482_v59  ;;  %v6710_v59 = vor.u32 %v8032_v17, %v6709_v53  ;;  %v6501_v53 = vld [vmem:[#allocation17] sm:$0xf]  ;;  %v7980_v17 = vld [vmem:[#allocation17 + $0xc] sm:$0xf0] }
 0x1b8   :  { %v2411_v9 = vpop.f32.mrf.mxu0 }
 0x1b9   :  { %v2412_v14 = vadd.f32 %v2411_v9, %v2076_v8  ;;  %v6462_v8 = vor.u32 %v7969_v6, %v6461_v5  ;;  %v6463_v9 = vld [vmem:[#allocation14 + $0x38] sm:$0xf0]  ;;  %v7994_v5 = vld [vmem:[#allocation17 + $0x84] sm:$0xf]  ;;  %v6567_v6 = vld [vmem:[#allocation17 + $0x90] sm:$0xf0] }
 0x1ba   :  { %2506 = vmatmul.bf16.vlgmr.msra.gmra.mxu3 %v2009_v11  ;;  %v6485_v11 = vld [vmem:[#allocation14 + $0x60] sm:$0xf] }
 0x1bb   :  { %v6486_v0 = vor.u32 %v7975_v51, %v6485_v11  ;;  %v6727_v11 = vld [vmem:[#allocation17 + $0x1d0] sm:$0xf0]  ;;  %v6581_v51 = vld [vmem:[#allocation17 + $0xa0] sm:$0xf] }
 0x1bc   :  { %v6582_v54 = vor.u32 %v8000_v52, %v6581_v51 }
 0x1bd   :  { %2784 = vmatpush.bf16.msrb.mxu2 %v6486_v0  ;;  %v6730_v0 = vor.u32 %v8034_v49, %v6727_v11  ;;  %v6647_v49 = vld [vmem:[#allocation17 + $0x130] sm:$0xf0] }
 0x1c0   :  { %v2423_v3 = vpop.f32.mrf.mxu1 }
 0x1c1   :  { %v2424_v15 = vadd.f32 %v2423_v3, %v2410_v13  ;;  %2785 = vmatpush.bf16.msrb.mxu2 %v6478_v56  ;;  %v6471_v3 = vld [vmem:[#allocation14 + $0x48] sm:$0xf0]  ;;  %v7966_v13 = vld [vmem:[#allocation14 + $0x24] sm:$0xf] }
 0x1c2   :  { %v8030_v56 = vld [vmem:[#allocation17 + $0x1a4] sm:$0xf] }
 0x1c5   :  { %2786 = vmatpush.bf16.msrb.mxu2 %v6470_v1  ;;  %v6693_v1 = vld [vmem:[#allocation17 + $0x180] sm:$0xf] }
 0x1c8   :  { %v2425_v10 = vpop.f32.mrf.mxu1 }
 0x1c9   :  { %v2426_v23 = vadd.f32 %v2425_v10, %v2412_v14  ;;  %v6466_v10 = vor.u32 %v7968_v7, %v6463_v9  ;;  %2787 = vmatpush.bf16.msrb.mxu2 %v6462_v8  ;;  %v8026_v8 = vld [vmem:[#allocation17 + $0x184] sm:$0xf]  ;;  %v6695_v9 = vld [vmem:[#allocation17 + $0x190] sm:$0xf0] }
 0x1d0   :  { %v2465_v18 = vpop.f32.mrf.mxu0 }
 0x1d1   :  { %v2479_v20 = vpop.f32.mrf.mxu1  ;;  %v2466_v28 = vadd.f32 %v2465_v18, %v2077_v26  ;;  %v7965_v18 = vld [vmem:[#allocation14 + $0x14] sm:$0xf0] }
 0x1d3   :  { %v2480_v32 = vadd.f32 %v2479_v20, %v2466_v28  ;;  %v6447_v20 = vld [vmem:[#allocation14 + $0x18] sm:$0xf0]  ;;  %v6741_v28 = vld [vmem:[#allocation17 + $0x1e0] sm:$0xf] }
 0x1d8   :  { %v2467_v27 = vpop.f32.mrf.mxu0 }
 0x1d9   :  { %v2481_v29 = vpop.f32.mrf.mxu1  ;;  %v2468_v31 = vadd.f32 %v2467_v27, %v2077_v26  ;;  %v6439_v26 = vld [vmem:[#allocation14 + $0x8] sm:$0xf0]  ;;  %v6613_v27 = vld [vmem:[#allocation17 + $0xe0] sm:$0xf] }
 0x1db   :  { %v2482_v34 = vadd.f32 %v2481_v29, %v2468_v31  ;;  %v8040_v31 = vld [vmem:[#allocation17 + $0x1ec] sm:$0xf0] }
 0x204   :  { %v2437_v4 = vpop.f32.mrf.mxu2 }
 0x205   :  { %v2438_v16 = vadd.f32 %v2437_v4, %v2424_v15  ;;  %v6474_v4 = vor.u32 %v7970_v63, %v6471_v3  ;;  %v6455_v15 = vld [vmem:[#allocation14 + $0x28] sm:$0xf0]  ;;  %v7996_v63 = vld [vmem:[#allocation17 + $0x8c] sm:$0xf0]  ;;  %v6714_v3 = vor.u32 %v8030_v56, %v6711_v58 }
 0x206   :  { %v8012_v58 = vld [vmem:[#allocation17 + $0x10c] sm:$0xf0] }
 0x207   :  { %2800 = vmatpush.bf16.msrb.mxu3 %v6474_v4  ;;  %v8028_v4 = vld [vmem:[#allocation17 + $0x18c] sm:$0xf0] }
 0x20b   :  { %2801 = vmatpush.bf16.msrb.mxu3 %v6466_v10  ;;  %v6566_v10 = vor.u32 %v7996_v63, %v6565_v61  ;;  %v6502_v61 = vor.u32 %v7980_v17, %v6501_v53  ;;  %v8010_v63 = vld [vmem:[#allocation17 + $0x104] sm:$0xf]  ;;  %v6703_v53 = vld [vmem:[#allocation17 + $0x198] sm:$0xf0] }
 0x20c   :  { %v2439_v62 = vpop.f32.mrf.mxu2 }
 0x20d   :  { %v2440_v19 = vadd.f32 %v2439_v62, %v2426_v23  ;;  %v6453_v62 = vld [vmem:[#allocation14 + $0x20] sm:$0xf]  ;;  %v6458_v23 = vor.u32 %v7966_v13, %v6455_v15 }
 0x20e   :  { %v6549_v13 = vld [vmem:[#allocation17 + $0x60] sm:$0xf] }
 0x20f   :  { %2802 = vmatpush.bf16.msrb.mxu3 %v6458_v23  ;;  %v6677_v15 = vld [vmem:[#allocation17 + $0x160] sm:$0xf]  ;;  %v6698_v23 = vor.u32 %v8026_v8, %v6695_v9  ;;  %v6621_v9 = vld [vmem:[#allocation17 + $0xe8] sm:$0xf] }
 0x214   :  { %v2493_v24 = vpop.f32.mrf.mxu2 }
 0x215   :  { %v2494_v22 = vadd.f32 %v2493_v24, %v2480_v32  ;;  %v7963_v24 = vld [vmem:[#allocation14 + $0x4] sm:$0xf0] }
 0x216   :  { %v8006_v32 = vld [vmem:[#allocation17 + $0xe4] sm:$0xf] }
 0x21c   :  { %v2495_v33 = vpop.f32.mrf.mxu2 }
 0x21d   :  { %v2496_v35 = vadd.f32 %v2495_v33, %v2482_v34  ;;  %v6615_v33 = vld [vmem:[#allocation17 + $0xf0] sm:$0xf0]  ;;  %v6742_v34 = vor.u32 %v8040_v31, %v6741_v28  ;;  %v7986_v28 = vld [vmem:[#allocation17 + $0x44] sm:$0xf]  ;;  %v8286_v31 = vld [vmem:[#allocation13] ss:$0 sm:$0xff] }
 0x21f   :  { %3225 = vmatpush.bf16.msra.mxu1 %v6742_v34 }
 0x22d   :  { %v2451_v12 = vpop.f32.mrf.mxu3 }
 0x22e   :  { %v2452_v37 = vadd.f32 %v2451_v12, %v2438_v16  ;;  %v7967_v12 = vld [vmem:[#allocation14 + $0x24] sm:$0xf0]  ;;  %v6445_v16 = vld [vmem:[#allocation14 + $0x10] sm:$0xf] }
 0x22f   :  { %v6454_v14 = vor.u32 %v7967_v12, %v6453_v62  ;;  %v6694_v62 = vor.u32 %v8028_v4, %v6693_v1  ;;  %v6570_v12 = vor.u32 %v7994_v5, %v6567_v6  ;;  %v6631_v1 = vld [vmem:[#allocation17 + $0x110] sm:$0xf0]  ;;  %v6630_v5 = vor.u32 %v8012_v58, %v6629_v55  ;;  %v6685_v55 = vld [vmem:[#allocation17 + $0x168] sm:$0xf]  ;;  %v8025_v58 = vld [vmem:[#allocation17 + $0x174] sm:$0xf0] }
 0x230   :  { %v2512_v2 = vmax.f32 %v2452_v37, 0.0  ;;  %v6446_v37 = vor.u32 %v7965_v18, %v6445_v16  ;;  %v8024_v16 = vld [vmem:[#allocation17 + $0x16c] sm:$0xf0]  ;;  %v7990_v18 = vld [vmem:[#allocation17 + $0x64] sm:$0xf]  ;;  %v6634_v8 = vor.u32 %v8010_v63, %v6631_v1 }
 0x231   :  { %2788 = vmatpush.bf16.msrb.mxu2 %v6454_v14  ;;  %v7992_v14 = vld [vmem:[#allocation17 + $0x6c] sm:$0xf0]  ;;  %v8023_v1 = vld [vmem:[#allocation17 + $0x16c] sm:$0xf] }
 0x235   :  { %v2453_v42 = vpop.f32.mrf.mxu3  ;;  %2789 = vmatpush.bf16.msrb.mxu2 %v6446_v37  ;;  %v8022_v37 = vld [vmem:[#allocation17 + $0x164] sm:$0xf] }
 0x236   :  { %v2454_v21 = vadd.f32 %v2453_v42, %v2440_v19  ;;  %v7964_v19 = vld [vmem:[#allocation14 + $0x14] sm:$0xf] }
 0x237   :  { %v6450_v42 = vor.u32 %v7964_v19, %v6447_v20  ;;  %v6551_v19 = vld [vmem:[#allocation17 + $0x70] sm:$0xf0] }
 0x238   :  { %v2514_v25 = vmax.f32 %v2454_v21, 0.0  ;;  %v6437_v21 = vld [vmem:[#allocation14] sm:$0xf]  ;;  %v6679_v20 = vld [vmem:[#allocation17 + $0x170] sm:$0xf0] }
 0x239   :  { %2803 = vmatpush.bf16.msrb.mxu3 %v6450_v42  ;;  %v6550_v42 = vor.u32 %v7992_v14, %v6549_v13  ;;  %v8041_v13 = vld [vmem:[#allocation17 + $0x1f4] sm:$0xf0]  ;;  %v8007_v14 = vld [vmem:[#allocation17 + $0xec] sm:$0xf] }
 0x23a   :  { %v2516_v41 = vpack.c.bf16 %v2514_v25, %v2512_v2  ;;  %v7962_v2 = vld [vmem:[#allocation14 + $0x4] sm:$0xf]  ;;  %v6438_v25 = vor.u32 %v7963_v24, %v6437_v21  ;;  %v6678_v21 = vor.u32 %v8024_v16, %v6677_v15  ;;  %v6554_v24 = vor.u32 %v7990_v18, %v6551_v19  ;;  %v6623_v15 = vld [vmem:[#allocation17 + $0xf8] sm:$0xf0]  ;;  %v8039_v18 = vld [vmem:[#allocation17 + $0x1ec] sm:$0xf] }
 0x23b   :  { %v6626_v16 = vor.u32 %v8007_v14, %v6623_v15  ;;  %v6751_v19 = vld [vmem:[#allocation17 + $0x1f8] sm:$0xf0] }
 0x23c   :  { %2658 = vmatmul.bf16.vlgmr.msrb.gmra.mxu0 %v2516_v41  ;;  %v6442_v41 = vor.u32 %v7962_v2, %v6439_v26  ;;  %2790 = vmatpush.bf16.msrb.mxu2 %v6438_v25  ;;  %v6533_v2 = vld [vmem:[#allocation17 + $0x40] sm:$0xf]  ;;  %v7988_v25 = vld [vmem:[#allocation17 + $0x4c] sm:$0xf0]  ;;  %v6671_v15 = vld [vmem:[#allocation17 + $0x158] sm:$0xf0] }
 0x23d   :  { %v2507_v30 = vpop.f32.mrf.mxu3  ;;  %v6661_v26 = vld [vmem:[#allocation17 + $0x140] sm:$0xf]  ;;  %v6534_v34 = vor.u32 %v7988_v25, %v6533_v2  ;;  %v8037_v2 = vld [vmem:[#allocation17 + $0x1d4] sm:$0xf0]  ;;  %v8003_v25 = vld [vmem:[#allocation17 + $0xcc] sm:$0xf] }
 0x23e   :  { %v2508_v36 = vadd.f32 %v2507_v30, %v2494_v22  ;;  %2804 = vmatpush.bf16.msrb.mxu3 %v6442_v41  ;;  %v8008_v30 = vld [vmem:[#allocation17 + $0xec] sm:$0xf0]  ;;  %v6618_v22 = vor.u32 %v8006_v32, %v6615_v33  ;;  %v8018_v32 = vld [vmem:[#allocation17 + $0x144] sm:$0xf]  ;;  %v6663_v33 = vld [vmem:[#allocation17 + $0x150] sm:$0xf0] }
 0x23f   :  { %v6614_v29 = vor.u32 %v8008_v30, %v6613_v27  ;;  %v6682_v27 = vor.u32 %v8022_v37, %v6679_v20  ;;  %v8020_v30 = vld [vmem:[#allocation17 + $0x14c] sm:$0xf0]  ;;  %v6754_v37 = vor.u32 %v8039_v18, %v6751_v19  ;;  %v6605_v20 = vld [vmem:[#allocation17 + $0xc8] sm:$0xf] }
 0x240   :  { %v2513_v40 = vmax.f32 %v2508_v36, 0.0  ;;  %v6743_v36 = vld [vmem:[#allocation17 + $0x1f0] sm:$0xf0]  ;;  %3239 = vmatpush.bf16.msra.mxu2 %v6618_v22  ;;  %v6653_v19 = vld [vmem:[#allocation17 + $0x128] sm:$0xf] }
 0x241   :  { %3211 = vmatpush.bf16.msra.mxu0 %v6614_v29  ;;  %v6535_v29 = vld [vmem:[#allocation17 + $0x50] sm:$0xf0] }
 0x244   :  { %3240 = vmatpush.bf16.msra.mxu2 %v6602_v50 }
 0x245   :  { %v2509_v38 = vpop.f32.mrf.mxu3 }
 0x246   :  { %v2510_v39 = vadd.f32 %v2509_v38, %v2496_v35  ;;  %v8038_v35 = vld [vmem:[#allocation17 + $0x1e4] sm:$0xf]  ;;  %v6597_v38 = vld [vmem:[#allocation17 + $0xc0] sm:$0xf] }
 0x248   :  { %v2515_v43 = vmax.f32 %v2510_v39, 0.0  ;;  %v6746_v39 = vor.u32 %v8038_v35, %v6743_v36  ;;  %3241 = vmatpush.bf16.msra.mxu2 %v6586_v60  ;;  %v6662_v35 = vor.u32 %v8020_v30, %v6661_v26  ;;  %v6538_v36 = vor.u32 %v7986_v28, %v6535_v29  ;;  %v6503_v60 = vld [vmem:[#allocation17 + $0x10] sm:$0xf0]  ;;  %v6607_v26 = vld [vmem:[#allocation17 + $0xd8] sm:$0xf0] }
 0x249   :  { %v8035_v30 = vld [vmem:[#allocation17 + $0x1cc] sm:$0xf]  ;;  %v6735_v28 = vld [vmem:[#allocation17 + $0x1d8] sm:$0xf0] }
 0x24a   :  { %v2517_v44 = vpack.c.bf16 %v2515_v43, %v2513_v40  ;;  %v8004_v40 = vld [vmem:[#allocation17 + $0xcc] sm:$0xf0]  ;;  %v6725_v43 = vld [vmem:[#allocation17 + $0x1c0] sm:$0xf]  ;;  %3253 = vmatpush.bf16.msra.mxu3 %v6746_v39  ;;  %v6738_v29 = vor.u32 %v8035_v30, %v6735_v28  ;;  %v6637_v30 = vld [vmem:[#allocation17 + $0x108] sm:$0xf] }
 0x24b   :  { %v6598_v45 = vor.u32 %v8004_v40, %v6597_v38  ;;  %v6517_v38 = vld [vmem:[#allocation17 + $0x20] sm:$0xf]  ;;  %v7984_v39 = vld [vmem:[#allocation17 + $0x2c] sm:$0xf0] }
 0x24c   :  { %2672 = vmatmul.bf16.vlgmr.msrb.gmra.mxu1 %v2517_v44  ;;  %v8036_v44 = vld [vmem:[#allocation17 + $0x1cc] sm:$0xf0]  ;;  %3242 = vmatpush.bf16.msra.mxu2 %v6570_v12  ;;  %v6645_v40 = vld [vmem:[#allocation17 + $0x120] sm:$0xf]  ;;  %v6518_v11 = vor.u32 %v7984_v39, %v6517_v38 }
 0x24d   :  { %v6726_v46 = vor.u32 %v8036_v44, %v6725_v43  ;;  %3212 = vmatpush.bf16.msra.mxu0 %v6598_v45  ;;  %v6666_v43 = vor.u32 %v8018_v32, %v6663_v33  ;;  %v8016_v44 = vld [vmem:[#allocation17 + $0x12c] sm:$0xf0]  ;;  %v7982_v45 = vld [vmem:[#allocation17 + $0x24] sm:$0xf]  ;;  %v8001_v32 = vld [vmem:[#allocation17 + $0xb4] sm:$0xf0] }
 0x24e   :  { %3254 = vmatpush.bf16.msra.mxu3 %v6730_v0  ;;  %v6646_v52 = vor.u32 %v8016_v44, %v6645_v40  ;;  %v6717_v33 = vld [vmem:[#allocation17 + $0x1a8] sm:$0xf]  ;;  %v8031_v40 = vld [vmem:[#allocation17 + $0x1ac] sm:$0xf] }
 0x24f   :  { %3226 = vmatpush.bf16.msra.mxu1 %v6726_v46  ;;  %v6519_v46 = vld [vmem:[#allocation17 + $0x30] sm:$0xf0] }
 0x250   :  { %3243 = vmatpush.bf16.msra.mxu2 %v6554_v24  ;;  %v6522_v0 = vor.u32 %v7982_v45, %v6519_v46  ;;  %v6573_v45 = vld [vmem:[#allocation17 + $0x88] sm:$0xf]  ;;  %v7997_v46 = vld [vmem:[#allocation17 + $0x94] sm:$0xf0] }
 0x251   :  { %3213 = vmatpush.bf16.msra.mxu0 %v6582_v54  ;;  %v6650_v54 = vor.u32 %v8014_v48, %v6647_v49  ;;  %v6574_v48 = vor.u32 %v7997_v46, %v6573_v45  ;;  %v8029_v49 = vld [vmem:[#allocation17 + $0x194] sm:$0xf0] }
 0x252   :  { %3255 = vmatpush.bf16.msra.mxu3 %v6714_v3 }
 0x253   :  { %3227 = vmatpush.bf16.msra.mxu1 %v6710_v59  ;;  %v7978_v59 = vld [vmem:[#allocation17 + $0x4] sm:$0xf] }
 0x254   :  { %3244 = vmatpush.bf16.msra.mxu2 %v6538_v36  ;;  %v6506_v6 = vor.u32 %v7978_v59, %v6503_v60  ;;  %v6591_v36 = vld [vmem:[#allocation17 + $0xb8] sm:$0xf0]  ;;  %v7991_v59 = vld [vmem:[#allocation17 + $0x6c] sm:$0xf] }
 0x255   :  { %3214 = vmatpush.bf16.msra.mxu0 %v6566_v10  ;;  %v8009_v10 = vld [vmem:[#allocation17 + $0xf4] sm:$0xf0]  ;;  %v6559_v60 = vld [vmem:[#allocation17 + $0x78] sm:$0xf0] }
 0x256   :  { %3256 = vmatpush.bf16.msra.mxu3 %v6698_v23  ;;  %v6622_v12 = vor.u32 %v8009_v10, %v6621_v9  ;;  %v6562_v63 = vor.u32 %v7991_v59, %v6559_v60  ;;  %v7625_v59 = vld [vmem:[#allocation19 + $0x6c8] sm:$0xf]  ;;  %v8262_v60 = vld [vmem:[#allocation19 + $0x6e0] sm:$0xf0] }
 0x257   :  { %3228 = vmatpush.bf16.msra.mxu1 %v6694_v62  ;;  %v6749_v62 = vld [vmem:[#allocation17 + $0x1e8] sm:$0xf] }
 0x258   :  { %3245 = vmatpush.bf16.msra.mxu2 %v6522_v0  ;;  %v6750_v23 = vor.u32 %v8041_v13, %v6749_v62  ;;  %v8027_v0 = vld [vmem:[#allocation17 + $0x18c] sm:$0xf] }
 0x259   :  { %3215 = vmatpush.bf16.msra.mxu0 %v6550_v42  ;;  %v8005_v42 = vld [vmem:[#allocation17 + $0xd4] sm:$0xf0]  ;;  %v6706_v17 = vor.u32 %v8027_v0, %v6703_v53  ;;  %v7987_v62 = vld [vmem:[#allocation17 + $0x4c] sm:$0xf]  ;;  %v7177_v0 = vld [vmem:[#allocation19 + $0x348] sm:$0xf] }
 0x25a   :  { %3257 = vmatpush.bf16.msra.mxu3 %v6682_v27  ;;  %v6606_v24 = vor.u32 %v8005_v42, %v6605_v20  ;;  %v6610_v27 = vor.u32 %v8003_v25, %v6607_v26  ;;  %v8019_v13 = vld [vmem:[#allocation17 + $0x14c] sm:$0xf]  ;;  %v8150_v53 = vld [vmem:[#allocation19 + $0x360] sm:$0xf0] }
 0x25b   :  { %3229 = vmatpush.bf16.msra.mxu1 %v6678_v21  ;;  %v6733_v21 = vld [vmem:[#allocation17 + $0x1c8] sm:$0xf]  ;;  %v6674_v18 = vor.u32 %v8019_v13, %v6671_v15  ;;  %v7983_v20 = vld [vmem:[#allocation17 + $0x2c] sm:$0xf]  ;;  %v6897_v15 = vld [vmem:[#allocation19 + $0x118] sm:$0xf] }
 0x25c   :  { %3246 = vmatpush.bf16.msra.mxu2 %v6506_v6  ;;  %v7989_v6 = vld [vmem:[#allocation17 + $0x54] sm:$0xf0]  ;;  %v8255_v13 = vld [vmem:[#allocation19 + $0x6a8] sm:$0xf0] }
 0x25d   :  { %3216 = vmatpush.bf16.msra.mxu0 %v6534_v34 }
 0x25e   :  { %3258 = vmatpush.bf16.msra.mxu3 %v6666_v43  ;;  %v6719_v43 = vld [vmem:[#allocation17 + $0x1b8] sm:$0xf0] }
 0x25f   :  { %3230 = vmatpush.bf16.msra.mxu1 %v6662_v35  ;;  %v7999_v35 = vld [vmem:[#allocation17 + $0xac] sm:$0xf]  ;;  %v6722_v44 = vor.u32 %v8031_v40, %v6719_v43 }
 0x260   :  { %v6594_v39 = vor.u32 %v7999_v35, %v6591_v36 }
 0x261   :  { %3217 = vmatpush.bf16.msra.mxu0 %v6518_v11  ;;  %v6575_v11 = vld [vmem:[#allocation17 + $0x98] sm:$0xf0] }
 0x262   :  { %3259 = vmatpush.bf16.msra.mxu3 %v6650_v54  ;;  %v7993_v54 = vld [vmem:[#allocation17 + $0x74] sm:$0xf0] }
 0x263   :  { %3231 = vmatpush.bf16.msra.mxu1 %v6646_v52 }
 0x265   :  { %3218 = vmatpush.bf16.msra.mxu0 %v6502_v61  ;;  %v6686_v61 = vor.u32 %v8025_v58, %v6685_v55  ;;  %v8206_v55 = vld [vmem:[#allocation19 + $0x520] sm:$0xf0] }
 0x266   :  { %3260 = vmatpush.bf16.msra.mxu3 %v6634_v8  ;;  %v8021_v8 = vld [vmem:[#allocation17 + $0x154] sm:$0xf0] }
 0x267   :  { %3232 = vmatpush.bf16.msra.mxu1 %v6630_v5 }
 0x269   :  { %3267 = vmatpush.bf16.msrb.mxu0 %v6622_v12  ;;  %v6543_v12 = vld [vmem:[#allocation17 + $0x58] sm:$0xf0] }
 0x26a   :  { %v6546_v14 = vor.u32 %v7987_v62, %v6543_v12  ;;  %v8199_v62 = vld [vmem:[#allocation19 + $0x4e8] sm:$0xf0]  ;;  %v7597_v12 = vld [vmem:[#allocation19 + $0x690] sm:$0xf] }
 0x26b   :  { %3281 = vmatpush.bf16.msrb.mxu1 %v6750_v23  ;;  %v6525_v23 = vld [vmem:[#allocation17 + $0x28] sm:$0xf] }
 0x26d   :  { %3268 = vmatpush.bf16.msrb.mxu0 %v6606_v24  ;;  %v8015_v24 = vld [vmem:[#allocation17 + $0x12c] sm:$0xf] }
 0x2b9   :  { %v2659_v7 = vpop.f32.mrf.mxu0 }
 0x2ba   :  { %v2660_v47 = vadd.f32 %v8286_v31, %v2659_v7 }
 0x2c1   :  { %v2661_v22 = vpop.f32.mrf.mxu0 }
 0x2c2   :  { %v2662_v50 = vadd.f32 %v8286_v31, %v2661_v22  ;;  %v6589_v31 = vld [vmem:[#allocation17 + $0xa8] sm:$0xf]  ;;  %v8033_v22 = vld [vmem:[#allocation17 + $0x1b4] sm:$0xf0] }
 0x2c3   :  { %v6590_v34 = vor.u32 %v8001_v32, %v6589_v31  ;;  %v6718_v38 = vor.u32 %v8033_v22, %v6717_v33  ;;  %v7979_v31 = vld [vmem:[#allocation17 + $0xc] sm:$0xf]  ;;  %v6511_v32 = vld [vmem:[#allocation17 + $0x18] sm:$0xf0] }
 0x2c4   :  { %v8011_v33 = vld [vmem:[#allocation17 + $0x10c] sm:$0xf]  ;;  %v6514_v36 = vor.u32 %v7979_v31, %v6511_v32  ;;  %v7317_v31 = vld [vmem:[#allocation19 + $0x460] sm:$0xf] }
 0x2c5   :  { %3269 = vmatpush.bf16.msrb.mxu0 %v6590_v34  ;;  %v6639_v34 = vld [vmem:[#allocation17 + $0x118] sm:$0xf0] }
 0x2c9   :  { %v2673_v41 = vpop.f32.mrf.mxu1  ;;  %3270 = vmatpush.bf16.msrb.mxu0 %v6574_v48 }
 0x2ca   :  { %v2674_v51 = vadd.f32 %v2673_v41, %v2660_v47  ;;  %v6734_v41 = vor.u32 %v8037_v2, %v6733_v21  ;;  %v6701_v47 = vld [vmem:[#allocation17 + $0x188] sm:$0xf]  ;;  %v6527_v21 = vld [vmem:[#allocation17 + $0x38] sm:$0xf0] }
 0x2cb   :  { %v6655_v2 = vld [vmem:[#allocation17 + $0x138] sm:$0xf0]  ;;  %v6530_v26 = vor.u32 %v7983_v20, %v6527_v21  ;;  %v7345_v20 = vld [vmem:[#allocation19 + $0x498] sm:$0xf]  ;;  %v8192_v21 = vld [vmem:[#allocation19 + $0x4b0] sm:$0xf0] }
 0x2cc   :  { %v2678_v3 = vmax.f32 %v2674_v51, 0.0  ;;  %3282 = vmatpush.bf16.msrb.mxu1 %v6734_v41  ;;  %v6702_v51 = vor.u32 %v8029_v49, %v6701_v47  ;;  %v6509_v41 = vld [vmem:[#allocation17 + $0x8] sm:$0xf]  ;;  %v6658_v28 = vor.u32 %v8015_v24, %v6655_v2  ;;  %v7569_v24 = vld [vmem:[#allocation19 + $0x658] sm:$0xf] }
 0x2cd   :  { %v8248_v2 = vld [vmem:[#allocation19 + $0x670] sm:$0xf0] }
 0x2ce   :  { %v7570_v32 = vor.u32 %v8248_v2, %v7569_v24 }
 0x2d0   :  { %3283 = vmatpush.bf16.msrb.mxu1 %v6718_v38  ;;  %v6642_v38 = vor.u32 %v8011_v33, %v6639_v34  ;;  %v8185_v33 = vld [vmem:[#allocation19 + $0x478] sm:$0xf0]  ;;  %v7541_v34 = vld [vmem:[#allocation19 + $0x620] sm:$0xf] }
 0x2d1   :  { %v2675_v57 = vpop.f32.mrf.mxu1 }
 0x2d2   :  { %v2676_v56 = vadd.f32 %v2675_v57, %v2662_v50  ;;  %v7995_v50 = vld [vmem:[#allocation17 + $0x8c] sm:$0xf]  ;;  %v6557_v57 = vld [vmem:[#allocation17 + $0x68] sm:$0xf] }
 0x2d3   :  { %v6578_v52 = vor.u32 %v7995_v50, %v6575_v11  ;;  %v6953_v50 = vld [vmem:[#allocation19 + $0x188] sm:$0xf] }
 0x2d4   :  { %v2679_v4 = vmax.f32 %v2676_v56, 0.0  ;;  %3284 = vmatpush.bf16.msrb.mxu1 %v6702_v51  ;;  %v6558_v56 = vor.u32 %v7993_v54, %v6557_v57  ;;  %v7401_v54 = vld [vmem:[#allocation19 + $0x508] sm:$0xf] }
 0x2d6   :  { %v2680_v7 = vpack.c.bf16 %v2679_v4, %v2678_v3  ;;  %v6687_v3 = vld [vmem:[#allocation17 + $0x178] sm:$0xf0]  ;;  %v6541_v4 = vld [vmem:[#allocation17 + $0x48] sm:$0xf]  ;;  %3271 = vmatpush.bf16.msrb.mxu0 %v6558_v56 }
 0x2d7   :  { %v6690_v5 = vor.u32 %v8023_v1, %v6687_v3  ;;  %v6542_v9 = vor.u32 %v7989_v6, %v6541_v4  ;;  %v6925_v3 = vld [vmem:[#allocation19 + $0x150] sm:$0xf]  ;;  %v8087_v4 = vld [vmem:[#allocation19 + $0x168] sm:$0xf0] }
 0x2d8   :  { %2791 = vmatmul.bf16.vlgmr.msrb.gmra.mxu2 %v2680_v7  ;;  %2805 = vmatmul.bf16.vlgmr.msrb.gmra.mxu3 %v2680_v7  ;;  %v6669_v7 = vld [vmem:[#allocation17 + $0x148] sm:$0xf]  ;;  %v7149_v6 = vld [vmem:[#allocation19 + $0x310] sm:$0xf] }
 0x2d9   :  { %3295 = vmatpush.bf16.msrb.mxu2 %v6626_v16  ;;  %3309 = vmatpush.bf16.msrb.mxu3 %v6754_v37  ;;  %v6670_v10 = vor.u32 %v8021_v8, %v6669_v7  ;;  %v7985_v16 = vld [vmem:[#allocation17 + $0x34] sm:$0xf0]  ;;  %v8143_v7 = vld [vmem:[#allocation19 + $0x328] sm:$0xf0]  ;;  %v7402_v8 = vor.u32 %v8206_v55, %v7401_v54  ;;  %v7261_v54 = vld [vmem:[#allocation19 + $0x3f0] sm:$0xf] }
 0x2da   :  { %3285 = vmatpush.bf16.msrb.mxu1 %v6686_v61  ;;  %v8017_v37 = vld [vmem:[#allocation17 + $0x134] sm:$0xf0]  ;;  %3272 = vmatpush.bf16.msrb.mxu0 %v6542_v9  ;;  %v6526_v42 = vor.u32 %v7985_v16, %v6525_v23  ;;  %v7373_v9 = vld [vmem:[#allocation19 + $0x4d0] sm:$0xf]  ;;  %v8080_v23 = vld [vmem:[#allocation19 + $0x130] sm:$0xf0]  ;;  %v7150_v16 = vor.u32 %v8143_v7, %v7149_v6 }
 0x2db   :  { %v6654_v25 = vor.u32 %v8017_v37, %v6653_v19  ;;  %v8136_v19 = vld [vmem:[#allocation19 + $0x2f0] sm:$0xf0]  ;;  %v7374_v37 = vor.u32 %v8199_v62, %v7373_v9  ;;  %v8171_v55 = vld [vmem:[#allocation19 + $0x408] sm:$0xf0]  ;;  %v8101_v62 = vld [vmem:[#allocation19 + $0x1d8] sm:$0xf0] }
 0x2dc   :  { %v8164_v6 = vld [vmem:[#allocation19 + $0x3d0] sm:$0xf0] }
 0x2dd   :  { %3296 = vmatpush.bf16.msrb.mxu2 %v6610_v27  ;;  %3310 = vmatpush.bf16.msrb.mxu3 %v6738_v29  ;;  %v7981_v27 = vld [vmem:[#allocation17 + $0x14] sm:$0xf0] }
 0x2de   :  { %3286 = vmatpush.bf16.msrb.mxu1 %v6670_v10  ;;  %v8013_v29 = vld [vmem:[#allocation17 + $0x114] sm:$0xf0]  ;;  %3273 = vmatpush.bf16.msrb.mxu0 %v6526_v42  ;;  %v6510_v22 = vor.u32 %v7981_v27, %v6509_v41  ;;  %v7626_v10 = vor.u32 %v8262_v60, %v7625_v59  ;;  %v7598_v42 = vor.u32 %v8255_v13, %v7597_v12  ;;  %v8073_v41 = vld [vmem:[#allocation19 + $0xf8] sm:$0xf0]  ;;  %v8052_v60 = vld [vmem:[#allocation19 + $0x50] sm:$0xf0] }
 0x2df   :  { %v6638_v35 = vor.u32 %v8013_v29, %v6637_v30  ;;  %v7093_v30 = vld [vmem:[#allocation19 + $0x2a0] sm:$0xf]  ;;  %v7346_v29 = vor.u32 %v8192_v21, %v7345_v20  ;;  %v6955_v13 = vld [vmem:[#allocation19 + $0x1a4] sm:$0xf0]  ;;  %v6927_v20 = vld [vmem:[#allocation19 + $0x16c] sm:$0xf0] }
 0x2e0   :  { %v7151_v21 = vld [vmem:[#allocation19 + $0x32c] sm:$0xf0] }
 0x2e1   :  { %3297 = vmatpush.bf16.msrb.mxu2 %v6594_v39  ;;  %3311 = vmatpush.bf16.msrb.mxu3 %v6722_v44  ;;  %v2697_v39 = vld [vmem:[#allocation16] sm:$0x3] }
 0x2e2   :  { %3287 = vmatpush.bf16.msrb.mxu1 %v6654_v25  ;;  %3274 = vmatpush.bf16.msrb.mxu0 %v6510_v22  ;;  %v2699_v44 = vperm.slane %v2697_v39, 0  ;;  %v2700_v45 = vperm.slane %v2697_v39, 1  ;;  %v6898_v25 = vor.u32 %v8080_v23, %v6897_v15  ;;  %v8241_v22 = vld [vmem:[#allocation19 + $0x638] sm:$0xf0]  ;;  %v7179_v15 = vld [vmem:[#allocation19 + $0x364] sm:$0xf0] }
 0x2e5   :  { %3298 = vmatpush.bf16.msrb.mxu2 %v6578_v52  ;;  %3312 = vmatpush.bf16.msrb.mxu3 %v6706_v17  ;;  %v8094_v52 = vld [vmem:[#allocation19 + $0x1a0] sm:$0xf0] }
 0x2e6   :  { %3288 = vmatpush.bf16.msrb.mxu1 %v6638_v35  ;;  %v6954_v1 = vor.u32 %v8094_v52, %v6953_v50  ;;  %v8059_v52 = vld [vmem:[#allocation19 + $0x88] sm:$0xf0] }
 0x2e9   :  { %3299 = vmatpush.bf16.msrb.mxu2 %v6562_v63  ;;  %3313 = vmatpush.bf16.msrb.mxu3 %v6690_v5  ;;  %v7178_v5 = vor.u32 %v8150_v53, %v7177_v0  ;;  %v7037_v0 = vld [vmem:[#allocation19 + $0x230] sm:$0xf]  ;;  %v8115_v53 = vld [vmem:[#allocation19 + $0x248] sm:$0xf0] }
 0x2ea   :  { %v7038_v59 = vor.u32 %v8115_v53, %v7037_v0  ;;  %v6815_v0 = vld [vmem:[#allocation19 + $0x8c] sm:$0xf0]  ;;  %v8196_v53 = vld [vmem:[#allocation19 + $0x4d4] sm:$0xf] }
 0x2ed   :  { %3300 = vmatpush.bf16.msrb.mxu2 %v6546_v14  ;;  %3314 = vmatpush.bf16.msrb.mxu3 %v6674_v18  ;;  %v6926_v14 = vor.u32 %v8087_v4, %v6925_v3  ;;  %v7121_v18 = vld [vmem:[#allocation19 + $0x2d8] sm:$0xf]  ;;  %v8108_v3 = vld [vmem:[#allocation19 + $0x210] sm:$0xf0]  ;;  %v7262_v4 = vor.u32 %v8171_v55, %v7261_v54  ;;  %v7429_v54 = vld [vmem:[#allocation19 + $0x540] sm:$0xf] }
 0x2ee   :  { %v7122_v27 = vor.u32 %v8136_v19, %v7121_v18  ;;  %v8084_v19 = vld [vmem:[#allocation19 + $0x154] sm:$0xf]  ;;  %v8213_v55 = vld [vmem:[#allocation19 + $0x558] sm:$0xf0] }
 0x2ef   :  { %v6930_v24 = vor.u32 %v8084_v19, %v6927_v20 }
 0x2f1   :  { %3301 = vmatpush.bf16.msrb.mxu2 %v6530_v26  ;;  %3315 = vmatpush.bf16.msrb.mxu3 %v6658_v28  ;;  %v6869_v26 = vld [vmem:[#allocation19 + $0xe0] sm:$0xf]  ;;  %v8129_v28 = vld [vmem:[#allocation19 + $0x2b8] sm:$0xf0] }
 0x2f2   :  { %v6870_v35 = vor.u32 %v8073_v41, %v6869_v26  ;;  %v7094_v39 = vor.u32 %v8129_v28, %v7093_v30  ;;  %v6899_v26 = vld [vmem:[#allocation19 + $0x134] sm:$0xf0]  ;;  %v6871_v30 = vld [vmem:[#allocation19 + $0xfc] sm:$0xf0] }
 0x2f5   :  { %3302 = vmatpush.bf16.msrb.mxu2 %v6514_v36  ;;  %3316 = vmatpush.bf16.msrb.mxu3 %v6642_v38  ;;  %v6841_v36 = vld [vmem:[#allocation19 + $0xa8] sm:$0xf]  ;;  %v8066_v38 = vld [vmem:[#allocation19 + $0xc0] sm:$0xf0] }
 0x2f6   :  { %v6842_v50 = vor.u32 %v8066_v38, %v6841_v36  ;;  %v8157_v36 = vld [vmem:[#allocation19 + $0x398] sm:$0xf0] }
 0x35b   :  { %v2792_v40 = vpop.f32.mrf.mxu2  ;;  %v2806_v43 = vpop.f32.mrf.mxu3 }
 0x35c   :  { %v2793_v46 = vadd.f32 %v2792_v40, %v2699_v44  ;;  %v2807_v47 = vadd.f32 %v2806_v43, %v2700_v45  ;;  %v7065_v40 = vld [vmem:[#allocation19 + $0x268] sm:$0xf]  ;;  %v8122_v43 = vld [vmem:[#allocation19 + $0x280] sm:$0xf0] }
 0x35e   :  { %v2811_v17 = vmax.f32 %v2793_v46, 0.0  ;;  %v2812_v57 = vmax.f32 %v2807_v47, 0.0  ;;  %v7542_v46 = vor.u32 %v8241_v22, %v7541_v34  ;;  %v8178_v47 = vld [vmem:[#allocation19 + $0x440] sm:$0xf0]  ;;  %v7123_v34 = vld [vmem:[#allocation19 + $0x2f4] sm:$0xf0] }
 0x363   :  { %v2794_v48 = vpop.f32.mrf.mxu2  ;;  %v2808_v49 = vpop.f32.mrf.mxu3 }
 0x364   :  { %v2795_v11 = vadd.f32 %v2794_v48, %v2699_v44  ;;  %v2809_v51 = vadd.f32 %v2808_v49, %v2700_v45  ;;  %v7318_v44 = vor.u32 %v8185_v33, %v7317_v31  ;;  %v7289_v45 = vld [vmem:[#allocation19 + $0x428] sm:$0xf]  ;;  %v8234_v49 = vld [vmem:[#allocation19 + $0x600] sm:$0xf0]  ;;  %v8227_v31 = vld [vmem:[#allocation19 + $0x5c8] sm:$0xf0] }
 0x365   :  { %v7513_v48 = vld [vmem:[#allocation19 + $0x5e8] sm:$0xf]  ;;  %v8133_v33 = vld [vmem:[#allocation19 + $0x2dc] sm:$0xf] }
 0x366   :  { %v2813_v56 = vmax.f32 %v2795_v11, 0.0  ;;  %v2814_v58 = vmax.f32 %v2809_v51, 0.0  ;;  %v6813_v11 = vld [vmem:[#allocation19 + $0x70] sm:$0xf]  ;;  %v7066_v51 = vor.u32 %v8122_v43, %v7065_v40  ;;  %v7126_v22 = vor.u32 %v8133_v33, %v7123_v34  ;;  %v6843_v40 = vld [vmem:[#allocation19 + $0xc4] sm:$0xf0] }
 0x367   :  { %v8203_v43 = vld [vmem:[#allocation19 + $0x50c] sm:$0xf]  ;;  %v7543_v33 = vld [vmem:[#allocation19 + $0x63c] sm:$0xf0] }
 0x368   :  { %v8788_v61 = vpack.c.bf16 %v2813_v56, %v2811_v17  ;;  %v8790_v63 = vpack.c.bf16 %v2814_v58, %v2812_v57  ;;  %v7290_v17 = vor.u32 %v8178_v47, %v7289_v45  ;;  %v7514_v57 = vor.u32 %v8234_v49, %v7513_v48  ;;  %v6785_v58 = vld [vmem:[#allocation19 + $0x38] sm:$0xf]  ;;  %v7403_v45 = vld [vmem:[#allocation19 + $0x524] sm:$0xf0]  ;;  %v8220_v47 = vld [vmem:[#allocation19 + $0x590] sm:$0xf0] }
 0x369   :  { %v6814_v56 = vor.u32 %v8059_v52, %v6813_v11  ;;  %v6786_v7 = vor.u32 %v8052_v60, %v6785_v58  ;;  %v7406_v48 = vor.u32 %v8203_v43, %v7403_v45  ;;  %v7095_v11 = vld [vmem:[#allocation19 + $0x2bc] sm:$0xf0]  ;;  %v8056_v52 = vld [vmem:[#allocation19 + $0x74] sm:$0xf]  ;;  %v7430_v58 = vor.u32 %v8213_v55, %v7429_v54  ;;  %v7067_v60 = vld [vmem:[#allocation19 + $0x284] sm:$0xf0] }
 0x36a   :  { %3219 = vmatmul.bf16.vlgmr.msra.gmra.mxu0 %v8788_v61  ;;  %3233 = vmatmul.bf16.vlgmr.msra.gmra.mxu1 %v8790_v63  ;;  %v8161_v43 = vld [vmem:[#allocation19 + $0x3bc] sm:$0xf] }
 0x36b   :  { %3247 = vmatmul.bf16.vlgmr.msra.gmra.mxu2 %v8788_v61  ;;  %3261 = vmatmul.bf16.vlgmr.msra.gmra.mxu3 %v8790_v63 }
 0x36c   :  { %4759 = vmatpush.bf16.msra.mxu0 %v6954_v1  ;;  %4773 = vmatpush.bf16.msra.mxu1 %v7178_v5  ;;  %v7009_v1 = vld [vmem:[#allocation19 + $0x1f8] sm:$0xf] }
 0x36d   :  { %4787 = vmatpush.bf16.msra.mxu2 %v7402_v8  ;;  %4801 = vmatpush.bf16.msra.mxu3 %v7626_v10  ;;  %v7233_v5 = vld [vmem:[#allocation19 + $0x3b8] sm:$0xf]  ;;  %v6757_v8 = vld [vmem:[#allocation19] sm:$0xf]  ;;  %v7010_v9 = vor.u32 %v8108_v3, %v7009_v1  ;;  %v8259_v1 = vld [vmem:[#allocation19 + $0x6cc] sm:$0xf] }
 0x36e   :  { %v6981_v10 = vld [vmem:[#allocation19 + $0x1c0] sm:$0xf]  ;;  %v7234_v12 = vor.u32 %v8164_v6, %v7233_v5  ;;  %v8049_v6 = vld [vmem:[#allocation19 + $0x3c] sm:$0xf] }
 0x370   :  { %4760 = vmatpush.bf16.msra.mxu0 %v6926_v14  ;;  %4774 = vmatpush.bf16.msra.mxu1 %v7150_v16  ;;  %v8147_v14 = vld [vmem:[#allocation19 + $0x34c] sm:$0xf]  ;;  %v6982_v16 = vor.u32 %v8101_v62, %v6981_v10  ;;  %v8112_v10 = vld [vmem:[#allocation19 + $0x234] sm:$0xf]  ;;  %v7039_v62 = vld [vmem:[#allocation19 + $0x24c] sm:$0xf0] }
 0x371   :  { %4788 = vmatpush.bf16.msra.mxu2 %v7374_v37  ;;  %4802 = vmatpush.bf16.msra.mxu3 %v7598_v42  ;;  %v7182_v37 = vor.u32 %v8147_v14, %v7179_v15  ;;  %v8140_v42 = vld [vmem:[#allocation19 + $0x314] sm:$0xf]  ;;  %v7599_v14 = vld [vmem:[#allocation19 + $0x6ac] sm:$0xf0] }
 0x372   :  { %v7154_v2 = vor.u32 %v8140_v42, %v7151_v21  ;;  %v8105_v42 = vld [vmem:[#allocation19 + $0x1fc] sm:$0xf]  ;;  %v7011_v21 = vld [vmem:[#allocation19 + $0x214] sm:$0xf0] }
 0x374   :  { %4761 = vmatpush.bf16.msra.mxu0 %v6898_v25  ;;  %4775 = vmatpush.bf16.msra.mxu1 %v7122_v27  ;;  %v8077_v25 = vld [vmem:[#allocation19 + $0x11c] sm:$0xf]  ;;  %v8070_v27 = vld [vmem:[#allocation19 + $0xe4] sm:$0xf] }
 0x375   :  { %4789 = vmatpush.bf16.msra.mxu2 %v7346_v29  ;;  %4803 = vmatpush.bf16.msra.mxu3 %v7570_v32  ;;  %v6902_v41 = vor.u32 %v8077_v25, %v6899_v26  ;;  %v6874_v28 = vor.u32 %v8070_v27, %v6871_v30  ;;  %v7485_v29 = vld [vmem:[#allocation19 + $0x5b0] sm:$0xf]  ;;  %v7571_v25 = vld [vmem:[#allocation19 + $0x674] sm:$0xf0]  ;;  %v7291_v27 = vld [vmem:[#allocation19 + $0x444] sm:$0xf0] }
 0x376   :  { %v7486_v32 = vor.u32 %v8227_v31, %v7485_v29  ;;  %v6983_v29 = vld [vmem:[#allocation19 + $0x1dc] sm:$0xf0]  ;;  %v8238_v31 = vld [vmem:[#allocation19 + $0x624] sm:$0xf] }
 0x377   :  { %v7546_v34 = vor.u32 %v8238_v31, %v7543_v33  ;;  %v7157_v33 = vld [vmem:[#allocation19 + $0x318] sm:$0xf] }
 0x378   :  { %4762 = vmatpush.bf16.msra.mxu0 %v6870_v35  ;;  %4776 = vmatpush.bf16.msra.mxu1 %v7094_v39  ;;  %v7205_v35 = vld [vmem:[#allocation19 + $0x380] sm:$0xf]  ;;  %v8063_v39 = vld [vmem:[#allocation19 + $0xac] sm:$0xf] }
 0x379   :  { %4790 = vmatpush.bf16.msra.mxu2 %v7318_v44  ;;  %4804 = vmatpush.bf16.msra.mxu3 %v7542_v46  ;;  %v7206_v38 = vor.u32 %v8157_v36, %v7205_v35  ;;  %v6846_v44 = vor.u32 %v8063_v39, %v6843_v40  ;;  %v7457_v46 = vld [vmem:[#allocation19 + $0x578] sm:$0xf]  ;;  %v7263_v35 = vld [vmem:[#allocation19 + $0x40c] sm:$0xf0]  ;;  %v7515_v39 = vld [vmem:[#allocation19 + $0x604] sm:$0xf0] }
 0x37a   :  { %3275 = vmatmul.bf16.vlgmr.msrb.gmra.mxu0 %v8788_v61  ;;  %3289 = vmatmul.bf16.vlgmr.msrb.gmra.mxu1 %v8790_v63  ;;  %v7458_v49 = vor.u32 %v8220_v47, %v7457_v46  ;;  %v8224_v46 = vld [vmem:[#allocation19 + $0x5b4] sm:$0xf]  ;;  %v7487_v47 = vld [vmem:[#allocation19 + $0x5cc] sm:$0xf0] }
 0x37b   :  { %3303 = vmatmul.bf16.vlgmr.msrb.gmra.mxu2 %v8788_v61  ;;  %3317 = vmatmul.bf16.vlgmr.msrb.gmra.mxu3 %v8790_v63  ;;  %v8045_v61 = vld [vmem:[#allocation19 + $0x18] sm:$0xf0]  ;;  %v8091_v63 = vld [vmem:[#allocation19 + $0x18c] sm:$0xf] }
 0x37c   :  { %4763 = vmatpush.bf16.msra.mxu0 %v6842_v50  ;;  %4777 = vmatpush.bf16.msra.mxu1 %v7066_v51  ;;  %v6758_v23 = vor.u32 %v8045_v61, %v6757_v8  ;;  %v6958_v18 = vor.u32 %v8091_v63, %v6955_v13  ;;  %v8126_v50 = vld [vmem:[#allocation19 + $0x2a4] sm:$0xf]  ;;  %v8189_v8 = vld [vmem:[#allocation19 + $0x49c] sm:$0xf]  ;;  %v7042_v13 = vor.u32 %v8112_v10, %v7039_v62 }
 0x37d   :  { %4791 = vmatpush.bf16.msra.mxu2 %v7290_v17  ;;  %4805 = vmatpush.bf16.msra.mxu3 %v7514_v57  ;;  %v7098_v51 = vor.u32 %v8126_v50, %v7095_v11  ;;  %v6818_v17 = vor.u32 %v8056_v52, %v6815_v0  ;;  %v7375_v57 = vld [vmem:[#allocation19 + $0x4ec] sm:$0xf0]  ;;  %v8154_v50 = vld [vmem:[#allocation19 + $0x384] sm:$0xf]  ;;  %v7207_v11 = vld [vmem:[#allocation19 + $0x39c] sm:$0xf0] }
 0x37e   :  { %v7210_v0 = vor.u32 %v8154_v50, %v7207_v11  ;;  %v8137_v50 = vld [vmem:[#allocation19 + $0x2f8] sm:$0xf0] }
 0x380   :  { %4764 = vmatpush.bf16.msra.mxu0 %v6814_v56  ;;  %4778 = vmatpush.bf16.msra.mxu1 %v7038_v59  ;;  %v7378_v56 = vor.u32 %v8196_v53, %v7375_v57  ;;  %v8119_v59 = vld [vmem:[#allocation19 + $0x26c] sm:$0xf]  ;;  %v7459_v57 = vld [vmem:[#allocation19 + $0x594] sm:$0xf0] }
 0x381   :  { %4792 = vmatpush.bf16.msra.mxu2 %v7262_v4  ;;  %4806 = vmatpush.bf16.msra.mxu3 %v7486_v32  ;;  %v7070_v3 = vor.u32 %v8119_v59, %v7067_v60  ;;  %v7627_v4 = vld [vmem:[#allocation19 + $0x6e4] sm:$0xf0] }
 0x382   :  { %v7630_v5 = vor.u32 %v8259_v1, %v7627_v4 }
 0x384   :  { %4765 = vmatpush.bf16.msra.mxu0 %v6786_v7  ;;  %4779 = vmatpush.bf16.msra.mxu1 %v7010_v9  ;;  %v6787_v7 = vld [vmem:[#allocation19 + $0x54] sm:$0xf0] }
 0x385   :  { %4793 = vmatpush.bf16.msra.mxu2 %v7234_v12  ;;  %4807 = vmatpush.bf16.msra.mxu3 %v7458_v49  ;;  %v6790_v61 = vor.u32 %v8049_v6, %v6787_v7  ;;  %v7347_v9 = vld [vmem:[#allocation19 + $0x4b4] sm:$0xf0]  ;;  %v8252_v12 = vld [vmem:[#allocation19 + $0x694] sm:$0xf]  ;;  %v7490_v49 = vor.u32 %v8224_v46, %v7487_v47 }
 0x386   :  { %v7350_v63 = vor.u32 %v8189_v8, %v7347_v9  ;;  %v7602_v15 = vor.u32 %v8252_v12, %v7599_v14  ;;  %v8095_v9 = vld [vmem:[#allocation19 + $0x1a8] sm:$0xf0] }
 0x388   :  { %4766 = vmatpush.bf16.msra.mxu0 %v6758_v23  ;;  %4780 = vmatpush.bf16.msra.mxu1 %v6982_v16  ;;  %v8042_v23 = vld [vmem:[#allocation19 + $0x4] sm:$0xf]  ;;  %v6759_v16 = vld [vmem:[#allocation19 + $0x1c] sm:$0xf0] }
 0x389   :  { %4794 = vmatpush.bf16.msra.mxu2 %v7206_v38  ;;  %4808 = vmatpush.bf16.msra.mxu3 %v7430_v58  ;;  %v6762_v19 = vor.u32 %v8042_v23, %v6759_v16  ;;  %v8231_v38 = vld [vmem:[#allocation19 + $0x5ec] sm:$0xf]  ;;  %v7431_v58 = vld [vmem:[#allocation19 + $0x55c] sm:$0xf0]  ;;  %v6933_v23 = vld [vmem:[#allocation19 + $0x158] sm:$0xf] }
 0x38a   :  { %v7518_v40 = vor.u32 %v8231_v38, %v7515_v39  ;;  %v8088_v16 = vld [vmem:[#allocation19 + $0x170] sm:$0xf0]  ;;  %v8074_v38 = vld [vmem:[#allocation19 + $0x100] sm:$0xf0] }
 0x38c   :  { %4815 = vmatpush.bf16.msrb.mxu0 %v6958_v18  ;;  %4829 = vmatpush.bf16.msrb.mxu1 %v7182_v37  ;;  %v8182_v18 = vld [vmem:[#allocation19 + $0x464] sm:$0xf]  ;;  %v7319_v37 = vld [vmem:[#allocation19 + $0x47c] sm:$0xf0] }
 0x38d   :  { %4843 = vmatpush.bf16.msrb.mxu2 %v7406_v48  ;;  %4857 = vmatpush.bf16.msrb.mxu3 %v7630_v5  ;;  %v7322_v20 = vor.u32 %v8182_v18, %v7319_v37  ;;  %v8803_v48 = vld [vmem:[%s8879_s10] sm:$0xf] }
 0x38e   :  { %v2883_v53 = vperm.slane %v8803_v48, 0  ;;  %v2886_v39 = vperm.slane %v8803_v48, 3 }
 0x390   :  { %4816 = vmatpush.bf16.msrb.mxu0 %v6930_v24  ;;  %4830 = vmatpush.bf16.msrb.mxu1 %v7154_v2  ;;  %v7014_v24 = vor.u32 %v8105_v42, %v7011_v21  ;;  %v8245_v2 = vld [vmem:[#allocation19 + $0x65c] sm:$0xf]  ;;  %v2885_v42 = vperm.slane %v8803_v48, 2 }
 0x391   :  { %4844 = vmatpush.bf16.msrb.mxu2 %v7378_v56  ;;  %4858 = vmatpush.bf16.msrb.mxu3 %v7602_v15  ;;  %v7574_v26 = vor.u32 %v8245_v2, %v7571_v25  ;;  %v8210_v56 = vld [vmem:[#allocation19 + $0x544] sm:$0xf]  ;;  %v7185_v2 = vld [vmem:[#allocation19 + $0x350] sm:$0xf]  ;;  %v8151_v25 = vld [vmem:[#allocation19 + $0x368] sm:$0xf0] }
 0x392   :  { %v7434_v1 = vor.u32 %v8210_v56, %v7431_v58  ;;  %v7101_v56 = vld [vmem:[#allocation19 + $0x2a8] sm:$0xf]  ;;  %v8130_v58 = vld [vmem:[#allocation19 + $0x2c0] sm:$0xf0] }
 0x394   :  { %4817 = vmatpush.bf16.msrb.mxu0 %v6902_v41  ;;  %4831 = vmatpush.bf16.msrb.mxu1 %v7126_v22  ;;  %v8175_v41 = vld [vmem:[#allocation19 + $0x42c] sm:$0xf]  ;;  %v8168_v22 = vld [vmem:[#allocation19 + $0x3f4] sm:$0xf] }
 0x395   :  { %4845 = vmatpush.bf16.msrb.mxu2 %v7350_v63  ;;  %v7294_v30 = vor.u32 %v8175_v41, %v7291_v27  ;;  %4859 = vmatpush.bf16.msrb.mxu3 %v7574_v26  ;;  %v7266_v36 = vor.u32 %v8168_v22, %v7263_v35  ;;  %v6905_v26 = vld [vmem:[#allocation19 + $0x120] sm:$0xf]  ;;  %v8081_v41 = vld [vmem:[#allocation19 + $0x138] sm:$0xf0] }
 0x398   :  { %4818 = vmatpush.bf16.msrb.mxu0 %v6874_v28  ;;  %4832 = vmatpush.bf16.msrb.mxu1 %v7098_v51  ;;  %v8098_v28 = vld [vmem:[#allocation19 + $0x1c4] sm:$0xf] }
 0x399   :  { %4846 = vmatpush.bf16.msrb.mxu2 %v7322_v20  ;;  %v6986_v32 = vor.u32 %v8098_v28, %v6983_v29  ;;  %4860 = vmatpush.bf16.msrb.mxu3 %v7546_v34  ;;  %v7186_v29 = vor.u32 %v8151_v25, %v7185_v2  ;;  %v8144_v34 = vld [vmem:[#allocation19 + $0x330] sm:$0xf0]  ;;  %v7045_v2 = vld [vmem:[#allocation19 + $0x238] sm:$0xf] }
 0x39c   :  { %4819 = vmatpush.bf16.msrb.mxu0 %v6846_v44  ;;  %4833 = vmatpush.bf16.msrb.mxu1 %v7070_v3  ;;  %v7235_v44 = vld [vmem:[#allocation19 + $0x3d4] sm:$0xf0]  ;;  %v2884_v3 = vperm.slane %v8803_v48, 1 }
 0x39d   :  { %4847 = vmatpush.bf16.msrb.mxu2 %v7294_v30  ;;  %4861 = vmatpush.bf16.msrb.mxu3 %v7518_v40  ;;  %v7238_v45 = vor.u32 %v8161_v43, %v7235_v44 }
 0x3a0   :  { %4820 = vmatpush.bf16.msrb.mxu0 %v6818_v17  ;;  %4834 = vmatpush.bf16.msrb.mxu1 %v7042_v13  ;;  %v8217_v17 = vld [vmem:[#allocation19 + $0x57c] sm:$0xf] }
 0x3a1   :  { %4848 = vmatpush.bf16.msrb.mxu2 %v7266_v36  ;;  %4862 = vmatpush.bf16.msrb.mxu3 %v7490_v49  ;;  %v7462_v54 = vor.u32 %v8217_v17, %v7459_v57  ;;  %v6877_v36 = vld [vmem:[#allocation19 + $0xe8] sm:$0xf]  ;;  %v7129_v49 = vld [vmem:[#allocation19 + $0x2e0] sm:$0xf]  ;;  %v8067_v17 = vld [vmem:[#allocation19 + $0xc8] sm:$0xf0] }
 0x3a2   :  { %v6878_v47 = vor.u32 %v8074_v38, %v6877_v36  ;;  %v8092_v36 = vld [vmem:[#allocation19 + $0x194] sm:$0xf]  ;;  %v6963_v38 = vld [vmem:[#allocation19 + $0x1ac] sm:$0xf0] }
 0x3a4   :  { %4821 = vmatpush.bf16.msrb.mxu0 %v6790_v61  ;;  %4835 = vmatpush.bf16.msrb.mxu1 %v7014_v24  ;;  %v6961_v61 = vld [vmem:[#allocation19 + $0x190] sm:$0xf]  ;;  %v6934_v24 = vor.u32 %v8088_v16, %v6933_v23  ;;  %v7353_v16 = vld [vmem:[#allocation19 + $0x4a0] sm:$0xf] }
 0x3a5   :  { %4849 = vmatpush.bf16.msrb.mxu2 %v7238_v45  ;;  %4863 = vmatpush.bf16.msrb.mxu3 %v7462_v54  ;;  %v6962_v12 = vor.u32 %v8095_v9, %v6961_v61  ;;  %v7158_v45 = vor.u32 %v8144_v34, %v7157_v33  ;;  %v7130_v54 = vor.u32 %v8137_v50, %v7129_v49  ;;  %v6765_v33 = vld [vmem:[#allocation19 + $0x8] sm:$0xf]  ;;  %v8046_v34 = vld [vmem:[#allocation19 + $0x20] sm:$0xf0]  ;;  %v7297_v49 = vld [vmem:[#allocation19 + $0x430] sm:$0xf] }
 0x3a6   :  { %v7102_v9 = vor.u32 %v8130_v58, %v7101_v56  ;;  %v8179_v50 = vld [vmem:[#allocation19 + $0x448] sm:$0xf0]  ;;  %v7187_v56 = vld [vmem:[#allocation19 + $0x36c] sm:$0xf0] }
 0x3a8   :  { %4822 = vmatpush.bf16.msrb.mxu0 %v6762_v19  ;;  %4836 = vmatpush.bf16.msrb.mxu1 %v6986_v32  ;;  %v6906_v32 = vor.u32 %v8081_v41, %v6905_v26  ;;  %v8116_v41 = vld [vmem:[#allocation19 + $0x250] sm:$0xf0] }
 0x3a9   :  { %4850 = vmatpush.bf16.msrb.mxu2 %v7210_v0  ;;  %4864 = vmatpush.bf16.msrb.mxu3 %v7434_v1 }
 0x3e7   :  { %v3220_v51 = vpop.f32.mrf.mxu0  ;;  %v3234_v52 = vpop.f32.mrf.mxu1 }
 0x3e8   :  { %v3221_v55 = vadd.f32 %v3220_v51, %v2883_v53  ;;  %v7409_v51 = vld [vmem:[#allocation19 + $0x510] sm:$0xf] }
 0x3ea   :  { %v3235_v6 = vadd.f32 %v3234_v52, %v3221_v55  ;;  %v8207_v52 = vld [vmem:[#allocation19 + $0x528] sm:$0xf0] }
 0x3eb   :  { %v7410_v55 = vor.u32 %v8207_v52, %v7409_v51  ;;  %v8085_v52 = vld [vmem:[#allocation19 + $0x15c] sm:$0xf] }
 0x3ec   :  { %v3323_v10 = vmax.f32 %v3235_v6, 0.0 }
 0x3ee   :  { %v3248_v59 = vpop.f32.mrf.mxu2  ;;  %v3262_v60 = vpop.f32.mrf.mxu3 }
 0x3ef   :  { %v3222_v4 = vpop.f32.mrf.mxu0  ;;  %v3236_v5 = vpop.f32.mrf.mxu1  ;;  %v3249_v63 = vadd.f32 %v3248_v59, %v2884_v3 }
 0x3f0   :  { %v3223_v7 = vadd.f32 %v3222_v4, %v2883_v53  ;;  %v6849_v53 = vld [vmem:[#allocation19 + $0xb0] sm:$0xf]  ;;  %v8200_v4 = vld [vmem:[#allocation19 + $0x4f0] sm:$0xf0] }
 0x3f1   :  { %v3263_v18 = vadd.f32 %v3262_v60, %v3249_v63  ;;  %v6850_v1 = vor.u32 %v8067_v17, %v6849_v53  ;;  %v7073_v63 = vld [vmem:[#allocation19 + $0x270] sm:$0xf]  ;;  %v6989_v53 = vld [vmem:[#allocation19 + $0x1c8] sm:$0xf]  ;;  %v8102_v17 = vld [vmem:[#allocation19 + $0x1e0] sm:$0xf0] }
 0x3f2   :  { %v3237_v8 = vadd.f32 %v3236_v5, %v3223_v7  ;;  %v6821_v7 = vld [vmem:[#allocation19 + $0x78] sm:$0xf] }
 0x3f3   :  { %v3324_v27 = vmax.f32 %v3263_v18, 0.0  ;;  %v8193_v18 = vld [vmem:[#allocation19 + $0x4b8] sm:$0xf0] }
 0x3f4   :  { %v3327_v62 = vmax.f32 %v3237_v8, 0.0  ;;  %v8060_v8 = vld [vmem:[#allocation19 + $0x90] sm:$0xf0]  ;;  %v7354_v26 = vor.u32 %v8193_v18, %v7353_v16  ;;  %v6879_v16 = vld [vmem:[#allocation19 + $0x104] sm:$0xf0] }
 0x3f5   :  { %v6822_v23 = vor.u32 %v8060_v8, %v6821_v7  ;;  %v7521_v8 = vld [vmem:[#allocation19 + $0x5f0] sm:$0xf] }
 0x3f6   :  { %v8807_v13 = vpack.c.bf16 %v3327_v62, %v3323_v10  ;;  %v3250_v14 = vpop.f32.mrf.mxu2  ;;  %v3264_v15 = vpop.f32.mrf.mxu3 }
 0x3f7   :  { %v3251_v19 = vadd.f32 %v3250_v14, %v2884_v3  ;;  %v3276_v37 = vpop.f32.mrf.mxu0  ;;  %v3290_v20 = vpop.f32.mrf.mxu1  ;;  %v7381_v3 = vld [vmem:[#allocation19 + $0x4d8] sm:$0xf]  ;;  %v7633_v14 = vld [vmem:[#allocation19 + $0x6d0] sm:$0xf] }
 0x3f8   :  { %4767 = vmatmul.bf16.vlgmr.msra.gmra.mxu0 %v8807_v13  ;;  %v3277_v28 = vadd.f32 %v3276_v37, %v2885_v42  ;;  %v7382_v62 = vor.u32 %v8200_v4, %v7381_v3  ;;  %v6990_v3 = vor.u32 %v8102_v17, %v6989_v53 }
 0x3f9   :  { %v3265_v21 = vadd.f32 %v3264_v15, %v3251_v19  ;;  %4871 = vmatpush.bf16.msra.mxu0 %v6962_v12  ;;  %v8123_v12 = vld [vmem:[#allocation19 + $0x288] sm:$0xf0] }
 0x3fa   :  { %v3291_v43 = vadd.f32 %v3290_v20, %v3277_v28  ;;  %v8263_v15 = vld [vmem:[#allocation19 + $0x6e8] sm:$0xf0]  ;;  %v6793_v20 = vld [vmem:[#allocation19 + $0x40] sm:$0xf] }
 0x3fb   :  { %v3328_v30 = vmax.f32 %v3265_v21, 0.0  ;;  %v7074_v21 = vor.u32 %v8123_v12, %v7073_v63  ;;  %v8141_v63 = vld [vmem:[#allocation19 + $0x31c] sm:$0xf]  ;;  %v7241_v12 = vld [vmem:[#allocation19 + $0x3c0] sm:$0xf] }
 0x3fc   :  { %v3325_v57 = vmax.f32 %v3291_v43, 0.0  ;;  %v8109_v43 = vld [vmem:[#allocation19 + $0x218] sm:$0xf0] }
 0x3fd   :  { %v8811_v31 = vpack.c.bf16 %v3328_v30, %v3324_v27  ;;  %4872 = vmatpush.bf16.msra.mxu0 %v6934_v24  ;;  %v7634_v24 = vor.u32 %v8263_v15, %v7633_v14  ;;  %v7605_v27 = vld [vmem:[#allocation19 + $0x698] sm:$0xf]  ;;  %v8256_v30 = vld [vmem:[#allocation19 + $0x6b0] sm:$0xf0]  ;;  %v8165_v14 = vld [vmem:[#allocation19 + $0x3d8] sm:$0xf0] }
 0x3fe   :  { %v3304_v22 = vpop.f32.mrf.mxu2  ;;  %v3318_v35 = vpop.f32.mrf.mxu3 }
 0x3ff   :  { %4781 = vmatmul.bf16.vlgmr.msra.gmra.mxu1 %v8811_v31  ;;  %v3278_v40 = vpop.f32.mrf.mxu0  ;;  %v3292_v46 = vpop.f32.mrf.mxu1  ;;  %v3305_v0 = vadd.f32 %v3304_v22, %v2886_v39  ;;  %v7046_v22 = vor.u32 %v8116_v41, %v7045_v2  ;;  %v7213_v2 = vld [vmem:[#allocation19 + $0x388] sm:$0xf]  ;;  %v8064_v41 = vld [vmem:[#allocation19 + $0xb4] sm:$0xf] }
 0x400   :  { %4885 = vmatpush.bf16.msra.mxu1 %v7186_v29  ;;  %v3279_v44 = vadd.f32 %v3278_v40, %v2885_v42  ;;  %v8053_v42 = vld [vmem:[#allocation19 + $0x58] sm:$0xf0]  ;;  %v7325_v29 = vld [vmem:[#allocation19 + $0x468] sm:$0xf] }
 0x401   :  { %4873 = vmatpush.bf16.msra.mxu0 %v6906_v32  ;;  %v3319_v5 = vadd.f32 %v3318_v35, %v3305_v0  ;;  %v6794_v28 = vor.u32 %v8053_v42, %v6793_v20  ;;  %v8186_v32 = vld [vmem:[#allocation19 + $0x480] sm:$0xf0]  ;;  %v7606_v35 = vor.u32 %v8256_v30, %v7605_v27  ;;  %v6935_v0 = vld [vmem:[#allocation19 + $0x174] sm:$0xf0]  ;;  %v7242_v20 = vor.u32 %v8165_v14, %v7241_v12  ;;  %v6851_v30 = vld [vmem:[#allocation19 + $0xcc] sm:$0xf0] }
 0x402   :  { %v3293_v11 = vadd.f32 %v3292_v46, %v3279_v44  ;;  %v7326_v40 = vor.u32 %v8186_v32, %v7325_v29  ;;  %v7577_v44 = vld [vmem:[#allocation19 + $0x660] sm:$0xf]  ;;  %v6766_v46 = vor.u32 %v8046_v34, %v6765_v33  ;;  %v6938_v58 = vor.u32 %v8085_v52, %v6935_v0  ;;  %v8134_v42 = vld [vmem:[#allocation19 + $0x2e4] sm:$0xf]  ;;  %v7411_v29 = vld [vmem:[#allocation19 + $0x52c] sm:$0xf0] }
 0x403   :  { %v3326_v19 = vmax.f32 %v3319_v5, 0.0  ;;  %v8078_v5 = vld [vmem:[#allocation19 + $0x124] sm:$0xf]  ;;  %v7465_v33 = vld [vmem:[#allocation19 + $0x580] sm:$0xf] }
 0x404   :  { %v3329_v48 = vmax.f32 %v3293_v11, 0.0  ;;  %4886 = vmatpush.bf16.msra.mxu1 %v7158_v45  ;;  %v8249_v45 = vld [vmem:[#allocation19 + $0x678] sm:$0xf0]  ;;  %v8260_v52 = vld [vmem:[#allocation19 + $0x6d4] sm:$0xf] }
 0x405   :  { %4874 = vmatpush.bf16.msra.mxu0 %v6878_v47  ;;  %v6966_v47 = vor.u32 %v8092_v36, %v6963_v38  ;;  %v7578_v51 = vor.u32 %v8249_v45, %v7577_v44  ;;  %v8221_v34 = vld [vmem:[#allocation19 + $0x598] sm:$0xf0]  ;;  %v7103_v36 = vld [vmem:[#allocation19 + $0x2c4] sm:$0xf0]  ;;  %v6854_v38 = vor.u32 %v8064_v41, %v6851_v30  ;;  %v6823_v44 = vld [vmem:[#allocation19 + $0x94] sm:$0xf0] }
 0x406   :  { %v8815_v59 = vpack.c.bf16 %v3329_v48, %v3325_v57  ;;  %v3306_v60 = vpop.f32.mrf.mxu2  ;;  %v3320_v61 = vpop.f32.mrf.mxu3  ;;  %v7549_v57 = vld [vmem:[#allocation19 + $0x628] sm:$0xf]  ;;  %v8242_v48 = vld [vmem:[#allocation19 + $0x640] sm:$0xf0]  ;;  %v8197_v45 = vld [vmem:[#allocation19 + $0x4dc] sm:$0xf] }
 0x407   :  { %v3307_v6 = vadd.f32 %v3306_v60, %v2886_v39  ;;  %v7017_v39 = vld [vmem:[#allocation19 + $0x200] sm:$0xf]  ;;  %v7269_v60 = vld [vmem:[#allocation19 + $0x3f8] sm:$0xf]  ;;  %v7550_v4 = vor.u32 %v8242_v48, %v7549_v57  ;;  %v7635_v0 = vld [vmem:[#allocation19 + $0x6ec] sm:$0xf0] }
 0x408   :  { %4887 = vmatpush.bf16.msra.mxu1 %v7130_v54  ;;  %4795 = vmatmul.bf16.vlgmr.msra.gmra.mxu2 %v8815_v59  ;;  %v7018_v11 = vor.u32 %v8109_v43, %v7017_v39  ;;  %v7298_v54 = vor.u32 %v8179_v50, %v7297_v49  ;;  %v7466_v43 = vor.u32 %v8221_v34, %v7465_v33  ;;  %v7437_v49 = vld [vmem:[#allocation19 + $0x548] sm:$0xf]  ;;  %v8214_v50 = vld [vmem:[#allocation19 + $0x560] sm:$0xf0]  ;;  %v6969_v12 = vld [vmem:[#allocation19 + $0x198] sm:$0xf] }
 0x409   :  { %v3321_v10 = vadd.f32 %v3320_v61, %v3307_v6  ;;  %4823 = vmatmul.bf16.vlgmr.msrb.gmra.mxu0 %v8807_v13  ;;  %4899 = vmatpush.bf16.msra.mxu2 %v7410_v55  ;;  %v8148_v55 = vld [vmem:[#allocation19 + $0x354] sm:$0xf]  ;;  %v6907_v6 = vld [vmem:[#allocation19 + $0x13c] sm:$0xf0]  ;;  %v8235_v61 = vld [vmem:[#allocation19 + $0x608] sm:$0xf0]  ;;  %v7438_v48 = vor.u32 %v8214_v50, %v7437_v49 }
 0x40a   :  { %4875 = vmatpush.bf16.msra.mxu0 %v6850_v1  ;;  %v8172_v1 = vld [vmem:[#allocation19 + $0x410] sm:$0xf0]  ;;  %v7190_v7 = vor.u32 %v8148_v55, %v7187_v56  ;;  %v7522_v15 = vor.u32 %v8235_v61, %v7521_v8  ;;  %v8050_v57 = vld [vmem:[#allocation19 + $0x44] sm:$0xf]  ;;  %v7355_v56 = vld [vmem:[#allocation19 + $0x4bc] sm:$0xf0] }
 0x40b   :  { %v3330_v37 = vmax.f32 %v3321_v10, 0.0  ;;  %v7159_v10 = vld [vmem:[#allocation19 + $0x334] sm:$0xf0]  ;;  %v8190_v55 = vld [vmem:[#allocation19 + $0x4a4] sm:$0xf] }
 0x40c   :  { %4888 = vmatpush.bf16.msra.mxu1 %v7102_v9  ;;  %v7270_v9 = vor.u32 %v8172_v1, %v7269_v60  ;;  %v7162_v18 = vor.u32 %v8141_v63, %v7159_v10  ;;  %v7638_v60 = vor.u32 %v8260_v52, %v7635_v0  ;;  %v8113_v1 = vld [vmem:[#allocation19 + $0x23c] sm:$0xf]  ;;  %v8043_v8 = vld [vmem:[#allocation19 + $0xc] sm:$0xf]  ;;  %v6767_v61 = vld [vmem:[#allocation19 + $0x24] sm:$0xf0] }
 0x40d   :  { %v8819_v25 = vpack.c.bf16 %v3330_v37, %v3326_v19  ;;  %4900 = vmatpush.bf16.msra.mxu2 %v7382_v62  ;;  %v6910_v62 = vor.u32 %v8078_v5, %v6907_v6  ;;  %v7493_v19 = vld [vmem:[#allocation19 + $0x5b8] sm:$0xf]  ;;  %v8228_v37 = vld [vmem:[#allocation19 + $0x5d0] sm:$0xf0]  ;;  %v7327_v63 = vld [vmem:[#allocation19 + $0x484] sm:$0xf0] }
 0x40e   :  { %4876 = vmatpush.bf16.msra.mxu0 %v6822_v23  ;;  %v8071_v23 = vld [vmem:[#allocation19 + $0xec] sm:$0xf]  ;;  %v7494_v27 = vor.u32 %v8228_v37, %v7493_v19  ;;  %v7607_v5 = vld [vmem:[#allocation19 + $0x6b4] sm:$0xf0]  ;;  %v8096_v14 = vld [vmem:[#allocation19 + $0x1b0] sm:$0xf0]  ;;  %v6770_v19 = vor.u32 %v8043_v8, %v6767_v61 }
 0x40f   :  { %4809 = vmatmul.bf16.vlgmr.msra.gmra.mxu3 %v8819_v25  ;;  %4837 = vmatmul.bf16.vlgmr.msrb.gmra.mxu1 %v8811_v31  ;;  %v8089_v41 = vld [vmem:[#allocation19 + $0x178] sm:$0xf0]  ;;  %v6991_v30 = vld [vmem:[#allocation19 + $0x1e4] sm:$0xf0]  ;;  %v7193_v33 = vld [vmem:[#allocation19 + $0x358] sm:$0xf] }
 0x410   :  { %4889 = vmatpush.bf16.msra.mxu1 %v7074_v21  ;;  %4913 = vmatpush.bf16.msra.mxu3 %v7634_v24  ;;  %v7131_v21 = vld [vmem:[#allocation19 + $0x2fc] sm:$0xf0]  ;;  %v6882_v24 = vor.u32 %v8071_v23, %v6879_v16  ;;  %v8246_v16 = vld [vmem:[#allocation19 + $0x664] sm:$0xf]  ;;  %v8152_v34 = vld [vmem:[#allocation19 + $0x370] sm:$0xf0] }
 0x411   :  { %4901 = vmatpush.bf16.msra.mxu2 %v7354_v26  ;;  %v8158_v26 = vld [vmem:[#allocation19 + $0x3a0] sm:$0xf0]  ;;  %v7134_v32 = vor.u32 %v8134_v42, %v7131_v21  ;;  %v7019_v23 = vld [vmem:[#allocation19 + $0x21c] sm:$0xf0]  ;;  %v8176_v42 = vld [vmem:[#allocation19 + $0x434] sm:$0xf] }
 0x412   :  { %4877 = vmatpush.bf16.msra.mxu0 %v6794_v28  ;;  %v8204_v28 = vld [vmem:[#allocation19 + $0x514] sm:$0xf]  ;;  %v7299_v21 = vld [vmem:[#allocation19 + $0x44c] sm:$0xf0]  ;;  %v7165_v49 = vld [vmem:[#allocation19 + $0x320] sm:$0xf] }
 0x413   :  { %v7414_v39 = vor.u32 %v8204_v28, %v7411_v29  ;;  %v8239_v28 = vld [vmem:[#allocation19 + $0x62c] sm:$0xf]  ;;  %v7551_v29 = vld [vmem:[#allocation19 + $0x644] sm:$0xf0]  ;;  %v8145_v50 = vld [vmem:[#allocation19 + $0x338] sm:$0xf0] }
 0x414   :  { %4890 = vmatpush.bf16.msra.mxu1 %v7046_v22  ;;  %4914 = vmatpush.bf16.msra.mxu3 %v7606_v35  ;;  %v7214_v22 = vor.u32 %v8158_v26, %v7213_v2  ;;  %v8127_v35 = vld [vmem:[#allocation19 + $0x2ac] sm:$0xf]  ;;  %v6941_v26 = vld [vmem:[#allocation19 + $0x160] sm:$0xf]  ;;  %v8208_v8 = vld [vmem:[#allocation19 + $0x530] sm:$0xf0] }
 0x415   :  { %4902 = vmatpush.bf16.msra.mxu2 %v7326_v40  ;;  %v8057_v40 = vld [vmem:[#allocation19 + $0x7c] sm:$0xf]  ;;  %v7243_v52 = vld [vmem:[#allocation19 + $0x3dc] sm:$0xf0] }
 0x416   :  { %4878 = vmatpush.bf16.msra.mxu0 %v6766_v46  ;;  %v7383_v46 = vld [vmem:[#allocation19 + $0x4f4] sm:$0xf0]  ;;  %v6826_v53 = vor.u32 %v8057_v40, %v6823_v44  ;;  %v6913_v40 = vld [vmem:[#allocation19 + $0x128] sm:$0xf]  ;;  %v7194_v44 = vor.u32 %v8152_v34, %v7193_v33 }
 0x417   :  { %v7386_v17 = vor.u32 %v8197_v45, %v7383_v46  ;;  %v8232_v45 = vld [vmem:[#allocation19 + $0x5f4] sm:$0xf]  ;;  %v7523_v46 = vld [vmem:[#allocation19 + $0x60c] sm:$0xf0] }
 0x418   :  { %4891 = vmatpush.bf16.msra.mxu1 %v7018_v11  ;;  %4915 = vmatpush.bf16.msra.mxu3 %v7578_v51  ;;  %v8120_v11 = vld [vmem:[#allocation19 + $0x274] sm:$0xf]  ;;  %v7075_v51 = vld [vmem:[#allocation19 + $0x28c] sm:$0xf0]  ;;  %v7526_v0 = vor.u32 %v8232_v45, %v7523_v46  ;;  %v8047_v46 = vld [vmem:[#allocation19 + $0x28] sm:$0xf0] }
 0x419   :  { %4851 = vmatmul.bf16.vlgmr.msrb.gmra.mxu2 %v8815_v59  ;;  %4879 = vmatmul.bf16.vlgmr.msra.gmra.mxu0 %v8807_v13 }
 0x41a   :  { %4927 = vmatpush.bf16.msrb.mxu0 %v6966_v47  ;;  %4903 = vmatpush.bf16.msra.mxu2 %v7298_v54  ;;  %v7106_v47 = vor.u32 %v8127_v35, %v7103_v36  ;;  %v6795_v54 = vld [vmem:[#allocation19 + $0x5c] sm:$0xf0]  ;;  %v8169_v35 = vld [vmem:[#allocation19 + $0x3fc] sm:$0xf]  ;;  %v7271_v36 = vld [vmem:[#allocation19 + $0x414] sm:$0xf0] }
 0x41b   :  { %v6798_v6 = vor.u32 %v8050_v57, %v6795_v54  ;;  %v7166_v57 = vor.u32 %v8145_v50, %v7165_v49  ;;  %v7495_v54 = vld [vmem:[#allocation19 + $0x5d4] sm:$0xf0]  ;;  %v8187_v49 = vld [vmem:[#allocation19 + $0x488] sm:$0xf0] }
 0x41c   :  { %4892 = vmatpush.bf16.msra.mxu1 %v6990_v3  ;;  %4916 = vmatpush.bf16.msra.mxu3 %v7550_v4  ;;  %v7047_v3 = vld [vmem:[#allocation19 + $0x254] sm:$0xf0]  ;;  %v8253_v4 = vld [vmem:[#allocation19 + $0x69c] sm:$0xf] }
 0x41d   :  { %v7050_v10 = vor.u32 %v8113_v1, %v7047_v3  ;;  %v8155_v1 = vld [vmem:[#allocation19 + $0x38c] sm:$0xf]  ;;  %v7215_v3 = vld [vmem:[#allocation19 + $0x3a4] sm:$0xf0] }
 0x41e   :  { %4928 = vmatpush.bf16.msrb.mxu0 %v6938_v58  ;;  %4904 = vmatpush.bf16.msra.mxu2 %v7270_v9  ;;  %v7078_v58 = vor.u32 %v8120_v11, %v7075_v51  ;;  %v8183_v9 = vld [vmem:[#allocation19 + $0x46c] sm:$0xf]  ;;  %v8162_v51 = vld [vmem:[#allocation19 + $0x3c4] sm:$0xf] }
 0x41f   :  { %4865 = vmatmul.bf16.vlgmr.msrb.gmra.mxu3 %v8819_v25  ;;  %4893 = vmatmul.bf16.vlgmr.msra.gmra.mxu1 %v8811_v31  ;;  %v7330_v37 = vor.u32 %v8183_v9, %v7327_v63  ;;  %v8218_v9 = vld [vmem:[#allocation19 + $0x584] sm:$0xf]  ;;  %v7467_v63 = vld [vmem:[#allocation19 + $0x59c] sm:$0xf0] }
 0x420   :  { %4941 = vmatpush.bf16.msrb.mxu1 %v7190_v7  ;;  %4917 = vmatpush.bf16.msra.mxu3 %v7522_v15  ;;  %v7358_v7 = vor.u32 %v8190_v55, %v7355_v56  ;;  %v8106_v15 = vld [vmem:[#allocation19 + $0x204] sm:$0xf]  ;;  %v7246_v55 = vor.u32 %v8162_v51, %v7243_v52  ;;  %v7137_v56 = vld [vmem:[#allocation19 + $0x2e8] sm:$0xf]  ;;  %v8093_v51 = vld [vmem:[#allocation19 + $0x19c] sm:$0xf] }
 0x421   :  { %v6971_v52 = vld [vmem:[#allocation19 + $0x1b4] sm:$0xf0] }
 0x422   :  { %4929 = vmatpush.bf16.msrb.mxu0 %v6910_v62  ;;  %4905 = vmatpush.bf16.msra.mxu2 %v7242_v20  ;;  %v7610_v62 = vor.u32 %v8253_v4, %v7607_v5  ;;  %v6970_v20 = vor.u32 %v8096_v14, %v6969_v12  ;;  %v6857_v4 = vld [vmem:[#allocation19 + $0xb8] sm:$0xf]  ;;  %v8131_v12 = vld [vmem:[#allocation19 + $0x2c8] sm:$0xf0] }
 0x424   :  { %4942 = vmatpush.bf16.msrb.mxu1 %v7162_v18  ;;  %4918 = vmatpush.bf16.msra.mxu3 %v7494_v27  ;;  %v7579_v18 = vld [vmem:[#allocation19 + $0x67c] sm:$0xf0]  ;;  %v8099_v27 = vld [vmem:[#allocation19 + $0x1cc] sm:$0xf] }
 0x425   :  { %v7582_v2 = vor.u32 %v8246_v16, %v7579_v18  ;;  %v7470_v16 = vor.u32 %v8218_v9, %v7467_v63  ;;  %v8061_v18 = vld [vmem:[#allocation19 + $0x98] sm:$0xf0]  ;;  %v7195_v9 = vld [vmem:[#allocation19 + $0x374] sm:$0xf0] }
 0x426   :  { %4930 = vmatpush.bf16.msrb.mxu0 %v6882_v24  ;;  %4906 = vmatpush.bf16.msra.mxu2 %v7214_v22  ;;  %v7022_v24 = vor.u32 %v8106_v15, %v7019_v23  ;;  %v6942_v22 = vor.u32 %v8089_v41, %v6941_v26  ;;  %v6829_v23 = vld [vmem:[#allocation19 + $0x80] sm:$0xf]  ;;  %v7641_v26 = vld [vmem:[#allocation19 + $0x6d8] sm:$0xf]  ;;  %v8264_v41 = vld [vmem:[#allocation19 + $0x6f0] sm:$0xf0] }
 0x427   :  { %v7642_v34 = vor.u32 %v8264_v41, %v7641_v26  ;;  %v7249_v26 = vld [vmem:[#allocation19 + $0x3c8] sm:$0xf]  ;;  %v8166_v41 = vld [vmem:[#allocation19 + $0x3e0] sm:$0xf0] }
 0x428   :  { %4943 = vmatpush.bf16.msrb.mxu1 %v7134_v32  ;;  %4919 = vmatpush.bf16.msra.mxu3 %v7466_v43  ;;  %v7302_v32 = vor.u32 %v8176_v42, %v7299_v21  ;;  %v8082_v43 = vld [vmem:[#allocation19 + $0x140] sm:$0xf0]  ;;  %v8211_v42 = vld [vmem:[#allocation19 + $0x54c] sm:$0xf]  ;;  %v7439_v21 = vld [vmem:[#allocation19 + $0x564] sm:$0xf0] }
 0x429   :  { %4907 = vmatmul.bf16.vlgmr.msra.gmra.mxu2 %v8815_v59  ;;  %v6914_v11 = vor.u32 %v8082_v43, %v6913_v40  ;;  %v8257_v40 = vld [vmem:[#allocation19 + $0x6b8] sm:$0xf0] }
 0x42a   :  { %4931 = vmatpush.bf16.msrb.mxu0 %v6854_v38  ;;  %4955 = vmatpush.bf16.msrb.mxu2 %v7414_v39  ;;  %v6994_v38 = vor.u32 %v8099_v27, %v6991_v30  ;;  %v7554_v39 = vor.u32 %v8239_v28, %v7551_v29  ;;  %v6830_v27 = vor.u32 %v8061_v18, %v6829_v23  ;;  %v6801_v29 = vld [vmem:[#allocation19 + $0x48] sm:$0xf]  ;;  %v8079_v23 = vld [vmem:[#allocation19 + $0x12c] sm:$0xf] }
 0x42b   :  { %v7442_v28 = vor.u32 %v8211_v42, %v7439_v21  ;;  %v6915_v18 = vld [vmem:[#allocation19 + $0x144] sm:$0xf0]  ;;  %v7167_v42 = vld [vmem:[#allocation19 + $0x33c] sm:$0xf0] }
 0x42c   :  { %4944 = vmatpush.bf16.msrb.mxu1 %v7106_v47  ;;  %4920 = vmatpush.bf16.msra.mxu3 %v7438_v48  ;;  %v7274_v47 = vor.u32 %v8169_v35, %v7271_v36  ;;  %v8225_v48 = vld [vmem:[#allocation19 + $0x5bc] sm:$0xf]  ;;  %v8194_v35 = vld [vmem:[#allocation19 + $0x4c0] sm:$0xf0]  ;;  %v7053_v36 = vld [vmem:[#allocation19 + $0x240] sm:$0xf] }
 0x42d   :  { %v7498_v5 = vor.u32 %v8225_v48, %v7495_v54 }
 0x42e   :  { %4932 = vmatpush.bf16.msrb.mxu0 %v6826_v53  ;;  %4956 = vmatpush.bf16.msrb.mxu2 %v7386_v17  ;;  %v6885_v53 = vld [vmem:[#allocation19 + $0xf0] sm:$0xf]  ;;  %v8075_v17 = vld [vmem:[#allocation19 + $0x108] sm:$0xf0] }
 0x42f   :  { %4921 = vmatmul.bf16.vlgmr.msra.gmra.mxu3 %v8819_v25 }
 0x430   :  { %4945 = vmatpush.bf16.msrb.mxu1 %v7078_v58  ;;  %4969 = vmatpush.bf16.msrb.mxu3 %v7638_v60  ;;  %v8138_v58 = vld [vmem:[#allocation19 + $0x300] sm:$0xf0]  ;;  %v6886_v60 = vor.u32 %v8075_v17, %v6885_v53  ;;  %v7585_v17 = vld [vmem:[#allocation19 + $0x668] sm:$0xf] }
 0x431   :  { %v7138_v61 = vor.u32 %v8138_v58, %v7137_v56  ;;  %v8110_v53 = vld [vmem:[#allocation19 + $0x220] sm:$0xf0]  ;;  %v7305_v56 = vld [vmem:[#allocation19 + $0x438] sm:$0xf]  ;;  %v8180_v58 = vld [vmem:[#allocation19 + $0x450] sm:$0xf0] }
 0x432   :  { %4933 = vmatpush.bf16.msrb.mxu0 %v6798_v6  ;;  %4957 = vmatpush.bf16.msrb.mxu2 %v7358_v7  ;;  %v8068_v6 = vld [vmem:[#allocation19 + $0xd0] sm:$0xf0]  ;;  %v7417_v7 = vld [vmem:[#allocation19 + $0x518] sm:$0xf]  ;;  %v7306_v63 = vor.u32 %v8180_v58, %v7305_v56  ;;  %v7445_v56 = vld [vmem:[#allocation19 + $0x550] sm:$0xf] }
 0x433   :  { %v6858_v14 = vor.u32 %v8068_v6, %v6857_v4  ;;  %v7418_v15 = vor.u32 %v8208_v8, %v7417_v7  ;;  %v6943_v4 = vld [vmem:[#allocation19 + $0x17c] sm:$0xf0]  ;;  %v8103_v6 = vld [vmem:[#allocation19 + $0x1e8] sm:$0xf0]  ;;  %v7557_v7 = vld [vmem:[#allocation19 + $0x630] sm:$0xf] }
 0x434   :  { %4946 = vmatpush.bf16.msrb.mxu1 %v7050_v10  ;;  %4970 = vmatpush.bf16.msrb.mxu3 %v7610_v62  ;;  %v7218_v10 = vor.u32 %v8155_v1, %v7215_v3  ;;  %v7109_v62 = vld [vmem:[#allocation19 + $0x2b0] sm:$0xf]  ;;  %v8086_v3 = vld [vmem:[#allocation19 + $0x164] sm:$0xf]  ;;  %v8243_v8 = vld [vmem:[#allocation19 + $0x648] sm:$0xf0] }
 0x435   :  { %v8215_v58 = vld [vmem:[#allocation19 + $0x568] sm:$0xf0] }
 0x436   :  { %4934 = vmatpush.bf16.msrb.mxu0 %v6770_v19  ;;  %4958 = vmatpush.bf16.msrb.mxu2 %v7330_v37  ;;  %v7389_v19 = vld [vmem:[#allocation19 + $0x4e0] sm:$0xf]  ;;  %v8201_v37 = vld [vmem:[#allocation19 + $0x4f8] sm:$0xf0] }
 0x437   :  { %v7390_v30 = vor.u32 %v8201_v37, %v7389_v19  ;;  %v7529_v19 = vld [vmem:[#allocation19 + $0x5f8] sm:$0xf]  ;;  %v8236_v37 = vld [vmem:[#allocation19 + $0x610] sm:$0xf0] }
 0x438   :  { %4947 = vmatpush.bf16.msrb.mxu1 %v7022_v24  ;;  %4971 = vmatpush.bf16.msrb.mxu3 %v7582_v2  ;;  %v7081_v24 = vld [vmem:[#allocation19 + $0x278] sm:$0xf]  ;;  %v8124_v2 = vld [vmem:[#allocation19 + $0x290] sm:$0xf0] }
 0x439   :  { %4935 = vmatmul.bf16.vlgmr.msrb.gmra.mxu0 %v8807_v13  ;;  %v7082_v33 = vor.u32 %v8124_v2, %v7081_v24  ;;  %v6918_v24 = vor.u32 %v8079_v23, %v6915_v18  ;;  %v7530_v2 = vor.u32 %v8236_v37, %v7529_v19  ;;  %v7615_v23 = vld [vmem:[#allocation19 + $0x6bc] sm:$0xf0]  ;;  %v8044_v18 = vld [vmem:[#allocation19 + $0x14] sm:$0xf] }
 0x43a   :  { %4983 = vmatpush.bf16.msra.mxu0 %v6970_v20  ;;  %4959 = vmatpush.bf16.msrb.mxu2 %v7302_v32  ;;  %v7110_v20 = vor.u32 %v8131_v12, %v7109_v62  ;;  %v8054_v32 = vld [vmem:[#allocation19 + $0x60] sm:$0xf0]  ;;  %v7558_v12 = vor.u32 %v8243_v8, %v7557_v7  ;;  %v7446_v7 = vor.u32 %v8215_v58, %v7445_v56 }
 0x43b   :  { %v6802_v43 = vor.u32 %v8054_v32, %v6801_v29  ;;  %v7501_v29 = vld [vmem:[#allocation19 + $0x5c0] sm:$0xf]  ;;  %v8229_v32 = vld [vmem:[#allocation19 + $0x5d8] sm:$0xf0]  ;;  %v8146_v56 = vld [vmem:[#allocation19 + $0x340] sm:$0xf0] }
 0x43c   :  { %4948 = vmatpush.bf16.msrb.mxu1 %v6994_v38  ;;  %4972 = vmatpush.bf16.msrb.mxu3 %v7554_v39  ;;  %v8117_v38 = vld [vmem:[#allocation19 + $0x258] sm:$0xf0]  ;;  %v7613_v39 = vld [vmem:[#allocation19 + $0x6a0] sm:$0xf] }
 0x43d   :  { %v7054_v50 = vor.u32 %v8117_v38, %v7053_v36  ;;  %v7502_v38 = vor.u32 %v8229_v32, %v7501_v29 }
 0x43e   :  { %4984 = vmatpush.bf16.msra.mxu0 %v6942_v22  ;;  %4960 = vmatpush.bf16.msrb.mxu2 %v7274_v47  ;;  %v7361_v22 = vld [vmem:[#allocation19 + $0x4a8] sm:$0xf]  ;;  %v7333_v47 = vld [vmem:[#allocation19 + $0x470] sm:$0xf] }
 0x43f   :  { %4949 = vmatmul.bf16.vlgmr.msrb.gmra.mxu1 %v8811_v31  ;;  %v7362_v45 = vor.u32 %v8194_v35, %v7361_v22  ;;  %v7334_v54 = vor.u32 %v8187_v49, %v7333_v47  ;;  %v7250_v22 = vor.u32 %v8166_v41, %v7249_v26  ;;  %v7221_v35 = vld [vmem:[#allocation19 + $0x390] sm:$0xf]  ;;  %v7473_v47 = vld [vmem:[#allocation19 + $0x588] sm:$0xf]  ;;  %v8222_v49 = vld [vmem:[#allocation19 + $0x5a0] sm:$0xf0] }
 0x440   :  { %4997 = vmatpush.bf16.msra.mxu1 %v7194_v44  ;;  %4973 = vmatpush.bf16.msrb.mxu3 %v7526_v0  ;;  %v6773_v44 = vld [vmem:[#allocation19 + $0x10] sm:$0xf]  ;;  %v7025_v0 = vld [vmem:[#allocation19 + $0x208] sm:$0xf]  ;;  %v8097_v26 = vld [vmem:[#allocation19 + $0x1b8] sm:$0xf0] }
 0x441   :  { %v6774_v48 = vor.u32 %v8047_v46, %v6773_v44  ;;  %v7419_v46 = vld [vmem:[#allocation19 + $0x534] sm:$0xf0]  ;;  %v8107_v41 = vld [vmem:[#allocation19 + $0x20c] sm:$0xf] }
 0x442   :  { %4985 = vmatpush.bf16.msra.mxu0 %v6914_v11  ;;  %4961 = vmatpush.bf16.msrb.mxu2 %v7246_v55  ;;  %v7614_v11 = vor.u32 %v8257_v40, %v7613_v39  ;;  %v6974_v55 = vor.u32 %v8093_v51, %v6971_v52  ;;  %v8159_v39 = vld [vmem:[#allocation19 + $0x3a8] sm:$0xf0]  ;;  %v8065_v40 = vld [vmem:[#allocation19 + $0xbc] sm:$0xf] }
 0x443   :  { %v7222_v51 = vor.u32 %v8159_v39, %v7221_v35  ;;  %v8090_v39 = vld [vmem:[#allocation19 + $0x180] sm:$0xf0] }
 0x444   :  { %4998 = vmatpush.bf16.msra.mxu1 %v7166_v57  ;;  %4974 = vmatpush.bf16.msrb.mxu3 %v7498_v5  ;;  %v8250_v57 = vld [vmem:[#allocation19 + $0x680] sm:$0xf0]  ;;  %v6997_v5 = vld [vmem:[#allocation19 + $0x1d0] sm:$0xf] }
 0x445   :  { %v7586_v1 = vor.u32 %v8250_v57, %v7585_v17  ;;  %v6998_v62 = vor.u32 %v8103_v6, %v6997_v5  ;;  %v6831_v17 = vld [vmem:[#allocation19 + $0x9c] sm:$0xf0]  ;;  %v7474_v57 = vor.u32 %v8222_v49, %v7473_v47  ;;  %v8153_v47 = vld [vmem:[#allocation19 + $0x378] sm:$0xf0] }
 0x446   :  { %4986 = vmatpush.bf16.msra.mxu0 %v6886_v60  ;;  %4962 = vmatpush.bf16.msrb.mxu2 %v7218_v10  ;;  %v7026_v60 = vor.u32 %v8110_v53, %v7025_v0  ;;  %v6946_v10 = vor.u32 %v8086_v3, %v6943_v4  ;;  %v8058_v53 = vld [vmem:[#allocation19 + $0x84] sm:$0xf]  ;;  %v8261_v3 = vld [vmem:[#allocation19 + $0x6dc] sm:$0xf]  ;;  %v7643_v4 = vld [vmem:[#allocation19 + $0x6f4] sm:$0xf0] }
 0x447   :  { %v6834_v5 = vor.u32 %v8058_v53, %v6831_v17  ;;  %v6921_v53 = vld [vmem:[#allocation19 + $0x130] sm:$0xf] }
 0x448   :  { %4999 = vmatpush.bf16.msra.mxu1 %v7138_v61  ;;  %4975 = vmatpush.bf16.msrb.mxu3 %v7470_v16  ;;  %v8149_v61 = vld [vmem:[#allocation19 + $0x35c] sm:$0xf] }
 0x449   :  { %4963 = vmatmul.bf16.vlgmr.msrb.gmra.mxu2 %v8815_v59  ;;  %v7198_v16 = vor.u32 %v8149_v61, %v7195_v9  ;;  %v8051_v61 = vld [vmem:[#allocation19 + $0x4c] sm:$0xf]  ;;  %v6803_v9 = vld [vmem:[#allocation19 + $0x64] sm:$0xf0] }
 0x44a   :  { %4987 = vmatpush.bf16.msra.mxu0 %v6858_v14  ;;  %5011 = vmatpush.bf16.msra.mxu2 %v7418_v15  ;;  %v7277_v14 = vld [vmem:[#allocation19 + $0x400] sm:$0xf]  ;;  %v8173_v15 = vld [vmem:[#allocation19 + $0x418] sm:$0xf0] }
 0x44b   :  { %v7278_v21 = vor.u32 %v8173_v15, %v7277_v14  ;;  %v7055_v14 = vld [vmem:[#allocation19 + $0x25c] sm:$0xf0]  ;;  %v8254_v15 = vld [vmem:[#allocation19 + $0x6a4] sm:$0xf] }
 0x44c   :  { %5000 = vmatpush.bf16.msra.mxu1 %v7110_v20  ;;  %4976 = vmatpush.bf16.msrb.mxu3 %v7442_v28  ;;  %v8142_v20 = vld [vmem:[#allocation19 + $0x324] sm:$0xf]  ;;  %v6887_v28 = vld [vmem:[#allocation19 + $0x10c] sm:$0xf0] }
 0x44e   :  { %4988 = vmatpush.bf16.msra.mxu0 %v6830_v27  ;;  %5012 = vmatpush.bf16.msra.mxu2 %v7390_v30  ;;  %v8072_v27 = vld [vmem:[#allocation19 + $0xf4] sm:$0xf]  ;;  %v7170_v30 = vor.u32 %v8142_v20, %v7167_v42  ;;  %v6775_v20 = vld [vmem:[#allocation19 + $0x2c] sm:$0xf0] }
 0x44f   :  { %4977 = vmatmul.bf16.vlgmr.msrb.gmra.mxu3 %v8819_v25  ;;  %v6890_v36 = vor.u32 %v8072_v27, %v6887_v28  ;;  %v8184_v42 = vld [vmem:[#allocation19 + $0x474] sm:$0xf]  ;;  %v7027_v27 = vld [vmem:[#allocation19 + $0x224] sm:$0xf0]  ;;  %v6778_v29 = vor.u32 %v8044_v18, %v6775_v20  ;;  %v8219_v20 = vld [vmem:[#allocation19 + $0x58c] sm:$0xf] }
 0x450   :  { %5001 = vmatpush.bf16.msra.mxu1 %v7082_v33  ;;  %5025 = vmatpush.bf16.msra.mxu3 %v7642_v34  ;;  %v8135_v33 = vld [vmem:[#allocation19 + $0x2ec] sm:$0xf]  ;;  %v7139_v34 = vld [vmem:[#allocation19 + $0x304] sm:$0xf0]  ;;  %v7030_v35 = vor.u32 %v8107_v41, %v7027_v27 }
 0x451   :  { %v7142_v44 = vor.u32 %v8135_v33, %v7139_v34  ;;  %v7587_v28 = vld [vmem:[#allocation19 + $0x684] sm:$0xf0]  ;;  %v8177_v34 = vld [vmem:[#allocation19 + $0x43c] sm:$0xf] }
 0x452   :  { %4989 = vmatpush.bf16.msra.mxu0 %v6802_v43  ;;  %5013 = vmatpush.bf16.msra.mxu2 %v7362_v45  ;;  %v6859_v43 = vld [vmem:[#allocation19 + $0xd4] sm:$0xf0]  ;;  %v8205_v45 = vld [vmem:[#allocation19 + $0x51c] sm:$0xf]  ;;  %v6837_v27 = vld [vmem:[#allocation19 + $0x88] sm:$0xf] }
 0x453   :  { %v6862_v52 = vor.u32 %v8065_v40, %v6859_v43  ;;  %v7422_v0 = vor.u32 %v8205_v45, %v7419_v46  ;;  %v8100_v40 = vld [vmem:[#allocation19 + $0x1d4] sm:$0xf]  ;;  %v6999_v43 = vld [vmem:[#allocation19 + $0x1ec] sm:$0xf0]  ;;  %v7201_v46 = vld [vmem:[#allocation19 + $0x360] sm:$0xf] }
 0x454   :  { %5002 = vmatpush.bf16.msra.mxu1 %v7054_v50  ;;  %5026 = vmatpush.bf16.msra.mxu3 %v7614_v11  ;;  %v8128_v50 = vld [vmem:[#allocation19 + $0x2b4] sm:$0xf]  ;;  %v7111_v11 = vld [vmem:[#allocation19 + $0x2cc] sm:$0xf0]  ;;  %v7202_v17 = vor.u32 %v8153_v47, %v7201_v46  ;;  %v8055_v47 = vld [vmem:[#allocation19 + $0x68] sm:$0xf0] }
 0x455   :  { %v7559_v45 = vld [vmem:[#allocation19 + $0x64c] sm:$0xf0] }
 0x456   :  { %4990 = vmatpush.bf16.msra.mxu0 %v6774_v48  ;;  %5014 = vmatpush.bf16.msra.mxu2 %v7334_v54  ;;  %v7114_v48 = vor.u32 %v8128_v50, %v7111_v11  ;;  %v8198_v54 = vld [vmem:[#allocation19 + $0x4e4] sm:$0xf]  ;;  %v7002_v11 = vor.u32 %v8100_v40, %v6999_v43  ;;  %v6809_v46 = vld [vmem:[#allocation19 + $0x50] sm:$0xf] }
 0x458   :  { %5003 = vmatpush.bf16.msra.mxu1 %v7026_v60  ;;  %5027 = vmatpush.bf16.msra.mxu3 %v7586_v1  ;;  %v8121_v60 = vld [vmem:[#allocation19 + $0x27c] sm:$0xf]  ;;  %v7083_v1 = vld [vmem:[#allocation19 + $0x294] sm:$0xf0] }
 0x459   :  { %4991 = vmatmul.bf16.vlgmr.msra.gmra.mxu0 %v8807_v13  ;;  %v7086_v8 = vor.u32 %v8121_v60, %v7083_v1 }
 0x45a   :  { %5039 = vmatpush.bf16.msrb.mxu0 %v6974_v55  ;;  %5015 = vmatpush.bf16.msra.mxu2 %v7306_v63  ;;  %v7391_v55 = vld [vmem:[#allocation19 + $0x4fc] sm:$0xf0]  ;;  %v8191_v63 = vld [vmem:[#allocation19 + $0x4ac] sm:$0xf] }
 0x45b   :  { %v7394_v6 = vor.u32 %v8198_v54, %v7391_v55  ;;  %v7531_v54 = vld [vmem:[#allocation19 + $0x614] sm:$0xf0]  ;;  %v7173_v55 = vld [vmem:[#allocation19 + $0x328] sm:$0xf] }
 0x45c   :  { %5004 = vmatpush.bf16.msra.mxu1 %v6998_v62  ;;  %5028 = vmatpush.bf16.msra.mxu3 %v7558_v12  ;;  %v7363_v62 = vld [vmem:[#allocation19 + $0x4c4] sm:$0xf0]  ;;  %v8114_v12 = vld [vmem:[#allocation19 + $0x244] sm:$0xf] }
 0x45d   :  { %v7366_v19 = vor.u32 %v8191_v63, %v7363_v62  ;;  %v7058_v37 = vor.u32 %v8114_v12, %v7055_v14  ;;  %v8139_v63 = vld [vmem:[#allocation19 + $0x308] sm:$0xf0]  ;;  %v8156_v62 = vld [vmem:[#allocation19 + $0x394] sm:$0xf] }
 0x45e   :  { %5040 = vmatpush.bf16.msrb.mxu0 %v6946_v10  ;;  %5016 = vmatpush.bf16.msra.mxu2 %v7278_v21  ;;  %v7646_v10 = vor.u32 %v8261_v3, %v7643_v4  ;;  %v7335_v21 = vld [vmem:[#allocation19 + $0x48c] sm:$0xf0]  ;;  %v8163_v3 = vld [vmem:[#allocation19 + $0x3cc] sm:$0xf]  ;;  %v7251_v4 = vld [vmem:[#allocation19 + $0x3e4] sm:$0xf0] }
 0x45f   :  { %5005 = vmatmul.bf16.vlgmr.msra.gmra.mxu1 %v8811_v31  ;;  %v7338_v32 = vor.u32 %v8184_v42, %v7335_v21  ;;  %v7475_v42 = vld [vmem:[#allocation19 + $0x5a4] sm:$0xf0]  ;;  %v7117_v21 = vld [vmem:[#allocation19 + $0x2b8] sm:$0xf] }
 0x460   :  { %5053 = vmatpush.bf16.msrb.mxu1 %v7198_v16  ;;  %5029 = vmatpush.bf16.msra.mxu3 %v7530_v2  ;;  %v6806_v16 = vor.u32 %v8051_v61, %v6803_v9  ;;  %v6977_v2 = vld [vmem:[#allocation19 + $0x1a0] sm:$0xf]  ;;  %v7145_v9 = vld [vmem:[#allocation19 + $0x2f0] sm:$0xf] }
 0x461   :  { %v6978_v33 = vor.u32 %v8097_v26, %v6977_v2  ;;  %v7503_v61 = vld [vmem:[#allocation19 + $0x5dc] sm:$0xf0]  ;;  %v7146_v18 = vor.u32 %v8139_v63, %v7145_v9 }
 0x462   :  { %5041 = vmatpush.bf16.msrb.mxu0 %v6918_v24  ;;  %5017 = vmatpush.bf16.msra.mxu2 %v7250_v22  ;;  %v7618_v24 = vor.u32 %v8254_v15, %v7615_v23  ;;  %v7307_v22 = vld [vmem:[#allocation19 + $0x454] sm:$0xf0]  ;;  %v7223_v15 = vld [vmem:[#allocation19 + $0x3ac] sm:$0xf0]  ;;  %v6865_v23 = vld [vmem:[#allocation19 + $0xc0] sm:$0xf] }
 0x463   :  { %v7310_v49 = vor.u32 %v8177_v34, %v7307_v22  ;;  %v7226_v2 = vor.u32 %v8156_v62, %v7223_v15  ;;  %v8212_v34 = vld [vmem:[#allocation19 + $0x554] sm:$0xf]  ;;  %v7447_v22 = vld [vmem:[#allocation19 + $0x56c] sm:$0xf0]  ;;  %v7313_v63 = vld [vmem:[#allocation19 + $0x440] sm:$0xf] }
 0x464   :  { %5054 = vmatpush.bf16.msrb.mxu1 %v7170_v30  ;;  %5030 = vmatpush.bf16.msra.mxu3 %v7502_v38  ;;  %v8247_v30 = vld [vmem:[#allocation19 + $0x66c] sm:$0xf]  ;;  %v6949_v38 = vld [vmem:[#allocation19 + $0x168] sm:$0xf]  ;;  %v8181_v62 = vld [vmem:[#allocation19 + $0x458] sm:$0xf0] }
 0x465   :  { %v6950_v50 = vor.u32 %v8090_v39, %v6949_v38  ;;  %v7649_v38 = vld [vmem:[#allocation19 + $0x6e0] sm:$0xf]  ;;  %v8265_v39 = vld [vmem:[#allocation19 + $0x6f8] sm:$0xf0] }
 0x466   :  { %5042 = vmatpush.bf16.msrb.mxu0 %v6890_v36  ;;  %5018 = vmatpush.bf16.msra.mxu2 %v7222_v51  ;;  %v7590_v36 = vor.u32 %v8247_v30, %v7587_v28  ;;  %v8062_v30 = vld [vmem:[#allocation19 + $0xa0] sm:$0xf0]  ;;  %v7478_v28 = vor.u32 %v8219_v20, %v7475_v42  ;;  %v7285_v42 = vld [vmem:[#allocation19 + $0x408] sm:$0xf] }
 0x467   :  { %v6838_v40 = vor.u32 %v8062_v30, %v6837_v27 }
 0x468   :  { %5055 = vmatpush.bf16.msrb.mxu1 %v7142_v44  ;;  %5031 = vmatpush.bf16.msra.mxu3 %v7474_v57  ;;  %v8240_v44 = vld [vmem:[#allocation19 + $0x634] sm:$0xf]  ;;  %v8083_v57 = vld [vmem:[#allocation19 + $0x148] sm:$0xf0] }
 0x469   :  { %5019 = vmatmul.bf16.vlgmr.msra.gmra.mxu2 %v8815_v59  ;;  %v7562_v51 = vor.u32 %v8240_v44, %v7559_v45  ;;  %v6922_v60 = vor.u32 %v8083_v57, %v6921_v53  ;;  %v7450_v44 = vor.u32 %v8212_v34, %v7447_v22  ;;  %v8258_v53 = vld [vmem:[#allocation19 + $0x6c0] sm:$0xf0]  ;;  %v6810_v57 = vor.u32 %v8055_v47, %v6809_v46 }
 0x46a   :  { %5043 = vmatpush.bf16.msrb.mxu0 %v6862_v52  ;;  %5067 = vmatpush.bf16.msrb.mxu2 %v7422_v0  ;;  %v8170_v52 = vld [vmem:[#allocation19 + $0x404] sm:$0xf]  ;;  %v7279_v0 = vld [vmem:[#allocation19 + $0x41c] sm:$0xf0] }
 0x46b   :  { %v7282_v58 = vor.u32 %v8170_v52, %v7279_v0  ;;  %v8118_v52 = vld [vmem:[#allocation19 + $0x260] sm:$0xf0]  ;;  %v7621_v0 = vld [vmem:[#allocation19 + $0x6a8] sm:$0xf] }
 0x46c   :  { %5056 = vmatpush.bf16.msrb.mxu1 %v7114_v48  ;;  %5032 = vmatpush.bf16.msra.mxu3 %v7446_v7  ;;  %v8233_v48 = vld [vmem:[#allocation19 + $0x5fc] sm:$0xf]  ;;  %v8076_v7 = vld [vmem:[#allocation19 + $0x110] sm:$0xf0]  ;;  %v8230_v34 = vld [vmem:[#allocation19 + $0x5e0] sm:$0xf0] }
 0x46d   :  { %v7534_v1 = vor.u32 %v8233_v48, %v7531_v54 }
 0x46e   :  { %5044 = vmatpush.bf16.msrb.mxu0 %v6834_v5  ;;  %5068 = vmatpush.bf16.msrb.mxu2 %v7394_v6  ;;  %v6893_v5 = vld [vmem:[#allocation19 + $0xf8] sm:$0xf]  ;;  %v7174_v6 = vor.u32 %v8146_v56, %v7173_v55  ;;  %v8048_v56 = vld [vmem:[#allocation19 + $0x30] sm:$0xf0] }
 0x46f   :  { %5033 = vmatmul.bf16.vlgmr.msra.gmra.mxu3 %v8819_v25  ;;  %v6894_v12 = vor.u32 %v8076_v7, %v6893_v5  ;;  %v6781_v55 = vld [vmem:[#allocation19 + $0x18] sm:$0xf]  ;;  %v8111_v5 = vld [vmem:[#allocation19 + $0x228] sm:$0xf0] }
 0x470   :  { %5057 = vmatpush.bf16.msrb.mxu1 %v7086_v8  ;;  %5081 = vmatpush.bf16.msrb.mxu3 %v7646_v10  ;;  %v8226_v8 = vld [vmem:[#allocation19 + $0x5c4] sm:$0xf]  ;;  %v7254_v10 = vor.u32 %v8163_v3, %v7251_v4  ;;  %v8188_v3 = vld [vmem:[#allocation19 + $0x490] sm:$0xf0]  ;;  %v7033_v4 = vld [vmem:[#allocation19 + $0x210] sm:$0xf] }
 0x471   :  { %v7506_v14 = vor.u32 %v8226_v8, %v7503_v61  ;;  %v8251_v7 = vld [vmem:[#allocation19 + $0x688] sm:$0xf0]  ;;  %v6782_v8 = vor.u32 %v8048_v56, %v6781_v55  ;;  %v7034_v9 = vor.u32 %v8111_v5, %v7033_v4 }
 0x472   :  { %5045 = vmatpush.bf16.msrb.mxu0 %v6806_v16  ;;  %5069 = vmatpush.bf16.msrb.mxu2 %v7366_v19  ;;  %v8069_v16 = vld [vmem:[#allocation19 + $0xd8] sm:$0xf0]  ;;  %v7425_v19 = vld [vmem:[#allocation19 + $0x520] sm:$0xf] }
 0x473   :  { %v6866_v26 = vor.u32 %v8069_v16, %v6865_v23  ;;  %v7565_v23 = vld [vmem:[#allocation19 + $0x638] sm:$0xf]  ;;  %v8244_v16 = vld [vmem:[#allocation19 + $0x650] sm:$0xf0] }
 0x474   :  { %5058 = vmatpush.bf16.msrb.mxu1 %v7058_v37  ;;  %5082 = vmatpush.bf16.msrb.mxu3 %v7618_v24  ;;  %v8209_v37 = vld [vmem:[#allocation19 + $0x538] sm:$0xf0]  ;;  %v8132_v24 = vld [vmem:[#allocation19 + $0x2d0] sm:$0xf0]  ;;  %v7566_v20 = vor.u32 %v8244_v16, %v7565_v23 }
 0x475   :  { %v7426_v41 = vor.u32 %v8209_v37, %v7425_v19 }
 0x476   :  { %5046 = vmatpush.bf16.msrb.mxu0 %v6778_v29  ;;  %5070 = vmatpush.bf16.msrb.mxu2 %v7338_v32  ;;  %v7118_v29 = vor.u32 %v8132_v24, %v7117_v21  ;;  %v7397_v32 = vld [vmem:[#allocation19 + $0x4e8] sm:$0xf]  ;;  %v8174_v21 = vld [vmem:[#allocation19 + $0x420] sm:$0xf0]  ;;  %v7537_v24 = vld [vmem:[#allocation19 + $0x600] sm:$0xf] }
 0x478   :  { %5059 = vmatpush.bf16.msrb.mxu1 %v7030_v35  ;;  %5083 = vmatpush.bf16.msrb.mxu3 %v7590_v36  ;;  %v7089_v35 = vld [vmem:[#allocation19 + $0x280] sm:$0xf]  ;;  %v8125_v36 = vld [vmem:[#allocation19 + $0x298] sm:$0xf0] }
 0x479   :  { %5047 = vmatmul.bf16.vlgmr.msrb.gmra.mxu0 %v8807_v13  ;;  %v7090_v45 = vor.u32 %v8125_v36, %v7089_v35  ;;  %v7229_v36 = vld [vmem:[#allocation19 + $0x398] sm:$0xf] }
 0x47a   :  { %5095 = vmatpush.bf16.msra.mxu0 %v6978_v33  ;;  %5071 = vmatpush.bf16.msrb.mxu2 %v7310_v49  ;;  %v8202_v33 = vld [vmem:[#allocation19 + $0x500] sm:$0xf0]  ;;  %v7369_v49 = vld [vmem:[#allocation19 + $0x4b0] sm:$0xf] }
 0x47b   :  { %v7398_v43 = vor.u32 %v8202_v33, %v7397_v32  ;;  %v7509_v33 = vld [vmem:[#allocation19 + $0x5c8] sm:$0xf] }
 0x47c   :  { %5060 = vmatpush.bf16.msrb.mxu1 %v7002_v11  ;;  %5084 = vmatpush.bf16.msrb.mxu3 %v7562_v51  ;;  %v8195_v11 = vld [vmem:[#allocation19 + $0x4c8] sm:$0xf0]  ;;  %v7061_v51 = vld [vmem:[#allocation19 + $0x248] sm:$0xf]  ;;  %v7510_v35 = vor.u32 %v8230_v34, %v7509_v33 }
 0x47d   :  { %v7370_v48 = vor.u32 %v8195_v11, %v7369_v49  ;;  %v7062_v54 = vor.u32 %v8118_v52, %v7061_v51  ;;  %v8216_v11 = vld [vmem:[#allocation19 + $0x570] sm:$0xf0] }
 0x47e   :  { %5096 = vmatpush.bf16.msra.mxu0 %v6950_v50  ;;  %5072 = vmatpush.bf16.msrb.mxu2 %v7282_v58  ;;  %v7650_v50 = vor.u32 %v8265_v39, %v7649_v38  ;;  %v7341_v58 = vld [vmem:[#allocation19 + $0x478] sm:$0xf]  ;;  %v8160_v38 = vld [vmem:[#allocation19 + $0x3b0] sm:$0xf0]  ;;  %v7481_v39 = vld [vmem:[#allocation19 + $0x590] sm:$0xf] }
 0x47f   :  { %5061 = vmatmul.bf16.vlgmr.msrb.gmra.mxu1 %v8811_v31  ;;  %v7342_v61 = vor.u32 %v8188_v3, %v7341_v58 }
 0x480   :  { %5109 = vmatpush.bf16.msra.mxu1 %v7202_v17  ;;  %5085 = vmatpush.bf16.msrb.mxu3 %v7534_v1  ;;  %v8840_v17 = vpop.f32.mrf.mxu0  ;;  %v7622_v1 = vor.u32 %v8258_v53, %v7621_v0 }
 0x482   :  { %5097 = vmatpush.bf16.msra.mxu0 %v6922_v60  ;;  %5073 = vmatpush.bf16.msrb.mxu2 %v7254_v10  ;;  %v8842_v60 = vpop.f32.mrf.mxu1 }
 0x484   :  { %5110 = vmatpush.bf16.msra.mxu1 %v7174_v6  ;;  %5086 = vmatpush.bf16.msrb.mxu3 %v7506_v14  ;;  %v7593_v6 = vld [vmem:[#allocation19 + $0x670] sm:$0xf]  ;;  %v8104_v14 = vld [vmem:[#allocation19 + $0x1f0] sm:$0xf0] }
 0x485   :  { %v7594_v10 = vor.u32 %v8251_v7, %v7593_v6 }
 0x486   :  { %5098 = vmatpush.bf16.msra.mxu0 %v6894_v12  ;;  %5074 = vmatpush.bf16.msrb.mxu2 %v7226_v2  ;;  %v7005_v12 = vld [vmem:[#allocation19 + $0x1d8] sm:$0xf]  ;;  %v8237_v2 = vld [vmem:[#allocation19 + $0x618] sm:$0xf0] }
 0x487   :  { %v7006_v19 = vor.u32 %v8104_v14, %v7005_v12  ;;  %v7538_v30 = vor.u32 %v8237_v2, %v7537_v24 }
 0x488   :  { %5111 = vmatpush.bf16.msra.mxu1 %v7146_v18  ;;  %5087 = vmatpush.bf16.msrb.mxu3 %v7478_v28  ;;  %v7314_v18 = vor.u32 %v8181_v62, %v7313_v63  ;;  %v4770_v37 = vpop.f32.mrf.mxu0  ;;  %v7257_v28 = vld [vmem:[#allocation19 + $0x3d0] sm:$0xf] }
 0x489   :  { %5075 = vmatmul.bf16.vlgmr.msrb.gmra.mxu2 %v8815_v59 }
 0x48a   :  { %5099 = vmatpush.bf16.msra.mxu0 %v6866_v26  ;;  %5123 = vmatpush.bf16.msra.mxu2 %v7426_v41  ;;  %v4784_v26 = vpop.f32.mrf.mxu1  ;;  %v7286_v41 = vor.u32 %v8174_v21, %v7285_v42 }
 0x48b   :  { %v4796_v15 = vpop.f32.mrf.mxu2 }
 0x48c   :  { %5112 = vmatpush.bf16.msra.mxu1 %v7118_v29  ;;  %5088 = vmatpush.bf16.msrb.mxu3 %v7450_v44  ;;  %v8167_v29 = vld [vmem:[#allocation19 + $0x3e8] sm:$0xf0] }
 0x48d   :  { %v7258_v22 = vor.u32 %v8167_v29, %v7257_v28 }
 0x48e   :  { %5100 = vmatpush.bf16.msra.mxu0 %v6838_v40  ;;  %5124 = vmatpush.bf16.msra.mxu2 %v7398_v43  ;;  %v8223_v40 = vld [vmem:[#allocation19 + $0x5a8] sm:$0xf0] }
 0x48f   :  { %5089 = vmatmul.bf16.vlgmr.msrb.gmra.mxu3 %v8819_v25  ;;  %v7482_v49 = vor.u32 %v8223_v40, %v7481_v39 }
 0x490   :  { %5113 = vmatpush.bf16.msra.mxu1 %v7090_v45  ;;  %5137 = vmatpush.bf16.msra.mxu3 %v7650_v50  ;;  %v4824_v43 = vpop.f32.mrf.mxu0  ;;  %v7453_v50 = vld [vmem:[#allocation19 + $0x558] sm:$0xf] }
 0x491   :  { %v7454_v53 = vor.u32 %v8216_v11, %v7453_v50 }
 0x492   :  { %5101 = vmatpush.bf16.msra.mxu0 %v6810_v57  ;;  %5125 = vmatpush.bf16.msra.mxu2 %v7370_v48  ;;  %v4810_v27 = vpop.f32.mrf.mxu3  ;;  %v4838_v46 = vpop.f32.mrf.mxu1 }
 0x493   :  { %v4798_v32 = vpop.f32.mrf.mxu2 }
 0x494   :  { %5114 = vmatpush.bf16.msra.mxu1 %v7062_v54  ;;  %5138 = vmatpush.bf16.msra.mxu3 %v7622_v1 }
 0x496   :  { %5102 = vmatpush.bf16.msra.mxu0 %v6782_v8  ;;  %5126 = vmatpush.bf16.msra.mxu2 %v7342_v61 }
 0x498   :  { %5115 = vmatpush.bf16.msra.mxu1 %v7034_v9  ;;  %5139 = vmatpush.bf16.msra.mxu3 %v7594_v10  ;;  %v4826_v56 = vpop.f32.mrf.mxu0 }
 0x499   :  { %5103 = vmatmul.bf16.vlgmr.msra.gmra.mxu0 %v8807_v13  ;;  %v8850_v13 = vld [vmem:[%s8881_s12] sm:$0xff]  ;;  %s8608_s12 = smov [#allocation20]  }
 0x49a   :  { %5127 = vmatpush.bf16.msra.mxu2 %v7314_v18  ;;  %v3593_v44 = vperm.slane %v8850_v13, 0  ;;  %v3594_v45 = vperm.slane %v8850_v13, 1  ;;  %v4812_v47 = vpop.f32.mrf.mxu3  ;;  %v4840_v4 = vpop.f32.mrf.mxu1  ;;  %s5171_s0 = sshll.u32 %s8608_s12, 4  ;;  %s5172_s0 = int_to_ptr.vmem [resolvable:$true] %s5171_s0 }
 0x49c   :  { %5116 = vmatpush.bf16.msra.mxu1 %v7006_v19  ;;  %5140 = vmatpush.bf16.msra.mxu3 %v7566_v20  ;;  %v4852_v51 = vpop.f32.mrf.mxu2  ;;  %v4769_v52 = vadd.f32 %v8840_v17, %v3593_v44  ;;  %v4825_v0 = vadd.f32 %v4824_v43, %v3594_v45  ;;  %v4771_v5 = vadd.f32 %v4770_v37, %v3593_v44  ;;  %v3596_v20 = vperm.slane %v8850_v13, 3 }
 0x49d   :  { %v4827_v6 = vadd.f32 %v4826_v56, %v3594_v45 }
 0x49e   :  { %5128 = vmatpush.bf16.msra.mxu2 %v7286_v41  ;;  %v4783_v57 = vadd.f32 %v8842_v60, %v4769_v52  ;;  %v4839_v48 = vadd.f32 %v4838_v46, %v4825_v0  ;;  %v4785_v8 = vadd.f32 %v4784_v26, %v4771_v5 }
 0x49f   :  { %5117 = vmatmul.bf16.vlgmr.msra.gmra.mxu1 %v8811_v31  ;;  %v7230_v31 = vor.u32 %v8160_v38, %v7229_v36  ;;  %v4841_v61 = vadd.f32 %v4840_v4, %v4827_v6 }
 0x4a0   :  { %5141 = vmatpush.bf16.msra.mxu3 %v7538_v30  ;;  %v4797_v54 = vadd.f32 %v4796_v15, %v4783_v57  ;;  %v4853_v55 = vadd.f32 %v4852_v51, %v4839_v48  ;;  %v4799_v60 = vadd.f32 %v4798_v32, %v4785_v8  ;;  %v4880_v12 = vpop.f32.mrf.mxu0 }
 0x4a2   :  { %5129 = vmatpush.bf16.msra.mxu2 %v7258_v22  ;;  %v4866_v58 = vpop.f32.mrf.mxu3  ;;  %v4811_v1 = vadd.f32 %v4810_v27, %v4797_v54  ;;  %v4813_v63 = vadd.f32 %v4812_v47, %v4799_v60  ;;  %v4894_v14 = vpop.f32.mrf.mxu1  ;;  %v3597_v54 = vperm.slane %v8850_v13, 4 }
 0x4a3   :  { %v4867_v3 = vadd.f32 %v4866_v58, %v4853_v55  ;;  %v3598_v55 = vperm.slane %v8850_v13, 5 }
 0x4a4   :  { %5142 = vmatpush.bf16.msra.mxu3 %v7510_v35  ;;  %v4854_v7 = vpop.f32.mrf.mxu2 }
 0x4a5   :  { %v5151_v17 = vpack.c.bf16 %v4867_v3, %v4811_v1  ;;  %v4855_v9 = vadd.f32 %v4854_v7, %v4841_v61 }
 0x4a6   :  { %5130 = vmatpush.bf16.msra.mxu2 %v7230_v31 }
 0x4a7   :  { %5159 = vst [vmem:[#allocation20] sm:$0xff] %v5151_v17 }
 0x4a8   :  { %5143 = vmatpush.bf16.msra.mxu3 %v7482_v49  ;;  %v4882_v23 = vpop.f32.mrf.mxu0 }
 0x4a9   :  { %5131 = vmatmul.bf16.vlgmr.msra.gmra.mxu2 %v8815_v59 }
 0x4aa   :  { %v4868_v59 = vpop.f32.mrf.mxu3  ;;  %v4896_v18 = vpop.f32.mrf.mxu1 }
 0x4ab   :  { %v4869_v10 = vadd.f32 %v4868_v59, %v4855_v9 }
 0x4ac   :  { %5144 = vmatpush.bf16.msra.mxu3 %v7454_v53  ;;  %v4908_v15 = vpop.f32.mrf.mxu2 }
 0x4ad   :  { %v5155_v62 = vpack.c.bf16 %v4869_v10, %v4813_v63 }
 0x4af   :  { %5145 = vmatmul.bf16.vlgmr.msra.gmra.mxu3 %v8819_v25  ;;  %5163 = vst [vmem:[#allocation20 + $0x1c] sm:$0xff] %v5155_v62  ;;  %v3595_v25 = vperm.slane %v8850_v13, 2 }
 0x4b1   :  { %v4881_v2 = vadd.f32 %v4880_v12, %v3595_v25  ;;  %v4883_v35 = vadd.f32 %v4882_v23, %v3595_v25 }
 0x4b2   :  { %v4922_v16 = vpop.f32.mrf.mxu3 }
 0x4b3   :  { %v4895_v41 = vadd.f32 %v4894_v14, %v4881_v2  ;;  %v4897_v40 = vadd.f32 %v4896_v18, %v4883_v35 }
 0x4b4   :  { %v4910_v19 = vpop.f32.mrf.mxu2 }
 0x4b5   :  { %v4909_v30 = vadd.f32 %v4908_v15, %v4895_v41  ;;  %v4911_v44 = vadd.f32 %v4910_v19, %v4897_v40 }
 0x4b6   :  { %v4936_v37 = vpop.f32.mrf.mxu0 }
 0x4b7   :  { %v4937_v26 = vadd.f32 %v4936_v37, %v3596_v20  ;;  %v4923_v33 = vadd.f32 %v4922_v16, %v4909_v30 }
 0x4ba   :  { %v4924_v21 = vpop.f32.mrf.mxu3 }
 0x4bb   :  { %v4925_v46 = vadd.f32 %v4924_v21, %v4911_v44 }
 0x4bc   :  { %v4950_v42 = vpop.f32.mrf.mxu1 }
 0x4bd   :  { %v4951_v27 = vadd.f32 %v4950_v42, %v4937_v26  ;;  %v3599_v42 = vperm.slane %v8850_v13, 6 }
 0x4be   :  { %v4938_v29 = vpop.f32.mrf.mxu0 }
 0x4bf   :  { %v4939_v36 = vadd.f32 %v4938_v29, %v3596_v20 }
 0x4c4   :  { %v4952_v22 = vpop.f32.mrf.mxu1 }
 0x4c5   :  { %v4953_v43 = vadd.f32 %v4952_v22, %v4939_v36 }
 0x4cc   :  { %v4964_v24 = vpop.f32.mrf.mxu2 }
 0x4cd   :  { %v4965_v28 = vadd.f32 %v4964_v24, %v4951_v27 }
 0x4d2   :  { %v4978_v32 = vpop.f32.mrf.mxu3 }
 0x4d3   :  { %v4979_v34 = vadd.f32 %v4978_v32, %v4965_v28 }
 0x4d4   :  { %v4966_v39 = vpop.f32.mrf.mxu2 }
 0x4d5   :  { %v5152_v38 = vpack.c.bf16 %v4979_v34, %v4923_v33  ;;  %v4967_v45 = vadd.f32 %v4966_v39, %v4953_v43 }
 0x4d6   :  { %v4992_v50 = vpop.f32.mrf.mxu0 }
 0x4d7   :  { %5160 = vst [vmem:[#allocation20 + $0x8] sm:$0xff] %v5152_v38  ;;  %v4993_v3 = vadd.f32 %v4992_v50, %v3597_v54 }
 0x4da   :  { %v4980_v31 = vpop.f32.mrf.mxu3 }
 0x4db   :  { %v4981_v47 = vadd.f32 %v4980_v31, %v4967_v45 }
 0x4dc   :  { %v5006_v11 = vpop.f32.mrf.mxu1 }
 0x4dd   :  { %v5156_v49 = vpack.c.bf16 %v4981_v47, %v4925_v46  ;;  %v5007_v5 = vadd.f32 %v5006_v11, %v4993_v3 }
 0x4de   :  { %v4994_v52 = vpop.f32.mrf.mxu0 }
 0x4df   :  { %5164 = vst [vmem:[#allocation20 + $0x24] sm:$0xff] %v5156_v49  ;;  %v4995_v63 = vadd.f32 %v4994_v52, %v3597_v54 }
 0x4e4   :  { %v5008_v53 = vpop.f32.mrf.mxu1 }
 0x4e5   :  { %v5009_v14 = vadd.f32 %v5008_v53, %v4995_v63 }
 0x4ec   :  { %v5020_v51 = vpop.f32.mrf.mxu2 }
 0x4ed   :  { %v5021_v17 = vadd.f32 %v5020_v51, %v5007_v5 }
 0x4f2   :  { %v5034_v0 = vpop.f32.mrf.mxu3 }
 0x4f3   :  { %v5035_v60 = vadd.f32 %v5034_v0, %v5021_v17 }
 0x4f4   :  { %v5022_v57 = vpop.f32.mrf.mxu2 }
 0x4f5   :  { %v5023_v23 = vadd.f32 %v5022_v57, %v5009_v14 }
 0x4f6   :  { %v5048_v48 = vpop.f32.mrf.mxu0 }
 0x4f7   :  { %v5049_v4 = vadd.f32 %v5048_v48, %v3598_v55 }
 0x4fa   :  { %v5036_v58 = vpop.f32.mrf.mxu3 }
 0x4fb   :  { %v5037_v19 = vadd.f32 %v5036_v58, %v5023_v23 }
 0x4fc   :  { %v5062_v56 = vpop.f32.mrf.mxu1 }
 0x4fd   :  { %v5063_v6 = vadd.f32 %v5062_v56, %v5049_v4 }
 0x4fe   :  { %v5050_v8 = vpop.f32.mrf.mxu0 }
 0x4ff   :  { %v5051_v10 = vadd.f32 %v5050_v8, %v3598_v55 }
 0x504   :  { %v5064_v59 = vpop.f32.mrf.mxu1 }
 0x505   :  { %v5065_v15 = vadd.f32 %v5064_v59, %v5051_v10 }
 0x50c   :  { %v5076_v1 = vpop.f32.mrf.mxu2 }
 0x50d   :  { %v5077_v7 = vadd.f32 %v5076_v1, %v5063_v6 }
 0x512   :  { %v5090_v61 = vpop.f32.mrf.mxu3 }
 0x513   :  { %v5091_v9 = vadd.f32 %v5090_v61, %v5077_v7 }
 0x514   :  { %v5078_v12 = vpop.f32.mrf.mxu2 }
 0x515   :  { %v5153_v62 = vpack.c.bf16 %v5091_v9, %v5035_v60  ;;  %v5079_v16 = vadd.f32 %v5078_v12, %v5065_v15 }
 0x516   :  { %v5104_v20 = vpop.f32.mrf.mxu0 }
 0x517   :  { %5161 = vst [vmem:[#allocation20 + $0x10] sm:$0xff] %v5153_v62  ;;  %v5105_v24 = vadd.f32 %v5104_v20, %v3599_v42 }
 0x51a   :  { %v5092_v18 = vpop.f32.mrf.mxu3 }
 0x51b   :  { %v5093_v37 = vadd.f32 %v5092_v18, %v5079_v16 }
 0x51c   :  { %v5118_v21 = vpop.f32.mrf.mxu1 }
 0x51d   :  { %v5157_v25 = vpack.c.bf16 %v5093_v37, %v5037_v19  ;;  %v5119_v26 = vadd.f32 %v5118_v21, %v5105_v24 }
 0x51e   :  { %v5106_v27 = vpop.f32.mrf.mxu0 }
 0x51f   :  { %5165 = vst [vmem:[#allocation20 + $0x2c] sm:$0xff] %v5157_v25  ;;  %v5107_v32 = vadd.f32 %v5106_v27, %v3599_v42 }
 0x524   :  { %v5120_v29 = vpop.f32.mrf.mxu1 }
 0x525   :  { %v5121_v22 = vadd.f32 %v5120_v29, %v5107_v32 }
 0x52c   :  { %v5132_v2 = vpop.f32.mrf.mxu2 }
 0x52d   :  { %v5133_v41 = vadd.f32 %v5132_v2, %v5119_v26 }
 0x532   :  { %v5146_v30 = vpop.f32.mrf.mxu3 }
 0x533   :  { %v5147_v28 = vadd.f32 %v5146_v30, %v5133_v41 }
 0x534   :  { %v5134_v34 = vpop.f32.mrf.mxu2 }
 0x535   :  { %v5154_v33 = vpack.c.bf16 %v5147_v28, %v5147_v28  ;;  %v5135_v35 = vadd.f32 %v5134_v34, %v5121_v22 }
 0x537   :  { %5162 = vst [vmem:[#allocation20 + $0x18] sm:$0xf] %v5154_v33 }
 0x53a   :  { %v5148_v36 = vpop.f32.mrf.mxu3 }
 0x53b   :  { %v5149_v13 = vadd.f32 %v5148_v36, %v5135_v35 }
 0x53d   :  { %v5158_v38 = vpack.c.bf16 %v5149_v13, %v5149_v13 }
 0x53f   :  { %5166 = vst [vmem:[#allocation20 + $0x34] sm:$0xf] %v5158_v38 }
 0x540   :  { %5179 = dma.vmem_to_hbm [thread:$0]  %s5172_s0, 896, %s5174_s27, [#allocation4], %s8601_s3, %s8601_s3, %s8602_s9  }
 0x541   :  { %8587 = dma.done.wait [#allocation4], 896  }
 0x542   :  { %8588 = vsyncadd [#allocation4], 4294966400 }
 0x543   :  { %5184 = vsyncpa [#allocation3], 1 }
 0x544   :  { %5185 = vsyncpa [#allocation6], 1 }
 0x545   :  { %5186 = vsyncpa [#allocation9], 1 }
 0x546   :  { %5187 = vsyncpa [#allocation12], 1 }
 0x547   :  { %5188 = vsyncpa [#allocation15], 1 }
 0x548   :  { %5189 = vsyncpa [#allocation18], 1 }
 0x549   :  { %5190 = vsyncpa [#allocation4], 1 }

</bundles_post_ra>
